<compile_context>
chip_gen: v6e
topology: v6e:2x2x1
jax: 0.10.0
libtpu: 0.0.40
codegen_flags: <defaults>
</compile_context>

<pallas_src>
import jax
import jax.numpy as jnp
from jax import lax
from jax.experimental import pallas as pl
from jax.experimental.pallas import tpu as pltpu

BN_EPS = 1e-5


def _aux_inception_kernel(x_ref, wpc_ref, bpc_ref, w1_ref, b1_ref, w2_ref, b2_ref,
                          o_ref):
    """[pool+conv1x1+BN folded matmul] -> ReLU -> fc1 -> ReLU -> fc2 (padded, lane-dense)."""
    # AvgPool1d(5,3) + Conv1d(k=1) + BN fold + channel-major flatten, all folded
    # into ONE f32 matmul with K = C*L (tiny), columns indexed c_out*Lp + p.
    h = jnp.dot(x_ref[...], wpc_ref[...],
                preferred_element_type=jnp.float32)              # (N, 2048) f32
    h = jnp.maximum(h + bpc_ref[...], 0.0)                       # bias+BN+ReLU

    # fc1: bf16 weights, f32 accumulation, f32 bias/ReLU.
    z = jnp.dot(h.astype(jnp.bfloat16), w1_ref[...],
                preferred_element_type=jnp.float32)              # (N, 1024) f32
    z = jnp.maximum(z + b1_ref[...], 0.0)
    # TODO(synk): nn.Dropout(0.7) is identity in eval mode; training-time
    # stochastic masking is intentionally not applied here.

    # fc2: bf16 weights padded to a lane-dense 128-wide output, single f32 store.
    o_ref[...] = (jnp.dot(z.astype(jnp.bfloat16), w2_ref[...],
                          preferred_element_type=jnp.float32) + b2_ref[...])


def prepare_params(raw_params, L):
    """One-time parameter re-layout + BN/pool/conv fold + bf16 cast (cache the result)."""
    (conv_w, conv_b, gamma, beta, rmean, rvar,
     fc1_w, fc1_b, fc2_w, fc2_b) = raw_params

    co, C = conv_w.shape                       # (512, in_channels)
    hidden, feat = fc1_w.shape                 # (1024, 2048)
    lp = feat // co                            # Lp positions after AvgPool1d(5,3)
    out_dim = fc2_w.shape[0]

    # Fold BatchNorm1d (running stats) + conv bias into the conv weight/bias.
    scale = gamma * lax.rsqrt(rvar + BN_EPS)                     # (512,)
    shift = beta - rmean * scale                                 # (512,)
    conv_ws = conv_w * scale[:, None]                            # (512, C)
    bias_c = conv_b * scale + shift                              # (512,)

    # Pooling matrix: pool_mat[l, p] = 1/5 iff 3p <= l < 3p+5 (AvgPool1d(5,3)).
    l_idx = jnp.arange(L)[:, None]
    p_idx = jnp.arange(lp)[None, :]
    pool_mat = (((l_idx >= 3 * p_idx) & (l_idx < 3 * p_idx + 5))
                .astype(jnp.float32) / 5.0)                      # (L, Lp)

    # Folded pool+conv matrix: row index c*L + l (matches x.reshape(N, C*L)),
    # column index c_out*Lp + p (matches PyTorch's channel-major flatten, so
    # fc1.weight.T is used directly with NO permutation).
    wpc = jnp.einsum('oc,lp->clop', conv_ws, pool_mat).reshape(C * L, co * lp)
    wpc = wpc.astype(jnp.float32)                                # (C*L, 2048) f32, ~512 KiB
    bpc = jnp.repeat(bias_c, lp).reshape(1, feat).astype(jnp.float32)

    w1t = fc1_w.T.astype(jnp.bfloat16)                           # (2048, 1024) bf16
    b1 = fc1_b.reshape(1, hidden).astype(jnp.float32)

    # Pad fc2 output to a lane-dense multiple of 128.
    out_pad = max(128, ((out_dim + 127) // 128) * 128)
    w2t = jnp.zeros((hidden, out_pad), jnp.bfloat16)
    w2t = w2t.at[:, :out_dim].set(fc2_w.T.astype(jnp.bfloat16))  # (1024, 128) bf16
    b2 = jnp.zeros((1, out_pad), jnp.float32).at[:, :out_dim].set(fc2_b)

    return (wpc, bpc, w1t, b1, w2t, b2)


def aux_inception_forward(x, prepared, out_dim):
    """Forward pass. `prepared` must come from prepare_params (cached)."""
    wpc, bpc, w1t, b1, w2t, b2 = prepared
    N, C, L = x.shape
    feat, hidden = w1t.shape
    out_pad = w2t.shape[1]
    assert wpc.shape == (C * L, feat), "folded pool+conv matrix shape mismatch"

    x2d = x.reshape(N, C * L)                   # trivial relayout outside the kernel

    vmem_spec = pl.BlockSpec(memory_space=pltpu.MemorySpace.VMEM)
    out_padded = pl.pallas_call(
        _aux_inception_kernel,
        out_shape=jax.ShapeDtypeStruct((N, out_pad), jnp.float32),
        in_specs=[vmem_spec] * 7,
        out_specs=vmem_spec,
        compiler_params=pltpu.CompilerParams(
            # ~4.8 MiB of weights; 32 MiB is comfortably safe on v5e/v6e/v7x.
            vmem_limit_bytes=32 * 1024 * 1024),
        # NOTE: grid-less (single step) on purpose — the whole problem fits in
        # VMEM and is HBM-weight-stream bound.  If N is batched up, add a
        # leading "parallel" batch grid axis to shard across v7x's 2 TCs.
    )(x2d, wpc, bpc, w1t, b1, w2t, b2)

    return out_padded[:, :out_dim]


def init_raw_params(key, in_channels, out_dim):
    """Deterministic synthetic parameters matching the PyTorch module shapes."""
    ks = jax.random.split(key, 10)
    conv_w = 0.05 * jax.random.normal(ks[0], (512, in_channels), jnp.float32)  # Conv1d k=1
    conv_b = 0.05 * jax.random.normal(ks[1], (512,), jnp.float32)
    gamma = 1.0 + 0.1 * jax.random.normal(ks[2], (512,), jnp.float32)          # BN weight
    beta = 0.1 * jax.random.normal(ks[3], (512,), jnp.float32)                 # BN bias
    rmean = 0.1 * jax.random.normal(ks[4], (512,), jnp.float32)                # running_mean
    rvar = jax.random.uniform(ks[5], (512,), jnp.float32, 0.5, 1.5)            # running_var
    fc1_w = 0.02 * jax.random.normal(ks[6], (1024, 2048), jnp.float32)
    fc1_b = 0.02 * jax.random.normal(ks[7], (1024,), jnp.float32)
    fc2_w = 0.02 * jax.random.normal(ks[8], (out_dim, 1024), jnp.float32)
    fc2_b = 0.02 * jax.random.normal(ks[9], (out_dim,), jnp.float32)
    return (conv_w, conv_b, gamma, beta, rmean, rvar, fc1_w, fc1_b, fc2_w, fc2_b)


def reference_forward(x, raw_params):
    """Pure-JAX f32 mirror of the PyTorch forward (eval mode) for validation."""
    (conv_w, conv_b, gamma, beta, rmean, rvar,
     fc1_w, fc1_b, fc2_w, fc2_b) = raw_params
    N, C, L = x.shape
    Lp = (L - 5) // 3 + 1
    pooled = jnp.stack(
        [x[:, :, 3 * i:3 * i + 5].mean(axis=-1) for i in range(Lp)], axis=-1)   # (N, C, Lp)
    h = jnp.einsum('ncp,oc->nop', pooled, conv_w) + conv_b[None, :, None]       # (N, 512, Lp)
    h = (gamma[None, :, None] * (h - rmean[None, :, None])
         / jnp.sqrt(rvar[None, :, None] + BN_EPS) + beta[None, :, None])
    h = jnp.maximum(h, 0.0)
    flat = h.reshape(N, -1)                                                     # channel-major
    z = jnp.maximum(flat @ fc1_w.T + fc1_b, 0.0)
    return z @ fc2_w.T + fc2_b


if __name__ == "__main__":
    N, C, L, OUT_DIM = 2, 4, 16, 10   # L=16 -> Lp=4 -> 512*4 = 2048 fc1 features
    key = jax.random.PRNGKey(0)
    kx, kp = jax.random.split(key)

    x = jax.random.normal(kx, (N, C, L), jnp.float32)
    raw_params = init_raw_params(kp, C, OUT_DIM)

    # One-time (cached) parameter fold + re-layout -- NOT part of the per-call path.
    prepared = jax.block_until_ready(prepare_params(raw_params, L))

    fwd = jax.jit(aux_inception_forward, static_argnums=(2,))
    out = jax.block_until_ready(fwd(x, prepared, OUT_DIM))

    ref = jax.block_until_ready(reference_forward(x, raw_params))
    assert out.shape == (N, OUT_DIM)
    # bf16 fc1/fc2 weights => slightly looser tolerance vs the f32 reference.
    assert jnp.allclose(out, ref, rtol=1e-2, atol=1e-2), "kernel mismatch vs reference"

    print("KERNEL_OK")
</pallas_src>

<mosaic_0001>
module attributes {stable_mosaic.version = 11 : i64} {
  func.func @_aux_inception_kernel(%arg0: memref<2x64xf32, #tpu.memory_space<vmem>>, %arg1: memref<64x2048xf32, #tpu.memory_space<vmem>>, %arg2: memref<1x2048xf32, #tpu.memory_space<vmem>>, %arg3: memref<2048x1024xbf16, #tpu.memory_space<vmem>>, %arg4: memref<1x1024xf32, #tpu.memory_space<vmem>>, %arg5: memref<1024x128xbf16, #tpu.memory_space<vmem>>, %arg6: memref<1x128xf32, #tpu.memory_space<vmem>>, %arg7: memref<2x128xf32, #tpu.memory_space<vmem>>) attributes {dimension_semantics = [], scalar_prefetch = 0 : i64, scratch_operands = 0 : i64, tpu.core_type = #tpu.core_type<tc>} {
    %c0 = arith.constant 0 : index
    %c0_0 = arith.constant 0 : index
    %0 = vector.load %arg0[%c0, %c0_0] : memref<2x64xf32, #tpu.memory_space<vmem>>, vector<2x64xf32>
    %c0_1 = arith.constant 0 : index
    %c0_2 = arith.constant 0 : index
    %1 = vector.load %arg1[%c0_1, %c0_2] : memref<64x2048xf32, #tpu.memory_space<vmem>>, vector<64x2048xf32>
    %cst = arith.constant dense<0.000000e+00> : vector<2x2048xf32>
    %2 = tpu.matmul %0, %1, %cst {dimension_numbers = #tpu.dot_dimension_numbers<[1], [0], [0], [1], [0, 0, 1, 1], [], []>} : vector<2x64xf32>, vector<64x2048xf32>, vector<2x2048xf32> -> vector<2x2048xf32>
    %c0_3 = arith.constant 0 : index
    %c0_4 = arith.constant 0 : index
    %3 = vector.load %arg2[%c0_3, %c0_4] : memref<1x2048xf32, #tpu.memory_space<vmem>>, vector<1x2048xf32>
    %4 = vector.broadcast %3 : vector<1x2048xf32> to vector<2x2048xf32>
    %5 = arith.addf %2, %4 : vector<2x2048xf32>
    %cst_5 = arith.constant 0.000000e+00 : f32
    %6 = vector.broadcast %cst_5 : f32 to vector<2x2048xf32>
    %7 = arith.maximumf %5, %6 : vector<2x2048xf32>
    %8 = arith.truncf %7 : vector<2x2048xf32> to vector<2x2048xbf16>
    %c0_6 = arith.constant 0 : index
    %c0_7 = arith.constant 0 : index
    %9 = vector.load %arg3[%c0_6, %c0_7] : memref<2048x1024xbf16, #tpu.memory_space<vmem>>, vector<2048x1024xbf16>
    %cst_8 = arith.constant dense<0.000000e+00> : vector<2x1024xf32>
    %10 = tpu.matmul %8, %9, %cst_8 {dimension_numbers = #tpu.dot_dimension_numbers<[1], [0], [0], [1], [0, 0, 1, 1], [], []>} : vector<2x2048xbf16>, vector<2048x1024xbf16>, vector<2x1024xf32> -> vector<2x1024xf32>
    %c0_9 = arith.constant 0 : index
    %c0_10 = arith.constant 0 : index
    %11 = vector.load %arg4[%c0_9, %c0_10] : memref<1x1024xf32, #tpu.memory_space<vmem>>, vector<1x1024xf32>
    %12 = vector.broadcast %11 : vector<1x1024xf32> to vector<2x1024xf32>
    %13 = arith.addf %10, %12 : vector<2x1024xf32>
    %cst_11 = arith.constant 0.000000e+00 : f32
    %14 = vector.broadcast %cst_11 : f32 to vector<2x1024xf32>
    %15 = arith.maximumf %13, %14 : vector<2x1024xf32>
    %16 = arith.truncf %15 : vector<2x1024xf32> to vector<2x1024xbf16>
    %c0_12 = arith.constant 0 : index
    %c0_13 = arith.constant 0 : index
    %17 = vector.load %arg5[%c0_12, %c0_13] : memref<1024x128xbf16, #tpu.memory_space<vmem>>, vector<1024x128xbf16>
    %cst_14 = arith.constant dense<0.000000e+00> : vector<2x128xf32>
    %18 = tpu.matmul %16, %17, %cst_14 {dimension_numbers = #tpu.dot_dimension_numbers<[1], [0], [0], [1], [0, 0, 1, 1], [], []>} : vector<2x1024xbf16>, vector<1024x128xbf16>, vector<2x128xf32> -> vector<2x128xf32>
    %c0_15 = arith.constant 0 : index
    %c0_16 = arith.constant 0 : index
    %19 = vector.load %arg6[%c0_15, %c0_16] : memref<1x128xf32, #tpu.memory_space<vmem>>, vector<1x128xf32>
    %20 = vector.broadcast %19 : vector<1x128xf32> to vector<2x128xf32>
    %21 = arith.addf %18, %20 : vector<2x128xf32>
    %c0_17 = arith.constant 0 : index
    %c0_18 = arith.constant 0 : index
    %22 = vector.load %arg7[%c0_17, %c0_18] : memref<2x128xf32, #tpu.memory_space<vmem>>, vector<2x128xf32>
    tpu.vector_store %arg7[%c0_17, %c0_18], %21 {strides = array<i32>} : memref<2x128xf32, #tpu.memory_space<vmem>>, vector<2x128xf32>,
    return
  }
}

</mosaic_0001>

<bundles_post_ra>
// kernel: aux_inception_forward.1
= control target key start
LH: loop header
LB: loop body
LE: loop exit
PB: predicated region body
PF: predicated region fallthrough
CT: control target
= control target key end

     0   :  { %12 = vsyncpa [#allocation3], 0  ;;  %s10937_s0 = inlined_call_operand.vmem [shape: f32[2,64], index: 0, kind: input, shape index: {}]   ;;  %s10938_s1 = inlined_call_operand.hbm [shape: f32[64,2048], index: 1, kind: input, shape index: {}]   ;;  %s10939_s2 = inlined_call_operand.hbm [shape: f32[1,2048], index: 2, kind: input, shape index: {}]   ;;  %s10940_s3 = inlined_call_operand.hbm [shape: bf16[2048,1024], index: 3, kind: input, shape index: {}]   ;;  %s10941_s4 = inlined_call_operand.hbm [shape: f32[1,1024], index: 4, kind: input, shape index: {}]   ;;  %s10942_s5 = inlined_call_operand.hbm [shape: bf16[1024,128], index: 5, kind: input, shape index: {}]   ;;  %s10943_s6 = inlined_call_operand.hbm [shape: f32[1,128], index: 6, kind: input, shape index: {}]   ;;  %s10944_s7 = inlined_call_operand.hbm [shape: f32[2,128], index: 7, kind: output, shape index: {}]  }
   0x1   :  { %13 = vsyncpa [#allocation6], 0 }
   0x2   :  { %14 = vsyncpa [#allocation9], 0 }
   0x3   :  { %15 = vsyncpa [#allocation12], 0 }
   0x4   :  { %16 = vsyncpa [#allocation4], 0  ;;  %s10549_s24 = smov [#allocation5]   ;;  %s10550_s26 = smov [#allocation8]  }
   0x5   :  { %s37_s25 = sshll.u32 %s10549_s24, 4  ;;  %s59_s27 = sshll.u32 %s10550_s26, 4  ;;  %s38_s25 = int_to_ptr.vmem [resolvable:$true] %s37_s25  ;;  %s60_s27 = int_to_ptr.vmem [resolvable:$true] %s59_s27 }
   0x6   :  { %s10407_s28 = scalar_lea.vmem %s38_s25, 256  ;;  %p10412_p1 = scmp.lt.s32.totalorder %s38_s25, %s38_s25 }
   0x7   :  { %p10408_p0 = scmp.ne.s32.totalorder %s38_s25, %s10407_s28  ;;  %p10413_p2 = scmp.lt.s32.totalorder %s10407_s28, %s10407_s28 }
   0x9   :  { %p10414_p3 = por %p10413_p2, %p10412_p1 }
   0xb   :  { %p10415_p4 = pnand %p10414_p3, %p10408_p0 }
   0xd   :  { %10418 = shalt.err (!%p10415_p4)
}
   0xe   :  { %40 = dma.hbm_to_vmem [thread:$0]  %s10939_s2, 256, %s38_s25, [#allocation6]  }
   0xf   :  { %s10427_s8 = scalar_lea.vmem %s60_s27, 128  ;;  %p10432_p6 = scmp.lt.s32.totalorder %s60_s27, %s60_s27 }
  0x10   :  { %p10428_p5 = scmp.ne.s32.totalorder %s60_s27, %s10427_s8  ;;  %p10433_p7 = scmp.lt.s32.totalorder %s10427_s8, %s10427_s8 }
  0x12   :  { %p10434_p8 = por %p10433_p7, %p10432_p6 }
  0x14   :  { %p10435_p9 = pnand %p10434_p8, %p10428_p5 }
  0x16   :  { %10438 = shalt.err (!%p10435_p9)
}
  0x17   :  { %62 = dma.hbm_to_vmem [thread:$0]  %s10941_s4, 128, %s60_s27, [#allocation9]  }
  0x18   :  { %s10551_s11 = smov [#allocation2]  }
  0x19   :  { %s24_s12 = sshll.u32 %s10551_s11, 4  ;;  %s25_s12 = int_to_ptr.vmem [resolvable:$true] %s24_s12 }
  0x1a   :  { %s10447_s13 = scalar_lea.vmem %s25_s12, 16384  ;;  %p10452_p11 = scmp.lt.s32.totalorder %s25_s12, %s25_s12 }
  0x1b   :  { %p10448_p10 = scmp.ne.s32.totalorder %s25_s12, %s10447_s13  ;;  %p10453_p12 = scmp.lt.s32.totalorder %s10447_s13, %s10447_s13 }
  0x1d   :  { %p10454_p13 = por %p10453_p12, %p10452_p11 }
  0x1f   :  { %p10455_p0 = pnand %p10454_p13, %p10448_p10 }
  0x21   :  { %10458 = shalt.err (!%p10455_p0)
}
  0x22   :  { %s10552_s2 = smov 2048   ;;  %s10553_s14 = smov 128  }
  0x23   :  { %30 = dma.hbm_to_vmem [thread:$0]  %s10938_s1, 16384, %s25_s12, [#allocation3], %s10552_s2, %s10552_s2, %s10553_s14  }
  0x24   :  { %s10554_s17 = smov [#allocation7]  }
  0x25   :  { %s46_s18 = sshll.u32 %s10554_s17, 4  ;;  %s47_s18 = int_to_ptr.vmem [resolvable:$true] %s46_s18 }
  0x26   :  { %s10467_s4 = scalar_lea.vmem %s47_s18, 131072  ;;  %p10472_p2 = scmp.lt.s32.totalorder %s47_s18, %s47_s18 }
  0x27   :  { %p10468_p1 = scmp.ne.s32.totalorder %s47_s18, %s10467_s4  ;;  %p10473_p3 = scmp.lt.s32.totalorder %s10467_s4, %s10467_s4 }
  0x29   :  { %p10474_p4 = por %p10473_p3, %p10472_p2 }
  0x2b   :  { %p10475_p5 = pnand %p10474_p4, %p10468_p1 }
  0x2d   :  { %10478 = shalt.err (!%p10475_p5)
}
  0x2e   :  { %s10555_s19 = smov 512   ;;  %s10556_s20 = smov 32  }
  0x2f   :  { %52 = dma.hbm_to_vmem [thread:$0]  %s10940_s3, 131072, %s47_s18, [#allocation6], %s10555_s19, %s10555_s19, %s10556_s20  }
  0x30   :  { %s10557_s23 = smov [#allocation10]  }
  0x31   :  { %s68_s24 = sshll.u32 %s10557_s23, 4  ;;  %s69_s24 = int_to_ptr.vmem [resolvable:$true] %s68_s24 }
  0x32   :  { %s10487_s1 = scalar_lea.vmem %s69_s24, 8192  ;;  %p10492_p7 = scmp.lt.s32.totalorder %s69_s24, %s69_s24 }
  0x33   :  { %p10488_p6 = scmp.ne.s32.totalorder %s69_s24, %s10487_s1  ;;  %p10493_p8 = scmp.lt.s32.totalorder %s10487_s1, %s10487_s1 }
  0x35   :  { %p10494_p9 = por %p10493_p8, %p10492_p7 }
  0x37   :  { %p10495_p10 = pnand %p10494_p9, %p10488_p6 }
  0x39   :  { %10498 = shalt.err (!%p10495_p10)
}
  0x3a   :  { %s10558_s25 = smov 64   ;;  %s10559_s26 = smov 4  }
  0x3b   :  { %74 = dma.hbm_to_vmem [thread:$0]  %s10942_s5, 8192, %s69_s24, [#allocation9], %s10558_s25, %s10558_s25, %s10559_s26  }
  0x3c   :  { %s10560_s29 = smov [#allocation11]  }
  0x3d   :  { %s81_s30 = sshll.u32 %s10560_s29, 4  ;;  %s82_s30 = int_to_ptr.vmem [resolvable:$true] %s81_s30 }
  0x3e   :  { %s10507_s3 = scalar_lea.vmem %s82_s30, 16  ;;  %s10511_s8 = scalar_lea.vmem %s82_s30, 32 }
  0x3f   :  { %p10508_p11 = scmp.ne.s32.totalorder %s82_s30, %s10507_s3  ;;  %p10512_p12 = scmp.lt.s32.totalorder %s82_s30, %s82_s30 }
  0x40   :  { %p10513_p13 = scmp.lt.s32.totalorder %s10511_s8, %s10507_s3 }
  0x42   :  { %p10514_p0 = por %p10513_p13, %p10512_p12 }
  0x44   :  { %p10515_p1 = pnand %p10514_p0, %p10508_p11 }
  0x46   :  { %10518 = shalt.err (!%p10515_p1)
}
  0x47   :  { %84 = dma.hbm_to_vmem [thread:$0]  %s10943_s6, 16, %s82_s30, [#allocation12]  }
  0x48   :  { %10539 = dma.done.wait [#allocation3], 16384  }
  0x49   :  { %10540 = vsyncadd [#allocation3], 4294950912 }
  0x4a   :  { %10541 = dma.done.wait [#allocation6], 131328  }
  0x4b   :  { %10542 = vsyncadd [#allocation6], 4294835968 }
  0x4c   :  { %10543 = dma.done.wait [#allocation9], 8320  }
  0x4d   :  { %10544 = vsyncadd [#allocation9], 4294958976 }
  0x4e   :  { %10545 = dma.done.wait [#allocation12], 16  }
  0x4f   :  { %10546 = vsyncadd [#allocation12], 4294967280  ;;  %v10561_v0 = vmov 0.0   ;;  %v218_v1 = vld [vmem:[#allocation2 + $0x388] sm:$0xff]  ;;  %v220_v2 = vld [vmem:[#allocation2 + $0x398] sm:$0xff]  ;;  %vm317_vm0 = vcmask 523264  }
  0x50   :  { %385 = vmatprep.mubr.f32.mxu0 %v10561_v0  ;;  %456 = vmatprep.mubr.f32.mxu1 %v10561_v0  ;;  %v217_v3 = vld [vmem:[#allocation2 + $0x380] sm:$0xff]  ;;  %v219_v4 = vld [vmem:[#allocation2 + $0x390] sm:$0xff]  ;;  %v202_v5 = vld [vmem:[#allocation2 + $0x308] sm:$0xff] }
  0x51   :  { %337 = vmatprep.subr.mxu0 %v218_v1  ;;  %408 = vmatprep.subr.mxu1 %v220_v2  ;;  %v204_v6 = vld [vmem:[#allocation2 + $0x318] sm:$0xff]  ;;  %v201_v7 = vld [vmem:[#allocation2 + $0x300] sm:$0xff]  ;;  %v203_v8 = vld [vmem:[#allocation2 + $0x310] sm:$0xff] }
  0x52   :  { %338 = vmatpush1.msra.mxu0 %v217_v3  ;;  %409 = vmatpush1.msra.mxu1 %v219_v4  ;;  %v186_v9 = vld [vmem:[#allocation2 + $0x288] sm:$0xff]  ;;  %v188_v10 = vld [vmem:[#allocation2 + $0x298] sm:$0xff]  ;;  %v185_v11 = vld [vmem:[#allocation2 + $0x280] sm:$0xff] }
  0x53   :  { %339 = vmatprep.subr.mxu0 %v202_v5  ;;  %410 = vmatprep.subr.mxu1 %v204_v6  ;;  %v187_v12 = vld [vmem:[#allocation2 + $0x290] sm:$0xff]  ;;  %v170_v13 = vld [vmem:[#allocation2 + $0x208] sm:$0xff]  ;;  %v172_v14 = vld [vmem:[#allocation2 + $0x218] sm:$0xff] }
  0x54   :  { %340 = vmatpush1.msra.mxu0 %v201_v7  ;;  %411 = vmatpush1.msra.mxu1 %v203_v8  ;;  %v169_v15 = vld [vmem:[#allocation2 + $0x200] sm:$0xff]  ;;  %v171_v16 = vld [vmem:[#allocation2 + $0x210] sm:$0xff]  ;;  %v154_v17 = vld [vmem:[#allocation2 + $0x188] sm:$0xff] }
  0x55   :  { %341 = vmatprep.subr.mxu0 %v186_v9  ;;  %412 = vmatprep.subr.mxu1 %v188_v10  ;;  %v156_v18 = vld [vmem:[#allocation2 + $0x198] sm:$0xff]  ;;  %v153_v19 = vld [vmem:[#allocation2 + $0x180] sm:$0xff]  ;;  %v155_v20 = vld [vmem:[#allocation2 + $0x190] sm:$0xff] }
  0x56   :  { %342 = vmatpush1.msra.mxu0 %v185_v11  ;;  %413 = vmatpush1.msra.mxu1 %v187_v12  ;;  %v138_v21 = vld [vmem:[#allocation2 + $0x108] sm:$0xff]  ;;  %v140_v22 = vld [vmem:[#allocation2 + $0x118] sm:$0xff]  ;;  %v137_v23 = vld [vmem:[#allocation2 + $0x100] sm:$0xff] }
  0x57   :  { %343 = vmatprep.subr.mxu0 %v170_v13  ;;  %414 = vmatprep.subr.mxu1 %v172_v14  ;;  %v139_v24 = vld [vmem:[#allocation2 + $0x110] sm:$0xff]  ;;  %v122_v25 = vld [vmem:[#allocation2 + $0x88] sm:$0xff]  ;;  %v124_v26 = vld [vmem:[#allocation2 + $0x98] sm:$0xff] }
  0x58   :  { %344 = vmatpush1.msra.mxu0 %v169_v15  ;;  %415 = vmatpush1.msra.mxu1 %v171_v16  ;;  %v121_v27 = vld [vmem:[#allocation2 + $0x80] sm:$0xff]  ;;  %v123_v28 = vld [vmem:[#allocation2 + $0x90] sm:$0xff]  ;;  %v106_v29 = vld [vmem:[#allocation2 + $0x8] sm:$0xff] }
  0x59   :  { %345 = vmatprep.subr.mxu0 %v154_v17  ;;  %416 = vmatprep.subr.mxu1 %v156_v18  ;;  %v108_v30 = vld [vmem:[#allocation2 + $0x18] sm:$0xff]  ;;  %v105_v31 = vld [vmem:[#allocation2] sm:$0xff]  ;;  %v107_v32 = vld [vmem:[#allocation2 + $0x10] sm:$0xff] }
  0x5a   :  { %346 = vmatpush1.msra.mxu0 %v153_v19  ;;  %417 = vmatpush1.msra.mxu1 %v155_v20  ;;  %v10626_v33 = vld [vmem:[%s10937_s0] sm:$0x3]  ;;  %v222_v34 = vld [vmem:[#allocation2 + $0x3a8] sm:$0xff]  ;;  %v224_v35 = vld [vmem:[#allocation2 + $0x3b8] sm:$0xff]  ;;  %s10562_s0 = smov [#allocation13]  }
  0x5b   :  { %347 = vmatprep.subr.mxu0 %v138_v21  ;;  %418 = vmatprep.subr.mxu1 %v140_v22  ;;  %v221_v36 = vld [vmem:[#allocation2 + $0x3a0] sm:$0xff]  ;;  %v223_v37 = vld [vmem:[#allocation2 + $0x3b0] sm:$0xff]  ;;  %v206_v38 = vld [vmem:[#allocation2 + $0x328] sm:$0xff]  ;;  %s9121_s11 = sshll.u32 %s10562_s0, 4  ;;  %s9122_s11 = int_to_ptr.vmem [resolvable:$true] %s9121_s11 }
  0x5c   :  { %348 = vmatpush1.msra.mxu0 %v137_v23  ;;  %419 = vmatpush1.msra.mxu1 %v139_v24  ;;  %v208_v39 = vld [vmem:[#allocation2 + $0x338] sm:$0xff]  ;;  %v205_v40 = vld [vmem:[#allocation2 + $0x320] sm:$0xff]  ;;  %v207_v41 = vld [vmem:[#allocation2 + $0x330] sm:$0xff]  ;;  %s10519_s12 = scalar_lea.vmem %s9122_s11, 32  ;;  %p10524_p3 = scmp.lt.s32.totalorder %s9122_s11, %s9122_s11 }
  0x5d   :  { %349 = vmatprep.subr.mxu0 %v122_v25  ;;  %420 = vmatprep.subr.mxu1 %v124_v26  ;;  %v190_v42 = vld [vmem:[#allocation2 + $0x2a8] sm:$0xff]  ;;  %v192_v43 = vld [vmem:[#allocation2 + $0x2b8] sm:$0xff]  ;;  %v189_v44 = vld [vmem:[#allocation2 + $0x2a0] sm:$0xff]  ;;  %p10520_p2 = scmp.ne.s32.totalorder %s9122_s11, %s10519_s12  ;;  %p10525_p4 = scmp.lt.s32.totalorder %s10519_s12, %s10519_s12 }
  0x5e   :  { %350 = vmatpush1.msra.mxu0 %v121_v27  ;;  %421 = vmatpush1.msra.mxu1 %v123_v28  ;;  %v191_v45 = vld [vmem:[#allocation2 + $0x2b0] sm:$0xff]  ;;  %v174_v46 = vld [vmem:[#allocation2 + $0x228] sm:$0xff]  ;;  %v176_v47 = vld [vmem:[#allocation2 + $0x238] sm:$0xff] }
  0x5f   :  { %351 = vmatprep.subr.mxu0 %v106_v29  ;;  %422 = vmatprep.subr.mxu1 %v108_v30  ;;  %v173_v48 = vld [vmem:[#allocation2 + $0x220] sm:$0xff]  ;;  %v175_v49 = vld [vmem:[#allocation2 + $0x230] sm:$0xff]  ;;  %v158_v50 = vld [vmem:[#allocation2 + $0x1a8] sm:$0xff]  ;;  %p10526_p5 = por %p10525_p4, %p10524_p3 }
  0x60   :  { %352 = vmatpush1.msra.mxu0 %v105_v31  ;;  %423 = vmatpush1.msra.mxu1 %v107_v32  ;;  %v160_v51 = vld [vmem:[#allocation2 + $0x1b8] sm:$0xff]  ;;  %v157_v52 = vld [vmem:[#allocation2 + $0x1a0] sm:$0xff]  ;;  %v159_v53 = vld [vmem:[#allocation2 + $0x1b0] sm:$0xff] }
  0x61   :  { %9133 = vmatmul.mubr.msk.f32.vlgmr.msra.gmra.mxu0 %vm317_vm0, %v10626_v33  ;;  %9134 = vmatmul.mubr.msk.f32.vlgmr.msra.gmra.mxu1 %vm317_vm0, %v10626_v33  ;;  %v142_v54 = vld [vmem:[#allocation2 + $0x128] sm:$0xff]  ;;  %v144_v55 = vld [vmem:[#allocation2 + $0x138] sm:$0xff]  ;;  %v141_v56 = vld [vmem:[#allocation2 + $0x120] sm:$0xff]  ;;  %p10527_p6 = pnand %p10526_p5, %p10520_p2 }
  0x62   :  { %479 = vmatprep.subr.mxu0 %v222_v34  ;;  %550 = vmatprep.subr.mxu1 %v224_v35  ;;  %v143_v57 = vld [vmem:[#allocation2 + $0x130] sm:$0xff]  ;;  %v126_v58 = vld [vmem:[#allocation2 + $0xa8] sm:$0xff]  ;;  %v128_v59 = vld [vmem:[#allocation2 + $0xb8] sm:$0xff] }
  0x63   :  { %480 = vmatpush1.msra.mxu0 %v221_v36  ;;  %551 = vmatpush1.msra.mxu1 %v223_v37  ;;  %v125_v60 = vld [vmem:[#allocation2 + $0xa0] sm:$0xff]  ;;  %v127_v61 = vld [vmem:[#allocation2 + $0xb0] sm:$0xff]  ;;  %v110_v62 = vld [vmem:[#allocation2 + $0x28] sm:$0xff] }
  0x64   :  { %481 = vmatprep.subr.mxu0 %v206_v38  ;;  %552 = vmatprep.subr.mxu1 %v208_v39  ;;  %v109_v63 = vld [vmem:[#allocation2 + $0x20] sm:$0xff]  ;;  %v112_v1 = vld [vmem:[#allocation2 + $0x38] sm:$0xff]  ;;  %v111_v2 = vld [vmem:[#allocation2 + $0x30] sm:$0xff] }
  0x65   :  { %482 = vmatpush1.msra.mxu0 %v205_v40  ;;  %553 = vmatpush1.msra.mxu1 %v207_v41  ;;  %v226_v3 = vld [vmem:[#allocation2 + $0x3c8] sm:$0xff]  ;;  %v225_v4 = vld [vmem:[#allocation2 + $0x3c0] sm:$0xff]  ;;  %v228_v5 = vld [vmem:[#allocation2 + $0x3d8] sm:$0xff] }
  0x66   :  { %483 = vmatprep.subr.mxu0 %v190_v42  ;;  %554 = vmatprep.subr.mxu1 %v192_v43  ;;  %v210_v6 = vld [vmem:[#allocation2 + $0x348] sm:$0xff]  ;;  %v227_v7 = vld [vmem:[#allocation2 + $0x3d0] sm:$0xff]  ;;  %v209_v8 = vld [vmem:[#allocation2 + $0x340] sm:$0xff] }
  0x67   :  { %484 = vmatpush1.msra.mxu0 %v189_v44  ;;  %555 = vmatpush1.msra.mxu1 %v191_v45  ;;  %v212_v9 = vld [vmem:[#allocation2 + $0x358] sm:$0xff]  ;;  %v194_v10 = vld [vmem:[#allocation2 + $0x2c8] sm:$0xff]  ;;  %v211_v11 = vld [vmem:[#allocation2 + $0x350] sm:$0xff] }
  0x68   :  { %485 = vmatprep.subr.mxu0 %v174_v46  ;;  %556 = vmatprep.subr.mxu1 %v176_v47  ;;  %v193_v12 = vld [vmem:[#allocation2 + $0x2c0] sm:$0xff]  ;;  %v196_v13 = vld [vmem:[#allocation2 + $0x2d8] sm:$0xff]  ;;  %v178_v14 = vld [vmem:[#allocation2 + $0x248] sm:$0xff] }
  0x69   :  { %486 = vmatpush1.msra.mxu0 %v173_v48  ;;  %557 = vmatpush1.msra.mxu1 %v175_v49  ;;  %v195_v15 = vld [vmem:[#allocation2 + $0x2d0] sm:$0xff]  ;;  %v177_v16 = vld [vmem:[#allocation2 + $0x240] sm:$0xff]  ;;  %v180_v17 = vld [vmem:[#allocation2 + $0x258] sm:$0xff] }
  0x6a   :  { %487 = vmatprep.subr.mxu0 %v158_v50  ;;  %558 = vmatprep.subr.mxu1 %v160_v51  ;;  %v162_v18 = vld [vmem:[#allocation2 + $0x1c8] sm:$0xff]  ;;  %v179_v19 = vld [vmem:[#allocation2 + $0x250] sm:$0xff]  ;;  %v161_v20 = vld [vmem:[#allocation2 + $0x1c0] sm:$0xff] }
  0x6b   :  { %488 = vmatpush1.msra.mxu0 %v157_v52  ;;  %559 = vmatpush1.msra.mxu1 %v159_v53  ;;  %v164_v21 = vld [vmem:[#allocation2 + $0x1d8] sm:$0xff]  ;;  %v146_v22 = vld [vmem:[#allocation2 + $0x148] sm:$0xff]  ;;  %v163_v23 = vld [vmem:[#allocation2 + $0x1d0] sm:$0xff] }
  0x6c   :  { %489 = vmatprep.subr.mxu0 %v142_v54  ;;  %560 = vmatprep.subr.mxu1 %v144_v55  ;;  %v145_v24 = vld [vmem:[#allocation2 + $0x140] sm:$0xff]  ;;  %v148_v25 = vld [vmem:[#allocation2 + $0x158] sm:$0xff]  ;;  %v130_v26 = vld [vmem:[#allocation2 + $0xc8] sm:$0xff] }
  0x6d   :  { %490 = vmatpush1.msra.mxu0 %v141_v56  ;;  %561 = vmatpush1.msra.mxu1 %v143_v57  ;;  %v147_v27 = vld [vmem:[#allocation2 + $0x150] sm:$0xff]  ;;  %v129_v28 = vld [vmem:[#allocation2 + $0xc0] sm:$0xff]  ;;  %v132_v29 = vld [vmem:[#allocation2 + $0xd8] sm:$0xff] }
  0x6e   :  { %491 = vmatprep.subr.mxu0 %v126_v58  ;;  %562 = vmatprep.subr.mxu1 %v128_v59  ;;  %v114_v30 = vld [vmem:[#allocation2 + $0x48] sm:$0xff]  ;;  %v131_v31 = vld [vmem:[#allocation2 + $0xd0] sm:$0xff]  ;;  %v113_v32 = vld [vmem:[#allocation2 + $0x40] sm:$0xff] }
  0x6f   :  { %492 = vmatpush1.msra.mxu0 %v125_v60  ;;  %563 = vmatpush1.msra.mxu1 %v127_v61  ;;  %v116_v34 = vld [vmem:[#allocation2 + $0x58] sm:$0xff]  ;;  %v115_v35 = vld [vmem:[#allocation2 + $0x50] sm:$0xff]  ;;  %v230_v36 = vld [vmem:[#allocation2 + $0x3e8] sm:$0xff] }
  0x70   :  { %493 = vmatprep.subr.mxu0 %v110_v62  ;;  %527 = vmatprep.mubr.f32.mxu0 %v10561_v0  ;;  %v229_v37 = vld [vmem:[#allocation2 + $0x3e0] sm:$0xff]  ;;  %v232_v38 = vld [vmem:[#allocation2 + $0x3f8] sm:$0xff]  ;;  %v214_v39 = vld [vmem:[#allocation2 + $0x368] sm:$0xff] }
  0x71   :  { %494 = vmatpush1.msra.mxu0 %v109_v63  ;;  %564 = vmatprep.subr.mxu1 %v112_v1  ;;  %v231_v40 = vld [vmem:[#allocation2 + $0x3f0] sm:$0xff]  ;;  %v213_v41 = vld [vmem:[#allocation2 + $0x360] sm:$0xff]  ;;  %v216_v42 = vld [vmem:[#allocation2 + $0x378] sm:$0xff] }
  0x72   :  { %9135 = vmatmul.mubr.msk.f32.vlgmr.msra.gmra.mxu0 %vm317_vm0, %v10626_v33  ;;  %565 = vmatpush1.msra.mxu1 %v111_v2  ;;  %v198_v43 = vld [vmem:[#allocation2 + $0x2e8] sm:$0xff]  ;;  %v215_v44 = vld [vmem:[#allocation2 + $0x370] sm:$0xff]  ;;  %v197_v45 = vld [vmem:[#allocation2 + $0x2e0] sm:$0xff] }
  0x73   :  { %598 = vmatprep.mubr.f32.mxu1 %v10561_v0  ;;  %621 = vmatprep.subr.mxu0 %v226_v3  ;;  %v200_v46 = vld [vmem:[#allocation2 + $0x2f8] sm:$0xff]  ;;  %v182_v47 = vld [vmem:[#allocation2 + $0x268] sm:$0xff]  ;;  %v199_v48 = vld [vmem:[#allocation2 + $0x2f0] sm:$0xff] }
  0x74   :  { %9136 = vmatmul.mubr.msk.f32.vlgmr.msra.gmra.mxu1 %vm317_vm0, %v10626_v33  ;;  %622 = vmatpush1.msra.mxu0 %v225_v4  ;;  %v181_v49 = vld [vmem:[#allocation2 + $0x260] sm:$0xff]  ;;  %v184_v50 = vld [vmem:[#allocation2 + $0x278] sm:$0xff]  ;;  %v166_v51 = vld [vmem:[#allocation2 + $0x1e8] sm:$0xff] }
  0x75   :  { %692 = vmatprep.subr.mxu1 %v228_v5  ;;  %623 = vmatprep.subr.mxu0 %v210_v6  ;;  %v183_v52 = vld [vmem:[#allocation2 + $0x270] sm:$0xff]  ;;  %v165_v53 = vld [vmem:[#allocation2 + $0x1e0] sm:$0xff]  ;;  %v168_v54 = vld [vmem:[#allocation2 + $0x1f8] sm:$0xff] }
  0x76   :  { %693 = vmatpush1.msra.mxu1 %v227_v7  ;;  %624 = vmatpush1.msra.mxu0 %v209_v8  ;;  %v150_v55 = vld [vmem:[#allocation2 + $0x168] sm:$0xff]  ;;  %v167_v56 = vld [vmem:[#allocation2 + $0x1f0] sm:$0xff]  ;;  %v149_v57 = vld [vmem:[#allocation2 + $0x160] sm:$0xff] }
  0x77   :  { %694 = vmatprep.subr.mxu1 %v212_v9  ;;  %625 = vmatprep.subr.mxu0 %v194_v10  ;;  %v152_v58 = vld [vmem:[#allocation2 + $0x178] sm:$0xff]  ;;  %v134_v59 = vld [vmem:[#allocation2 + $0xe8] sm:$0xff]  ;;  %v151_v60 = vld [vmem:[#allocation2 + $0x170] sm:$0xff] }
  0x78   :  { %695 = vmatpush1.msra.mxu1 %v211_v11  ;;  %626 = vmatpush1.msra.mxu0 %v193_v12  ;;  %v133_v61 = vld [vmem:[#allocation2 + $0xe0] sm:$0xff]  ;;  %v136_v62 = vld [vmem:[#allocation2 + $0xf8] sm:$0xff]  ;;  %v118_v63 = vld [vmem:[#allocation2 + $0x68] sm:$0xff] }
  0x79   :  { %696 = vmatprep.subr.mxu1 %v196_v13  ;;  %627 = vmatprep.subr.mxu0 %v178_v14  ;;  %v977_v1 = vld [vmem:[#allocation7 + $0x1c0] sm:$0xff]  ;;  %v117_v4 = vld [vmem:[#allocation2 + $0x60] sm:$0xff]  ;;  %v120_v7 = vld [vmem:[#allocation2 + $0x78] sm:$0xff] }
  0x7a   :  { %697 = vmatpush1.msra.mxu1 %v195_v15  ;;  %628 = vmatpush1.msra.mxu0 %v177_v16  ;;  %v981_v2 = vld [vmem:[#allocation7 + $0x1e0] sm:$0xff] }
  0x7b   :  { %698 = vmatprep.subr.mxu1 %v180_v17  ;;  %629 = vmatprep.subr.mxu0 %v162_v18  ;;  %v135_v3 = vld [vmem:[#allocation2 + $0xf0] sm:$0xff]  ;;  %v9198_v13 = vcombine.high %v977_v1, %v981_v2  ;;  %v9197_v15 = vcombine.low %v977_v1, %v981_v2 }
  0x7c   :  { %699 = vmatpush1.msra.mxu1 %v179_v19  ;;  %630 = vmatpush1.msra.mxu0 %v161_v20  ;;  %v1105_v5 = vld [vmem:[#allocation7 + $0x5c0] sm:$0xff] }
  0x7d   :  { %700 = vmatprep.subr.mxu1 %v164_v21  ;;  %631 = vmatprep.subr.mxu0 %v146_v22  ;;  %v1109_v6 = vld [vmem:[#allocation7 + $0x5e0] sm:$0xff] }
  0x7e   :  { %701 = vmatpush1.msra.mxu1 %v163_v23  ;;  %632 = vmatpush1.msra.mxu0 %v145_v24  ;;  %v119_v8 = vld [vmem:[#allocation2 + $0x70] sm:$0xff]  ;;  %v9326_v14 = vcombine.high %v1105_v5, %v1109_v6  ;;  %v9325_v16 = vcombine.low %v1105_v5, %v1109_v6 }
  0x7f   :  { %702 = vmatprep.subr.mxu1 %v148_v25  ;;  %633 = vmatprep.subr.mxu0 %v130_v26  ;;  %v969_v9 = vld [vmem:[#allocation7 + $0x180] sm:$0xff] }
  0x80   :  { %703 = vmatpush1.msra.mxu1 %v147_v27  ;;  %634 = vmatpush1.msra.mxu0 %v129_v28  ;;  %v973_v10 = vld [vmem:[#allocation7 + $0x1a0] sm:$0xff] }
  0x81   :  { %704 = vmatprep.subr.mxu1 %v132_v29  ;;  %635 = vmatprep.subr.mxu0 %v114_v30  ;;  %v1097_v11 = vld [vmem:[#allocation7 + $0x580] sm:$0xff]  ;;  %v9190_v21 = vcombine.high %v969_v9, %v973_v10  ;;  %v9189_v23 = vcombine.low %v969_v9, %v973_v10 }
  0x82   :  { %705 = vmatpush1.msra.mxu1 %v131_v31  ;;  %636 = vmatpush1.msra.mxu0 %v113_v32  ;;  %v1101_v12 = vld [vmem:[#allocation7 + $0x5a0] sm:$0xff] }
  0x83   :  { %669 = vmatprep.mubr.f32.mxu0 %v10561_v0  ;;  %706 = vmatprep.subr.mxu1 %v116_v34  ;;  %v961_v17 = vld [vmem:[#allocation7 + $0x140] sm:$0xff]  ;;  %v9318_v22 = vcombine.high %v1097_v11, %v1101_v12  ;;  %v9317_v24 = vcombine.low %v1097_v11, %v1101_v12 }
  0x84   :  { %9137 = vmatmul.mubr.msk.f32.vlgmr.msra.gmra.mxu0 %vm317_vm0, %v10626_v33  ;;  %707 = vmatpush1.msra.mxu1 %v115_v35  ;;  %v965_v18 = vld [vmem:[#allocation7 + $0x160] sm:$0xff] }
  0x85   :  { %763 = vmatprep.subr.mxu0 %v230_v36  ;;  %740 = vmatprep.mubr.f32.mxu1 %v10561_v0  ;;  %v1089_v19 = vld [vmem:[#allocation7 + $0x540] sm:$0xff]  ;;  %v9182_v29 = vcombine.high %v961_v17, %v965_v18 }
  0x86   :  { %764 = vmatpush1.msra.mxu0 %v229_v37  ;;  %834 = vmatprep.subr.mxu1 %v232_v38  ;;  %v1093_v20 = vld [vmem:[#allocation7 + $0x560] sm:$0xff] }
  0x87   :  { %9138 = vmatmul.mubr.msk.f32.vlgmr.msra.gmra.mxu1 %vm317_vm0, %v10626_v33  ;;  %765 = vmatprep.subr.mxu0 %v214_v39  ;;  %v953_v25 = vld [vmem:[#allocation7 + $0x100] sm:$0xff]  ;;  %v9310_v30 = vcombine.high %v1089_v19, %v1093_v20  ;;  %v9309_v31 = vcombine.low %v1089_v19, %v1093_v20 }
  0x88   :  { %835 = vmatpush1.msra.mxu1 %v231_v40  ;;  %766 = vmatpush1.msra.mxu0 %v213_v41  ;;  %v957_v26 = vld [vmem:[#allocation7 + $0x120] sm:$0xff] }
  0x89   :  { %836 = vmatprep.subr.mxu1 %v216_v42  ;;  %767 = vmatprep.subr.mxu0 %v198_v43  ;;  %v1081_v27 = vld [vmem:[#allocation7 + $0x500] sm:$0xff]  ;;  %v9173_v38 = vcombine.low %v953_v25, %v957_v26 }
  0x8a   :  { %837 = vmatpush1.msra.mxu1 %v215_v44  ;;  %768 = vmatpush1.msra.mxu0 %v197_v45  ;;  %v1085_v28 = vld [vmem:[#allocation7 + $0x520] sm:$0xff] }
  0x8b   :  { %838 = vmatprep.subr.mxu1 %v200_v46  ;;  %769 = vmatprep.subr.mxu0 %v182_v47  ;;  %v945_v32 = vld [vmem:[#allocation7 + $0xc0] sm:$0xff]  ;;  %v9302_v34 = vcombine.high %v1081_v27, %v1085_v28  ;;  %v9301_v39 = vcombine.low %v1081_v27, %v1085_v28 }
  0x8c   :  { %839 = vmatpush1.msra.mxu1 %v199_v48  ;;  %770 = vmatpush1.msra.mxu0 %v181_v49  ;;  %v949_v35 = vld [vmem:[#allocation7 + $0xe0] sm:$0xff] }
  0x8d   :  { %840 = vmatprep.subr.mxu1 %v184_v50  ;;  %771 = vmatprep.subr.mxu0 %v166_v51  ;;  %v1073_v36 = vld [vmem:[#allocation7 + $0x4c0] sm:$0xff]  ;;  %v9166_v41 = vcombine.high %v945_v32, %v949_v35  ;;  %v9165_v46 = vcombine.low %v945_v32, %v949_v35 }
  0x8e   :  { %841 = vmatpush1.msra.mxu1 %v183_v52  ;;  %772 = vmatpush1.msra.mxu0 %v165_v53  ;;  %v1077_v37 = vld [vmem:[#allocation7 + $0x4e0] sm:$0xff] }
  0x8f   :  { %842 = vmatprep.subr.mxu1 %v168_v54  ;;  %773 = vmatprep.subr.mxu0 %v150_v55  ;;  %v937_v40 = vld [vmem:[#allocation7 + $0x80] sm:$0xff]  ;;  %v9294_v42 = vcombine.high %v1073_v36, %v1077_v37  ;;  %v9293_v47 = vcombine.low %v1073_v36, %v1077_v37 }
  0x90   :  { %843 = vmatpush1.msra.mxu1 %v167_v56  ;;  %774 = vmatpush1.msra.mxu0 %v149_v57  ;;  %v941_v43 = vld [vmem:[#allocation7 + $0xa0] sm:$0xff] }
  0x91   :  { %844 = vmatprep.subr.mxu1 %v152_v58  ;;  %775 = vmatprep.subr.mxu0 %v134_v59  ;;  %v1065_v44 = vld [vmem:[#allocation7 + $0x480] sm:$0xff]  ;;  %v9158_v52 = vcombine.high %v937_v40, %v941_v43  ;;  %v9157_v57 = vcombine.low %v937_v40, %v941_v43 }
  0x92   :  { %845 = vmatpush1.msra.mxu1 %v151_v60  ;;  %776 = vmatpush1.msra.mxu0 %v133_v61  ;;  %v1069_v45 = vld [vmem:[#allocation7 + $0x4a0] sm:$0xff] }
  0x93   :  { %846 = vmatprep.subr.mxu1 %v136_v62  ;;  %777 = vmatprep.subr.mxu0 %v118_v63  ;;  %v929_v48 = vld [vmem:[#allocation7 + $0x40] sm:$0xff]  ;;  %v9286_v53 = vcombine.high %v1065_v44, %v1069_v45  ;;  %v9285_v59 = vcombine.low %v1065_v44, %v1069_v45 }
  0x94   :  { %847 = vmatpush1.msra.mxu1 %v135_v3  ;;  %778 = vmatpush1.msra.mxu0 %v117_v4  ;;  %v933_v49 = vld [vmem:[#allocation7 + $0x60] sm:$0xff] }
  0x95   :  { %811 = vmatprep.mubr.f32.mxu0 %v10561_v0  ;;  %848 = vmatprep.subr.mxu1 %v120_v7  ;;  %v1057_v50 = vld [vmem:[#allocation7 + $0x440] sm:$0xff]  ;;  %v9150_v3 = vcombine.high %v929_v48, %v933_v49  ;;  %v9149_v5 = vcombine.low %v929_v48, %v933_v49 }
  0x96   :  { %9139 = vmatmul.mubr.msk.f32.vlgmr.msra.gmra.mxu0 %vm317_vm0, %v10626_v33  ;;  %849 = vmatpush1.msra.mxu1 %v119_v8  ;;  %v1061_v51 = vld [vmem:[#allocation7 + $0x460] sm:$0xff] }
  0x97   :  { %882 = vmatprep.mubr.f32.mxu1 %v10561_v0  ;;  %7107 = vmatprep.subr.bf16.mxu0 %v9198_v13  ;;  %v9181_v0 = vcombine.low %v961_v17, %v965_v18  ;;  %v10650_v54 = vld [vmem:[#allocation7 + $0x9c0] sm:$0xff]  ;;  %v9278_v4 = vcombine.high %v1057_v50, %v1061_v51  ;;  %v9277_v6 = vcombine.low %v1057_v50, %v1061_v51 }
  0x98   :  { %7148 = vmatprep.subr.bf16.mxu1 %v9326_v14  ;;  %9140 = vmatmul.mubr.msk.f32.vlgmr.msra.gmra.mxu1 %vm317_vm0, %v10626_v33  ;;  %v9174_v33 = vcombine.high %v953_v25, %v957_v26  ;;  %v10652_v55 = vld [vmem:[#allocation7 + $0x9e0] sm:$0xff] }
  0x99   :  { %7108 = vmatpush1.bf16.msra.mxu0 %v9197_v15  ;;  %7149 = vmatpush1.bf16.msra.mxu1 %v9325_v16  ;;  %v10654_v56 = vld [vmem:[#allocation7 + $0xdc0] sm:$0xff]  ;;  %v9453_v1 = vcombine.low %v10650_v54, %v10652_v55 }
  0x9a   :  { %7109 = vmatprep.subr.bf16.mxu0 %v9190_v21  ;;  %7150 = vmatprep.subr.bf16.mxu1 %v9318_v22  ;;  %v10656_v58 = vld [vmem:[#allocation7 + $0xde0] sm:$0xff] }
  0x9b   :  { %v921_v60 = vld [vmem:[#allocation7] sm:$0xff]  ;;  %v9581_v2 = vcombine.low %v10654_v56, %v10656_v58 }
  0x9c   :  { %v925_v61 = vld [vmem:[#allocation7 + $0x20] sm:$0xff] }
  0x9d   :  { %7110 = vmatpush1.bf16.msra.mxu0 %v9189_v23  ;;  %7151 = vmatpush1.bf16.msra.mxu1 %v9317_v24  ;;  %v1049_v62 = vld [vmem:[#allocation7 + $0x400] sm:$0xff]  ;;  %v9142_v11 = vcombine.high %v921_v60, %v925_v61  ;;  %v9141_v13 = vcombine.low %v921_v60, %v925_v61 }
  0x9e   :  { %7111 = vmatprep.subr.bf16.mxu0 %v9182_v29  ;;  %7152 = vmatprep.subr.bf16.mxu1 %v9310_v30  ;;  %v1053_v63 = vld [vmem:[#allocation7 + $0x420] sm:$0xff] }
  0x9f   :  { %v1041_v7 = vld [vmem:[#allocation7 + $0x3c0] sm:$0xff]  ;;  %v9270_v12 = vcombine.high %v1049_v62, %v1053_v63  ;;  %v9269_v14 = vcombine.low %v1049_v62, %v1053_v63 }
  0xa0   :  { %v1045_v8 = vld [vmem:[#allocation7 + $0x3e0] sm:$0xff] }
  0xa1   :  { %7112 = vmatpush1.bf16.msra.mxu0 %v9181_v0  ;;  %7153 = vmatpush1.bf16.msra.mxu1 %v9309_v31  ;;  %v1169_v9 = vld [vmem:[#allocation7 + $0x7c0] sm:$0xff]  ;;  %v9262_v19 = vcombine.high %v1041_v7, %v1045_v8  ;;  %v9261_v21 = vcombine.low %v1041_v7, %v1045_v8 }
  0xa2   :  { %7113 = vmatprep.subr.bf16.mxu0 %v9174_v33  ;;  %7154 = vmatprep.subr.bf16.mxu1 %v9302_v34  ;;  %v1173_v10 = vld [vmem:[#allocation7 + $0x7e0] sm:$0xff] }
  0xa3   :  { %v1033_v15 = vld [vmem:[#allocation7 + $0x380] sm:$0xff]  ;;  %v9390_v20 = vcombine.high %v1169_v9, %v1173_v10  ;;  %v9389_v22 = vcombine.low %v1169_v9, %v1173_v10 }
  0xa4   :  { %v1037_v16 = vld [vmem:[#allocation7 + $0x3a0] sm:$0xff] }
  0xa5   :  { %7114 = vmatpush1.bf16.msra.mxu0 %v9173_v38  ;;  %7155 = vmatpush1.bf16.msra.mxu1 %v9301_v39  ;;  %v1161_v17 = vld [vmem:[#allocation7 + $0x780] sm:$0xff]  ;;  %v9254_v27 = vcombine.high %v1033_v15, %v1037_v16  ;;  %v9253_v29 = vcombine.low %v1033_v15, %v1037_v16 }
  0xa6   :  { %7115 = vmatprep.subr.bf16.mxu0 %v9166_v41  ;;  %7156 = vmatprep.subr.bf16.mxu1 %v9294_v42  ;;  %v1165_v18 = vld [vmem:[#allocation7 + $0x7a0] sm:$0xff] }
  0xa7   :  { %v1025_v23 = vld [vmem:[#allocation7 + $0x340] sm:$0xff]  ;;  %v9382_v28 = vcombine.high %v1161_v17, %v1165_v18  ;;  %v9381_v30 = vcombine.low %v1161_v17, %v1165_v18  ;;  %v9454_v17 = vcombine.high %v10650_v54, %v10652_v55  ;;  %v9582_v18 = vcombine.high %v10654_v56, %v10656_v58 }
  0xa8   :  { %v1029_v24 = vld [vmem:[#allocation7 + $0x360] sm:$0xff] }
  0xa9   :  { %7116 = vmatpush1.bf16.msra.mxu0 %v9165_v46  ;;  %7157 = vmatpush1.bf16.msra.mxu1 %v9293_v47  ;;  %v1153_v25 = vld [vmem:[#allocation7 + $0x740] sm:$0xff]  ;;  %v9246_v34 = vcombine.high %v1025_v23, %v1029_v24  ;;  %v9245_v36 = vcombine.low %v1025_v23, %v1029_v24  ;;  %v10674_v23 = vld [vmem:[#allocation5] sm:$0xff] }
  0xaa   :  { %7117 = vmatprep.subr.bf16.mxu0 %v9158_v52  ;;  %7158 = vmatprep.subr.bf16.mxu1 %v9286_v53  ;;  %v1157_v26 = vld [vmem:[#allocation7 + $0x760] sm:$0xff] }
  0xab   :  { %v1017_v0 = vld [vmem:[#allocation7 + $0x300] sm:$0xff]  ;;  %v9374_v35 = vcombine.high %v1153_v25, %v1157_v26  ;;  %v9373_v37 = vcombine.low %v1153_v25, %v1157_v26 }
  0xac   :  { %v1021_v31 = vld [vmem:[#allocation7 + $0x320] sm:$0xff] }
  0xad   :  { %7118 = vmatpush1.bf16.msra.mxu0 %v9157_v57  ;;  %7159 = vmatpush1.bf16.msra.mxu1 %v9285_v59  ;;  %v1145_v32 = vld [vmem:[#allocation7 + $0x700] sm:$0xff]  ;;  %v9238_v42 = vcombine.high %v1017_v0, %v1021_v31  ;;  %v9237_v44 = vcombine.low %v1017_v0, %v1021_v31 }
  0xae   :  { %7119 = vmatprep.subr.bf16.mxu0 %v9150_v3  ;;  %7160 = vmatprep.subr.bf16.mxu1 %v9278_v4  ;;  %v1149_v33 = vld [vmem:[#allocation7 + $0x720] sm:$0xff] }
  0xaf   :  { %v1009_v38 = vld [vmem:[#allocation7 + $0x2c0] sm:$0xff]  ;;  %v9366_v43 = vcombine.high %v1145_v32, %v1149_v33  ;;  %v9365_v45 = vcombine.low %v1145_v32, %v1149_v33 }
  0xb0   :  { %v1013_v39 = vld [vmem:[#allocation7 + $0x2e0] sm:$0xff] }
  0xb1   :  { %7120 = vmatpush1.bf16.msra.mxu0 %v9149_v5  ;;  %7161 = vmatpush1.bf16.msra.mxu1 %v9277_v6  ;;  %v1137_v40 = vld [vmem:[#allocation7 + $0x6c0] sm:$0xff]  ;;  %v9230_v50 = vcombine.high %v1009_v38, %v1013_v39  ;;  %v9229_v52 = vcombine.low %v1009_v38, %v1013_v39 }
  0xb2   :  { %7121 = vmatprep.subr.bf16.mxu0 %v9142_v11  ;;  %7162 = vmatprep.subr.bf16.mxu1 %v9270_v12  ;;  %v1141_v41 = vld [vmem:[#allocation7 + $0x6e0] sm:$0xff] }
  0xb3   :  { %v1001_v46 = vld [vmem:[#allocation7 + $0x280] sm:$0xff]  ;;  %v9358_v51 = vcombine.high %v1137_v40, %v1141_v41  ;;  %v9357_v53 = vcombine.low %v1137_v40, %v1141_v41 }
  0xb4   :  { %v1005_v47 = vld [vmem:[#allocation7 + $0x2a0] sm:$0xff] }
  0xb5   :  { %7122 = vmatpush1.bf16.msra.mxu0 %v9141_v13  ;;  %7163 = vmatpush1.bf16.msra.mxu1 %v9269_v14  ;;  %v1129_v48 = vld [vmem:[#allocation7 + $0x680] sm:$0xff]  ;;  %v9222_v57 = vcombine.high %v1001_v46, %v1005_v47  ;;  %v9221_v3 = vcombine.low %v1001_v46, %v1005_v47 }
  0xb6   :  { %7123 = vmatprep.subr.bf16.mxu0 %v9262_v19  ;;  %7164 = vmatprep.subr.bf16.mxu1 %v9390_v20  ;;  %v1133_v49 = vld [vmem:[#allocation7 + $0x6a0] sm:$0xff]  ;;  %v237_v19 = vlaneseq }
  0xb7   :  { %v9350_v59 = vcombine.high %v1129_v48, %v1133_v49  ;;  %v993_v60 = vld [vmem:[#allocation7 + $0x240] sm:$0xff]  ;;  %v9349_v4 = vcombine.low %v1129_v48, %v1133_v49 }
  0xb8   :  { %v997_v61 = vld [vmem:[#allocation7 + $0x260] sm:$0xff]  ;;  %v10666_v20 = vshrl.u32 %v237_v19, 7 }
  0xb9   :  { %7124 = vmatpush2.bf16.msra.mxu0 %v9261_v21  ;;  %7165 = vmatpush2.bf16.msra.mxu1 %v9389_v22  ;;  %v1121_v62 = vld [vmem:[#allocation7 + $0x640] sm:$0xff]  ;;  %v9214_v5 = vcombine.high %v993_v60, %v997_v61  ;;  %v9213_v11 = vcombine.low %v993_v60, %v997_v61 }
  0xba   :  { %7125 = vmatprep.subr.bf16.mxu0 %v9254_v27  ;;  %7166 = vmatprep.subr.bf16.mxu1 %v9382_v28  ;;  %v1125_v63 = vld [vmem:[#allocation7 + $0x660] sm:$0xff]  ;;  %v10669_v21 = vsub.s32 0, %v10666_v20  ;;  %v10672_v22 = vsub.s32 2, %v10666_v20  ;;  %v10677_v24 = vsub.s32 1, %v10666_v20  ;;  %v10680_v25 = vsub.s32 3, %v10666_v20 }
  0xbb   :  { %v9342_v6 = vcombine.high %v1121_v62, %v1125_v63  ;;  %v985_v7 = vld [vmem:[#allocation7 + $0x200] sm:$0xff]  ;;  %v9341_v12 = vcombine.low %v1121_v62, %v1125_v63  ;;  %v10712_v54 = vsub.s32 7, %v10666_v20 }
  0xbc   :  { %v989_v8 = vld [vmem:[#allocation7 + $0x220] sm:$0xff]  ;;  %v240_v26 = vrot.slane %v10674_v23, %v10669_v21  ;;  %v248_v27 = vrot.slane %v10674_v23, %v10672_v22  ;;  %v244_v28 = vrot.slane %v10674_v23, %v10677_v24 }
  0xbd   :  { %7126 = vmatpush2.bf16.msra.mxu0 %v9253_v29  ;;  %7167 = vmatpush2.bf16.msra.mxu1 %v9381_v30  ;;  %v1113_v9 = vld [vmem:[#allocation7 + $0x600] sm:$0xff]  ;;  %v9206_v13 = vcombine.high %v985_v7, %v989_v8  ;;  %v9205_v15 = vcombine.low %v985_v7, %v989_v8  ;;  %v252_v29 = vrot.slane %v10674_v23, %v10680_v25 }
  0xbe   :  { %7127 = vmatprep.subr.bf16.mxu0 %v9246_v34  ;;  %7168 = vmatprep.subr.bf16.mxu1 %v9374_v35  ;;  %v1117_v10 = vld [vmem:[#allocation7 + $0x620] sm:$0xff] }
  0xbf   :  { %v9334_v14 = vcombine.high %v1113_v9, %v1117_v10  ;;  %v9333_v16 = vcombine.low %v1113_v9, %v1117_v10  ;;  %v1225_v39 = vld [vmem:[#allocation7 + $0x980] sm:$0xff] }
  0xc0   :  { %v1209_v63 = vld [vmem:[#allocation7 + $0x900] sm:$0xff] }
  0xc1   :  { %7128 = vmatpush2.bf16.msra.mxu0 %v9245_v36  ;;  %7169 = vmatpush2.bf16.msra.mxu1 %v9373_v37  ;;  %v1205_v8 = vld [vmem:[#allocation7 + $0x8e0] sm:$0xff] }
  0xc2   :  { %7129 = vmatprep.subr.bf16.mxu0 %v9238_v42  ;;  %7170 = vmatprep.subr.bf16.mxu1 %v9366_v43  ;;  %v1229_v42 = vld [vmem:[#allocation7 + $0x9a0] sm:$0xff] }
  0xc3   :  { %v1353_v43 = vld [vmem:[#allocation7 + $0xd80] sm:$0xff]  ;;  %v9446_v49 = vcombine.high %v1225_v39, %v1229_v42 }
  0xc4   :  { %v1329_v9 = vld [vmem:[#allocation7 + $0xcc0] sm:$0xff] }
  0xc5   :  { %7130 = vmatpush2.bf16.msra.mxu0 %v9237_v44  ;;  %7171 = vmatpush2.bf16.msra.mxu1 %v9365_v45  ;;  %v1357_v44 = vld [vmem:[#allocation7 + $0xda0] sm:$0xff] }
  0xc6   :  { %7131 = vmatprep.subr.bf16.mxu0 %v9230_v50  ;;  %7172 = vmatprep.subr.bf16.mxu1 %v9358_v51  ;;  %v9574_v50 = vcombine.high %v1353_v43, %v1357_v44  ;;  %v1217_v51 = vld [vmem:[#allocation7 + $0x940] sm:$0xff]  ;;  %v9573_v60 = vcombine.low %v1353_v43, %v1357_v44 }
  0xc7   :  { %v1333_v10 = vld [vmem:[#allocation7 + $0xce0] sm:$0xff] }
  0xc8   :  { %v1193_v19 = vld [vmem:[#allocation7 + $0x880] sm:$0xff] }
  0xc9   :  { %7132 = vmatpush2.bf16.msra.mxu0 %v9229_v52  ;;  %7173 = vmatpush2.bf16.msra.mxu1 %v9357_v53  ;;  %v1221_v52 = vld [vmem:[#allocation7 + $0x960] sm:$0xff] }
  0xca   :  { %7133 = vmatprep.subr.bf16.mxu0 %v9222_v57  ;;  %7174 = vmatprep.subr.bf16.mxu1 %v9350_v59  ;;  %v1345_v53 = vld [vmem:[#allocation7 + $0xd40] sm:$0xff]  ;;  %v9445_v59 = vcombine.low %v1225_v39, %v1229_v42  ;;  %v9438_v61 = vcombine.high %v1217_v51, %v1221_v52  ;;  %v9437_v55 = vcombine.low %v1217_v51, %v1221_v52 }
  0xcb   :  { %v1349_v57 = vld [vmem:[#allocation7 + $0xd60] sm:$0xff] }
  0xcc   :  { %v9566_v62 = vcombine.high %v1345_v53, %v1349_v57  ;;  %v9565_v56 = vcombine.low %v1345_v53, %v1349_v57  ;;  %v1189_v39 = vld [vmem:[#allocation7 + $0x860] sm:$0xff] }
  0xcd   :  { %7134 = vmatpush2.bf16.msra.mxu0 %v9221_v3  ;;  %7175 = vmatpush2.bf16.msra.mxu1 %v9349_v4  ;;  %v10709_v3 = vsub.s32 5, %v10666_v20  ;;  %v1213_v4 = vld [vmem:[#allocation7 + $0x920] sm:$0xff] }
  0xce   :  { %7135 = vmatprep.subr.bf16.mxu0 %v9214_v5  ;;  %7176 = vmatprep.subr.bf16.mxu1 %v9342_v6  ;;  %v1337_v5 = vld [vmem:[#allocation7 + $0xd00] sm:$0xff]  ;;  %v9430_v58 = vcombine.high %v1209_v63, %v1213_v4 }
  0xcf   :  { %v1341_v6 = vld [vmem:[#allocation7 + $0xd20] sm:$0xff]  ;;  %v260_v7 = vrot.slane %v10674_v23, %v10709_v3 }
  0xd0   :  { %v1177_v51 = vld [vmem:[#allocation7 + $0x800] sm:$0xff] }
  0xd1   :  { %7136 = vmatpush2.bf16.msra.mxu0 %v9213_v11  ;;  %7177 = vmatpush2.bf16.msra.mxu1 %v9341_v12  ;;  %v268_v12 = vrot.slane %v10674_v23, %v10712_v54  ;;  %v1181_v52 = vld [vmem:[#allocation7 + $0x820] sm:$0xff] }
  0xd2   :  { %7137 = vmatprep.subr.bf16.mxu0 %v9206_v13  ;;  %7178 = vmatprep.subr.bf16.mxu1 %v9334_v14  ;;  %v9429_v13 = vcombine.low %v1209_v63, %v1213_v4  ;;  %v9557_v14 = vcombine.low %v1337_v5, %v1341_v6  ;;  %v1305_v53 = vld [vmem:[#allocation7 + $0xc00] sm:$0xff] }
  0xd3   :  { %v1309_v57 = vld [vmem:[#allocation7 + $0xc20] sm:$0xff] }
  0xd4   :  { %v1297_v63 = vld [vmem:[#allocation7 + $0xbc0] sm:$0xff] }
  0xd5   :  { %7138 = vmatpush2.bf16.msra.mxu0 %v9205_v15  ;;  %7179 = vmatpush2.bf16.msra.mxu1 %v9333_v16  ;;  %v1301_v4 = vld [vmem:[#allocation7 + $0xbe0] sm:$0xff] }
  0xd6   :  { %7189 = vmatprep.subr.bf16.mxu0 %v9454_v17  ;;  %7230 = vmatprep.subr.bf16.mxu1 %v9582_v18  ;;  %v9550_v18 = vcombine.high %v1329_v9, %v1333_v10 }
 0x121   :  { %v387_v30 = vpop.f32.mrf.mxu0  ;;  %v458_v0 = vpop.f32.mrf.mxu1 }
 0x122   :  { %v388_v31 = vadd.f32 %v387_v30, %v240_v26  ;;  %v459_v32 = vadd.f32 %v458_v0, %v248_v27  ;;  %v1197_v27 = vld [vmem:[#allocation7 + $0x8a0] sm:$0xff] }
 0x123   :  { %v389_v33 = vpop.f32.mrf.mxu0  ;;  %v460_v34 = vpop.f32.mrf.mxu1  ;;  %v9413_v43 = vcombine.low %v1193_v19, %v1197_v27 }
 0x124   :  { %v891_v35 = vmax.f32 %v459_v32, 0.0  ;;  %v390_v36 = vadd.f32 %v389_v33, %v244_v28  ;;  %v461_v37 = vadd.f32 %v460_v34, %v252_v29  ;;  %v889_v38 = vmax.f32 %v388_v31, 0.0  ;;  %v1321_v28 = vld [vmem:[#allocation7 + $0xc80] sm:$0xff] }
 0x125   :  { %v1325_v29 = vld [vmem:[#allocation7 + $0xca0] sm:$0xff]  ;;  %v9549_v33 = vcombine.low %v1329_v9, %v1333_v10  ;;  %v9414_v34 = vcombine.high %v1193_v19, %v1197_v27  ;;  %v9517_v10 = vcombine.low %v1297_v63, %v1301_v4 }
 0x126   :  { %v890_v40 = vmax.f32 %v390_v36, 0.0  ;;  %v892_v41 = vmax.f32 %v461_v37, 0.0  ;;  %v10690_v45 = vpack.c.bf16 %v891_v35, %v891_v35  ;;  %v10696_v48 = vpack.c.bf16 %v889_v38, %v889_v38  ;;  %v1185_v36 = vld [vmem:[#allocation7 + $0x840] sm:$0xff] }
 0x127   :  { %v9542_v35 = vcombine.high %v1321_v28, %v1325_v29  ;;  %v9541_v44 = vcombine.low %v1321_v28, %v1325_v29  ;;  %v1421_v9 = vld [vmem:[#allocation7 + $0xfa0] sm:$0xff] }
 0x128   :  { %v10692_v46 = vpack.c.bf16 %v890_v40, %v890_v40  ;;  %v10694_v47 = vpack.c.bf16 %v892_v41, %v892_v41  ;;  %v1313_v40 = vld [vmem:[#allocation7 + $0xc40] sm:$0xff] }
 0x129   :  { %v1317_v41 = vld [vmem:[#allocation7 + $0xc60] sm:$0xff] }
 0x12a   :  { %7139 = vmatprep.mubr.bf16.mxu0 %v10692_v46  ;;  %7180 = vmatprep.mubr.bf16.mxu1 %v10694_v47  ;;  %v1413_v19 = vld [vmem:[#allocation7 + $0xf60] sm:$0xff] }
 0x12b   :  { %7140 = vmatmul.mubr.bf16.vlgmr.msra.gmra.mxu0 %v10696_v48  ;;  %7181 = vmatmul.mubr.bf16.vlgmr.msra.gmra.mxu1 %v10690_v45 }
 0x12c   :  { %7190 = vmatpush1.bf16.msra.mxu0 %v9453_v1  ;;  %7231 = vmatpush1.bf16.msra.mxu1 %v9581_v2  ;;  %v9558_v1 = vcombine.high %v1337_v5, %v1341_v6  ;;  %v1201_v2 = vld [vmem:[#allocation7 + $0x8c0] sm:$0xff] }
 0x12d   :  { %7191 = vmatprep.subr.bf16.mxu0 %v9446_v49  ;;  %7232 = vmatprep.subr.bf16.mxu1 %v9574_v50  ;;  %v9422_v17 = vcombine.high %v1201_v2, %v1205_v8  ;;  %v9421_v32 = vcombine.low %v1201_v2, %v1205_v8  ;;  %v9406_v49 = vcombine.high %v1185_v36, %v1189_v39  ;;  %v1425_v5 = vld [vmem:[#allocation7 + $0xfc0] sm:$0xff] }
 0x12e   :  { %v9534_v50 = vcombine.high %v1313_v40, %v1317_v41  ;;  %v1429_v6 = vld [vmem:[#allocation7 + $0xfe0] sm:$0xff] }
 0x12f   :  { %v1289_v2 = vld [vmem:[#allocation7 + $0xb80] sm:$0xff] }
 0x130   :  { %7192 = vmatpush1.bf16.msra.mxu0 %v9445_v59  ;;  %7233 = vmatpush1.bf16.msra.mxu1 %v9573_v60  ;;  %v9405_v59 = vcombine.low %v1185_v36, %v1189_v39  ;;  %v9533_v60 = vcombine.low %v1313_v40, %v1317_v41  ;;  %v1417_v8 = vld [vmem:[#allocation7 + $0xf80] sm:$0xff] }
 0x131   :  { %7193 = vmatprep.subr.bf16.mxu0 %v9438_v61  ;;  %7234 = vmatprep.subr.bf16.mxu1 %v9566_v62  ;;  %v9398_v61 = vcombine.high %v1177_v51, %v1181_v52  ;;  %v9526_v62 = vcombine.high %v1305_v53, %v1309_v57  ;;  %v9637_v27 = vcombine.low %v1417_v8, %v1421_v9  ;;  %v1269_v39 = vld [vmem:[#allocation7 + $0xae0] sm:$0xff] }
 0x132   :  { %v10716_v11 = vpop.f32.mrf.mxu0  ;;  %v1393_v40 = vld [vmem:[#allocation7 + $0xec0] sm:$0xff] }
 0x133   :  { %v1397_v41 = vld [vmem:[#allocation7 + $0xee0] sm:$0xff] }
 0x134   :  { %7194 = vmatpush1.bf16.msra.mxu0 %v9437_v55  ;;  %7235 = vmatpush1.bf16.msra.mxu1 %v9565_v56  ;;  %v10720_v15 = vpop.f32.mrf.mxu1  ;;  %v531_v16 = vpop.f32.mrf.mxu0  ;;  %v9397_v55 = vcombine.low %v1177_v51, %v1181_v52  ;;  %v9525_v56 = vcombine.low %v1305_v53, %v1309_v57  ;;  %v1257_v51 = vld [vmem:[#allocation7 + $0xa80] sm:$0xff] }
 0x135   :  { %7195 = vmatprep.subr.bf16.mxu0 %v9430_v58  ;;  %7236 = vmatprep.subr.bf16.mxu1 %v9558_v1  ;;  %v532_v26 = vadd.f32 %v531_v16, %v260_v7  ;;  %v9518_v58 = vcombine.high %v1297_v63, %v1301_v4  ;;  %v9646_v1 = vcombine.high %v1425_v5, %v1429_v6  ;;  %v1293_v7 = vld [vmem:[#allocation7 + $0xba0] sm:$0xff]  ;;  %v10732_v4 = vsub.s32 4, %v10666_v20 }
 0x136   :  { %v602_v30 = vpop.f32.mrf.mxu1  ;;  %v1281_v16 = vld [vmem:[#allocation7 + $0xb40] sm:$0xff] }
 0x137   :  { %v894_v0 = vmax.f32 %v532_v26, 0.0  ;;  %v603_v31 = vadd.f32 %v602_v30, %v268_v12  ;;  %v9645_v12 = vcombine.low %v1425_v5, %v1429_v6  ;;  %v9509_v26 = vcombine.low %v1289_v2, %v1293_v7  ;;  %v1273_v30 = vld [vmem:[#allocation7 + $0xb00] sm:$0xff] }
 0x138   :  { %7196 = vmatpush1.bf16.msra.mxu0 %v9429_v13  ;;  %7237 = vmatpush1.bf16.msra.mxu1 %v9557_v14  ;;  %v9510_v13 = vcombine.high %v1289_v2, %v1293_v7  ;;  %v9638_v14 = vcombine.high %v1417_v8, %v1421_v9  ;;  %v1261_v52 = vld [vmem:[#allocation7 + $0xaa0] sm:$0xff] }
 0x139   :  { %7197 = vmatprep.subr.bf16.mxu0 %v9422_v17  ;;  %7238 = vmatprep.subr.bf16.mxu1 %v9550_v18  ;;  %v10722_v37 = vpack.c.bf16 %v894_v0, %v894_v0  ;;  %v896_v38 = vmax.f32 %v603_v31, 0.0  ;;  %v1285_v17 = vld [vmem:[#allocation7 + $0xb60] sm:$0xff]  ;;  %v9477_v8 = vcombine.low %v1257_v51, %v1261_v52 }
 0x13a   :  { %v1409_v18 = vld [vmem:[#allocation7 + $0xf40] sm:$0xff]  ;;  %v9502_v28 = vcombine.high %v1281_v16, %v1285_v17 }
 0x13b   :  { %v10724_v42 = vpack.c.bf16 %v896_v38, %v896_v38  ;;  %7221 = vmatprep.mubr.bf16.mxu0 %v10722_v37  ;;  %v9630_v29 = vcombine.high %v1409_v18, %v1413_v19  ;;  %v1277_v0 = vld [vmem:[#allocation7 + $0xb20] sm:$0xff] }
 0x13c   :  { %7198 = vmatpush1.bf16.msra.mxu0 %v9421_v32  ;;  %7239 = vmatpush1.bf16.msra.mxu1 %v9549_v33  ;;  %v1401_v31 = vld [vmem:[#allocation7 + $0xf00] sm:$0xff]  ;;  %v9501_v33 = vcombine.low %v1281_v16, %v1285_v17 }
 0x13d   :  { %7199 = vmatprep.subr.bf16.mxu0 %v9414_v34  ;;  %7240 = vmatprep.subr.bf16.mxu1 %v9542_v35  ;;  %v1405_v32 = vld [vmem:[#allocation7 + $0xf20] sm:$0xff]  ;;  %v9629_v34 = vcombine.low %v1409_v18, %v1413_v19  ;;  %v9494_v35 = vcombine.high %v1273_v30, %v1277_v0 }
 0x13e   :  { %7262 = vmatprep.mubr.bf16.mxu1 %v10724_v42  ;;  %v9622_v36 = vcombine.high %v1401_v31, %v1405_v32  ;;  %v1265_v38 = vld [vmem:[#allocation7 + $0xac0] sm:$0xff] }
 0x13f   :  { %v1385_v53 = vld [vmem:[#allocation7 + $0xe80] sm:$0xff] }
 0x140   :  { %7200 = vmatpush1.bf16.msra.mxu0 %v9413_v43  ;;  %7241 = vmatpush1.bf16.msra.mxu1 %v9541_v44  ;;  %v9493_v43 = vcombine.low %v1273_v30, %v1277_v0  ;;  %v9621_v44 = vcombine.low %v1401_v31, %v1405_v32  ;;  %v1389_v57 = vld [vmem:[#allocation7 + $0xea0] sm:$0xff] }
 0x141   :  { %7201 = vmatprep.subr.bf16.mxu0 %v9406_v49  ;;  %7242 = vmatprep.subr.bf16.mxu1 %v9534_v50  ;;  %v9486_v49 = vcombine.high %v1265_v38, %v1269_v39  ;;  %v9614_v50 = vcombine.high %v1393_v40, %v1397_v41  ;;  %v9606_v63 = vcombine.high %v1385_v53, %v1389_v57  ;;  %v1249_v5 = vld [vmem:[#allocation7 + $0xa40] sm:$0xff] }
 0x142   :  { %v1253_v6 = vld [vmem:[#allocation7 + $0xa60] sm:$0xff]  ;;  %v9605_v9 = vcombine.low %v1385_v53, %v1389_v57 }
 0x143   :  { %v1369_v16 = vld [vmem:[#allocation7 + $0xe00] sm:$0xff] }
 0x144   :  { %7202 = vmatpush1.bf16.msra.mxu0 %v9405_v59  ;;  %7243 = vmatpush1.bf16.msra.mxu1 %v9533_v60  ;;  %v10729_v59 = vsub.s32 6, %v10666_v20  ;;  %v9485_v60 = vcombine.low %v1265_v38, %v1269_v39  ;;  %v10738_v2 = vpop.f32.mrf.mxu0  ;;  %v256_v20 = vrot.slane %v10674_v23, %v10732_v4  ;;  %v1373_v17 = vld [vmem:[#allocation7 + $0xe20] sm:$0xff] }
 0x145   :  { %7203 = vmatprep.subr.bf16.mxu0 %v9398_v61  ;;  %7244 = vmatprep.subr.bf16.mxu1 %v9526_v62  ;;  %v9613_v61 = vcombine.low %v1393_v40, %v1397_v41  ;;  %v9478_v62 = vcombine.high %v1257_v51, %v1261_v52  ;;  %v9590_v31 = vcombine.high %v1369_v16, %v1373_v17  ;;  %v1489_v32 = vld [vmem:[#allocation7 + $0x11c0] sm:$0xff] }
 0x146   :  { %v530_v30 = vadd.f32 %v10716_v11, %v256_v20  ;;  %v9589_v40 = vcombine.low %v1369_v16, %v1373_v17  ;;  %v1613_v51 = vld [vmem:[#allocation7 + $0x15a0] sm:$0xff] }
 0x147   :  { %v10740_v7 = vpop.f32.mrf.mxu1  ;;  %v1469_v16 = vld [vmem:[#allocation7 + $0x1120] sm:$0xff] }
 0x148   :  { %7204 = vmatpush1.bf16.msra.mxu0 %v9397_v55  ;;  %7245 = vmatpush1.bf16.msra.mxu1 %v9525_v56  ;;  %v1377_v55 = vld [vmem:[#allocation7 + $0xe40] sm:$0xff]  ;;  %v893_v41 = vmax.f32 %v530_v30, 0.0 }
 0x149   :  { %7205 = vmatprep.subr.bf16.mxu0 %v9518_v58  ;;  %7246 = vmatprep.subr.bf16.mxu1 %v9646_v1  ;;  %v1381_v56 = vld [vmem:[#allocation7 + $0xe60] sm:$0xff]  ;;  %v264_v58 = vrot.slane %v10674_v23, %v10729_v59  ;;  %v10736_v1 = vld [vmem:[#allocation5 + $0x8] sm:$0xff] }
 0x14a   :  { %v276_v18 = vrot.slane %v10736_v1, %v10677_v24  ;;  %v284_v19 = vrot.slane %v10736_v1, %v10680_v25  ;;  %v9597_v23 = vcombine.low %v1377_v55, %v1381_v56  ;;  %v1593_v17 = vld [vmem:[#allocation7 + $0x1500] sm:$0xff] }
 0x14b   :  { %v1585_v30 = vld [vmem:[#allocation7 + $0x14c0] sm:$0xff] }
 0x14c   :  { %7206 = vmatpush2.bf16.msra.mxu0 %v9517_v10  ;;  %7247 = vmatpush2.bf16.msra.mxu1 %v9645_v12  ;;  %v9470_v10 = vcombine.high %v1249_v5, %v1253_v6  ;;  %v9598_v12 = vcombine.high %v1377_v55, %v1381_v56  ;;  %v1477_v55 = vld [vmem:[#allocation7 + $0x1160] sm:$0xff] }
 0x14d   :  { %7207 = vmatprep.subr.bf16.mxu0 %v9510_v13  ;;  %7248 = vmatprep.subr.bf16.mxu1 %v9638_v14  ;;  %v1241_v13 = vld [vmem:[#allocation7 + $0xa00] sm:$0xff] }
 0x14e   :  { %v1245_v14 = vld [vmem:[#allocation7 + $0xa20] sm:$0xff] }
 0x14f   :  { %v9462_v0 = vcombine.high %v1241_v13, %v1245_v14  ;;  %v1601_v56 = vld [vmem:[#allocation7 + $0x1540] sm:$0xff] }
 0x150   :  { %7208 = vmatpush2.bf16.msra.mxu0 %v9509_v26  ;;  %7249 = vmatpush2.bf16.msra.mxu1 %v9637_v27  ;;  %v601_v26 = vadd.f32 %v10720_v15, %v264_v58  ;;  %v673_v27 = vpop.f32.mrf.mxu0  ;;  %v9461_v15 = vcombine.low %v1241_v13, %v1245_v14  ;;  %v1605_v58 = vld [vmem:[#allocation7 + $0x1560] sm:$0xff] }
 0x151   :  { %7209 = vmatprep.subr.bf16.mxu0 %v9502_v28  ;;  %7250 = vmatprep.subr.bf16.mxu1 %v9630_v29  ;;  %v744_v28 = vpop.f32.mrf.mxu1  ;;  %v9469_v29 = vcombine.low %v1249_v5, %v1253_v6  ;;  %v1473_v6 = vld [vmem:[#allocation7 + $0x1140] sm:$0xff]  ;;  %v9822_v13 = vcombine.high %v1601_v56, %v1605_v58 }
 0x152   :  { %v745_v38 = vadd.f32 %v744_v28, %v284_v19  ;;  %v895_v39 = vmax.f32 %v601_v26, 0.0  ;;  %v1465_v14 = vld [vmem:[#allocation7 + $0x1100] sm:$0xff]  ;;  %v9693_v19 = vcombine.low %v1473_v6, %v1477_v55  ;;  %v9821_v26 = vcombine.low %v1601_v56, %v1605_v58 }
 0x154   :  { %7210 = vmatpush2.bf16.msra.mxu0 %v9501_v33  ;;  %7251 = vmatpush2.bf16.msra.mxu1 %v9629_v34  ;;  %v1493_v33 = vld [vmem:[#allocation7 + $0x11e0] sm:$0xff]  ;;  %v900_v53 = vmax.f32 %v745_v38, 0.0  ;;  %v10750_v57 = vpack.c.bf16 %v895_v39, %v895_v39 }
 0x155   :  { %7211 = vmatprep.subr.bf16.mxu0 %v9494_v35  ;;  %7252 = vmatprep.subr.bf16.mxu1 %v9622_v36  ;;  %v1617_v34 = vld [vmem:[#allocation7 + $0x15c0] sm:$0xff]  ;;  %v674_v36 = vadd.f32 %v673_v27, %v276_v18  ;;  %v9686_v27 = vcombine.high %v1465_v14, %v1469_v16 }
 0x156   :  { %v1621_v35 = vld [vmem:[#allocation7 + $0x15e0] sm:$0xff] }
 0x157   :  { %v9838_v11 = vcombine.high %v1617_v34, %v1621_v35  ;;  %v898_v52 = vmax.f32 %v674_v36, 0.0  ;;  %v1597_v18 = vld [vmem:[#allocation7 + $0x1520] sm:$0xff] }
 0x158   :  { %7212 = vmatpush2.bf16.msra.mxu0 %v9493_v43  ;;  %7253 = vmatpush2.bf16.msra.mxu1 %v9621_v44  ;;  %v9710_v43 = vcombine.high %v1489_v32, %v1493_v33  ;;  %v1481_v44 = vld [vmem:[#allocation7 + $0x1180] sm:$0xff]  ;;  %v9814_v28 = vcombine.high %v1593_v17, %v1597_v18 }
 0x159   :  { %7213 = vmatprep.subr.bf16.mxu0 %v9486_v49  ;;  %7254 = vmatprep.subr.bf16.mxu1 %v9614_v50  ;;  %v1485_v49 = vld [vmem:[#allocation7 + $0x11a0] sm:$0xff] }
 0x15a   :  { %v1609_v50 = vld [vmem:[#allocation7 + $0x1580] sm:$0xff]  ;;  %v9701_v20 = vcombine.low %v1481_v44, %v1485_v49 }
 0x15b   :  { %v9830_v5 = vcombine.high %v1609_v50, %v1613_v51  ;;  %v1453_v36 = vld [vmem:[#allocation7 + $0x10a0] sm:$0xff] }
 0x15c   :  { %7214 = vmatpush2.bf16.msra.mxu0 %v9485_v60  ;;  %7255 = vmatpush2.bf16.msra.mxu1 %v9613_v61  ;;  %v9709_v60 = vcombine.low %v1489_v32, %v1493_v33  ;;  %v9837_v61 = vcombine.low %v1617_v34, %v1621_v35  ;;  %v9813_v32 = vcombine.low %v1593_v17, %v1597_v18  ;;  %v1449_v35 = vld [vmem:[#allocation7 + $0x1080] sm:$0xff] }
 0x15d   :  { %7215 = vmatprep.subr.bf16.mxu0 %v9478_v62  ;;  %7256 = vmatprep.subr.bf16.mxu1 %v9606_v63  ;;  %v10752_v62 = vpack.c.bf16 %v893_v41, %v893_v41  ;;  %v9702_v63 = vcombine.high %v1481_v44, %v1485_v49  ;;  %v1577_v38 = vld [vmem:[#allocation7 + $0x1480] sm:$0xff]  ;;  %v9670_v41 = vcombine.high %v1449_v35, %v1453_v36 }
 0x15e   :  { %v1581_v39 = vld [vmem:[#allocation7 + $0x14a0] sm:$0xff] }
 0x15f   :  { %v1445_v44 = vld [vmem:[#allocation7 + $0x1060] sm:$0xff] }
 0x160   :  { %7216 = vmatpush2.bf16.msra.mxu0 %v9477_v8  ;;  %7257 = vmatpush2.bf16.msra.mxu1 %v9605_v9  ;;  %v10754_v8 = vpack.c.bf16 %v898_v52, %v898_v52  ;;  %v10756_v9 = vpack.c.bf16 %v900_v53, %v900_v53  ;;  %v1569_v49 = vld [vmem:[#allocation7 + $0x1440] sm:$0xff]  ;;  %v9797_v52 = vcombine.low %v1577_v38, %v1581_v39 }
 0x161   :  { %7217 = vmatprep.subr.bf16.mxu0 %v9470_v10  ;;  %7258 = vmatprep.subr.bf16.mxu1 %v9598_v12  ;;  %v9829_v10 = vcombine.low %v1609_v50, %v1613_v51  ;;  %v9694_v12 = vcombine.high %v1473_v6, %v1477_v55  ;;  %v1573_v50 = vld [vmem:[#allocation7 + $0x1460] sm:$0xff]  ;;  %v9669_v51 = vcombine.low %v1449_v35, %v1453_v36 }
 0x162   :  { %v1565_v6 = vld [vmem:[#allocation7 + $0x1420] sm:$0xff]  ;;  %v9789_v56 = vcombine.low %v1569_v49, %v1573_v50 }
 0x163   :  { %v1669_v35 = vld [vmem:[#allocation7 + $0x1760] sm:$0xff] }
 0x164   :  { %7218 = vmatpush2.bf16.msra.mxu0 %v9469_v29  ;;  %7259 = vmatpush2.bf16.msra.mxu1 %v9597_v23  ;;  %v1457_v29 = vld [vmem:[#allocation7 + $0x10c0] sm:$0xff] }
 0x165   :  { %7219 = vmatprep.subr.bf16.mxu0 %v9462_v0  ;;  %7260 = vmatprep.subr.bf16.mxu1 %v9590_v31  ;;  %v1461_v23 = vld [vmem:[#allocation7 + $0x10e0] sm:$0xff]  ;;  %v9685_v31 = vcombine.low %v1465_v14, %v1469_v16 }
 0x166   :  { %v1589_v0 = vld [vmem:[#allocation7 + $0x14e0] sm:$0xff]  ;;  %v9678_v33 = vcombine.high %v1457_v29, %v1461_v23 }
 0x167   :  { %v9806_v34 = vcombine.high %v1585_v30, %v1589_v0  ;;  %v1685_v14 = vld [vmem:[#allocation7 + $0x17e0] sm:$0xff] }
 0x168   :  { %7220 = vmatpush2.bf16.msra.mxu0 %v9461_v15  ;;  %7261 = vmatpush2.bf16.msra.mxu1 %v9589_v40  ;;  %v9677_v15 = vcombine.low %v1457_v29, %v1461_v23  ;;  %v9805_v40 = vcombine.low %v1585_v30, %v1589_v0  ;;  %v1677_v29 = vld [vmem:[#allocation7 + $0x17a0] sm:$0xff] }
 0x169   :  { %7271 = vmatprep.subr.bf16.mxu0 %v9710_v43  ;;  %7312 = vmatprep.subr.bf16.mxu1 %v9838_v11  ;;  %v9798_v43 = vcombine.high %v1577_v38, %v1581_v39  ;;  %v1441_v11 = vld [vmem:[#allocation7 + $0x1040] sm:$0xff] }
 0x16a   :  { %v9662_v53 = vcombine.high %v1441_v11, %v1445_v44  ;;  %v9661_v55 = vcombine.low %v1441_v11, %v1445_v44  ;;  %v1661_v11 = vld [vmem:[#allocation7 + $0x1720] sm:$0xff] }
 0x16b   :  { %7222 = vmatmul.mubr.bf16.vlgmr.msra.gmra.mxu0 %v10752_v62  ;;  %7263 = vmatmul.mubr.bf16.vlgmr.msra.gmra.mxu1 %v10750_v57 }
 0x16c   :  { %7272 = vmatpush1.bf16.msra.mxu0 %v9709_v60  ;;  %7313 = vmatpush1.bf16.msra.mxu1 %v9837_v61  ;;  %v9790_v60 = vcombine.high %v1569_v49, %v1573_v50  ;;  %v1433_v61 = vld [vmem:[#allocation7 + $0x1000] sm:$0xff] }
 0x16d   :  { %7273 = vmatprep.subr.bf16.mxu0 %v9702_v63  ;;  %7314 = vmatprep.subr.bf16.mxu1 %v9830_v5  ;;  %v1437_v63 = vld [vmem:[#allocation7 + $0x1020] sm:$0xff] }
 0x16e   :  { %7303 = vmatprep.mubr.bf16.mxu0 %v10754_v8  ;;  %7344 = vmatprep.mubr.bf16.mxu1 %v10756_v9  ;;  %v1561_v5 = vld [vmem:[#allocation7 + $0x1400] sm:$0xff]  ;;  %v9654_v58 = vcombine.high %v1433_v61, %v1437_v63  ;;  %v9653_v16 = vcombine.low %v1433_v61, %v1437_v63 }
 0x16f   :  { %v9781_v17 = vcombine.low %v1561_v5, %v1565_v6  ;;  %v1653_v61 = vld [vmem:[#allocation7 + $0x16e0] sm:$0xff] }
 0x170   :  { %7274 = vmatpush1.bf16.msra.mxu0 %v9701_v20  ;;  %7315 = vmatpush1.bf16.msra.mxu1 %v9829_v10  ;;  %v9782_v20 = vcombine.high %v1561_v5, %v1565_v6  ;;  %v1553_v10 = vld [vmem:[#allocation7 + $0x13c0] sm:$0xff] }
 0x171   :  { %7275 = vmatprep.subr.bf16.mxu0 %v9694_v12  ;;  %7316 = vmatprep.subr.bf16.mxu1 %v9822_v13  ;;  %v1557_v12 = vld [vmem:[#allocation7 + $0x13e0] sm:$0xff] }
 0x172   :  { %v1681_v13 = vld [vmem:[#allocation7 + $0x17c0] sm:$0xff]  ;;  %v9774_v18 = vcombine.high %v1553_v10, %v1557_v12  ;;  %v9773_v23 = vcombine.low %v1553_v10, %v1557_v12 }
 0x173   :  { %v9901_v30 = vcombine.low %v1681_v13, %v1685_v14  ;;  %v1645_v10 = vld [vmem:[#allocation7 + $0x16a0] sm:$0xff] }
 0x174   :  { %7276 = vmatpush1.bf16.msra.mxu0 %v9693_v19  ;;  %7317 = vmatpush1.bf16.msra.mxu1 %v9821_v26  ;;  %v9902_v19 = vcombine.high %v1681_v13, %v1685_v14  ;;  %v1545_v26 = vld [vmem:[#allocation7 + $0x1380] sm:$0xff] }
 0x175   :  { %7277 = vmatprep.subr.bf16.mxu0 %v9686_v27  ;;  %7318 = vmatprep.subr.bf16.mxu1 %v9814_v28  ;;  %v1549_v27 = vld [vmem:[#allocation7 + $0x13a0] sm:$0xff] }
 0x176   :  { %v1673_v28 = vld [vmem:[#allocation7 + $0x1780] sm:$0xff]  ;;  %v9766_v0 = vcombine.high %v1545_v26, %v1549_v27  ;;  %v9765_v36 = vcombine.low %v1545_v26, %v1549_v27  ;;  %v10762_v27 = vpop.f32.mrf.mxu0 }
 0x177   :  { %v9893_v38 = vcombine.low %v1673_v28, %v1677_v29  ;;  %v1637_v26 = vld [vmem:[#allocation7 + $0x1660] sm:$0xff] }
 0x178   :  { %7278 = vmatpush1.bf16.msra.mxu0 %v9685_v31  ;;  %7319 = vmatpush1.bf16.msra.mxu1 %v9813_v32  ;;  %v9894_v31 = vcombine.high %v1673_v28, %v1677_v29  ;;  %v1537_v32 = vld [vmem:[#allocation7 + $0x1340] sm:$0xff]  ;;  %v10764_v28 = vpop.f32.mrf.mxu1  ;;  %v272_v29 = vrot.slane %v10736_v1, %v10669_v21 }
 0x179   :  { %7279 = vmatprep.subr.bf16.mxu0 %v9678_v33  ;;  %7320 = vmatprep.subr.bf16.mxu1 %v9806_v34  ;;  %v1541_v33 = vld [vmem:[#allocation7 + $0x1360] sm:$0xff] }
 0x17a   :  { %v1665_v34 = vld [vmem:[#allocation7 + $0x1740] sm:$0xff]  ;;  %v9758_v39 = vcombine.high %v1537_v32, %v1541_v33  ;;  %v9757_v44 = vcombine.low %v1537_v32, %v1541_v33 }
 0x17b   :  { %v9885_v49 = vcombine.low %v1665_v34, %v1669_v35  ;;  %v1497_v33 = vld [vmem:[#allocation7 + $0x1200] sm:$0xff] }
 0x17c   :  { %7280 = vmatpush1.bf16.msra.mxu0 %v9677_v15  ;;  %7321 = vmatpush1.bf16.msra.mxu1 %v9805_v40  ;;  %v9886_v15 = vcombine.high %v1665_v34, %v1669_v35  ;;  %v1529_v40 = vld [vmem:[#allocation7 + $0x1300] sm:$0xff] }
 0x17d   :  { %7281 = vmatprep.subr.bf16.mxu0 %v9670_v41  ;;  %7322 = vmatprep.subr.bf16.mxu1 %v9798_v43  ;;  %v1533_v41 = vld [vmem:[#allocation7 + $0x1320] sm:$0xff] }
 0x17e   :  { %v1657_v43 = vld [vmem:[#allocation7 + $0x1700] sm:$0xff]  ;;  %v9750_v50 = vcombine.high %v1529_v40, %v1533_v41  ;;  %v9749_v63 = vcombine.low %v1529_v40, %v1533_v41  ;;  %v886_v40 = vpop.f32.mrf.mxu1 }
 0x17f   :  { %v9877_v5 = vcombine.low %v1657_v43, %v1661_v11  ;;  %v1501_v34 = vld [vmem:[#allocation7 + $0x1220] sm:$0xff] }
 0x180   :  { %7282 = vmatpush1.bf16.msra.mxu0 %v9669_v51  ;;  %7323 = vmatpush1.bf16.msra.mxu1 %v9797_v52  ;;  %v9878_v51 = vcombine.high %v1657_v43, %v1661_v11  ;;  %v1521_v52 = vld [vmem:[#allocation7 + $0x12c0] sm:$0xff]  ;;  %v9718_v11 = vcombine.high %v1497_v33, %v1501_v34 }
 0x181   :  { %7283 = vmatprep.subr.bf16.mxu0 %v9662_v53  ;;  %7324 = vmatprep.subr.bf16.mxu1 %v9790_v60  ;;  %v1525_v53 = vld [vmem:[#allocation7 + $0x12e0] sm:$0xff] }
 0x182   :  { %v1649_v60 = vld [vmem:[#allocation7 + $0x16c0] sm:$0xff]  ;;  %v9742_v6 = vcombine.high %v1521_v52, %v1525_v53  ;;  %v9741_v12 = vcombine.low %v1521_v52, %v1525_v53 }
 0x183   :  { %v9869_v13 = vcombine.low %v1649_v60, %v1653_v61  ;;  %v1625_v35 = vld [vmem:[#allocation7 + $0x1600] sm:$0xff] }
 0x184   :  { %7284 = vmatpush1.bf16.msra.mxu0 %v9661_v55  ;;  %7325 = vmatpush1.bf16.msra.mxu1 %v9789_v56  ;;  %v9870_v55 = vcombine.high %v1649_v60, %v1653_v61  ;;  %v1513_v56 = vld [vmem:[#allocation7 + $0x1280] sm:$0xff] }
 0x185   :  { %7285 = vmatprep.subr.bf16.mxu0 %v9654_v58  ;;  %7326 = vmatprep.subr.bf16.mxu1 %v9782_v20  ;;  %v1517_v58 = vld [vmem:[#allocation7 + $0x12a0] sm:$0xff] }
 0x186   :  { %v1641_v20 = vld [vmem:[#allocation7 + $0x1680] sm:$0xff]  ;;  %v9734_v14 = vcombine.high %v1513_v56, %v1517_v58 }
 0x187   :  { %v1749_v52 = vld [vmem:[#allocation7 + $0x19e0] sm:$0xff] }
 0x188   :  { %7286 = vmatpush1.bf16.msra.mxu0 %v9653_v16  ;;  %7327 = vmatpush1.bf16.msra.mxu1 %v9781_v17  ;;  %v9862_v16 = vcombine.high %v1641_v20, %v1645_v10  ;;  %v1505_v17 = vld [vmem:[#allocation7 + $0x1240] sm:$0xff] }
 0x189   :  { %7287 = vmatprep.subr.bf16.mxu0 %v9774_v18  ;;  %7328 = vmatprep.subr.bf16.mxu1 %v9902_v19  ;;  %v1509_v18 = vld [vmem:[#allocation7 + $0x1260] sm:$0xff] }
 0x18a   :  { %v1633_v19 = vld [vmem:[#allocation7 + $0x1640] sm:$0xff]  ;;  %v9725_v41 = vcombine.low %v1505_v17, %v1509_v18 }
 0x18b   :  { %v9854_v32 = vcombine.high %v1633_v19, %v1637_v26  ;;  %v9853_v43 = vcombine.low %v1633_v19, %v1637_v26  ;;  %v1873_v53 = vld [vmem:[#allocation7 + $0x1dc0] sm:$0xff] }
 0x18c   :  { %7288 = vmatpush2.bf16.msra.mxu0 %v9773_v23  ;;  %7329 = vmatpush2.bf16.msra.mxu1 %v9901_v30  ;;  %v9733_v23 = vcombine.low %v1513_v56, %v1517_v58  ;;  %v9861_v30 = vcombine.low %v1641_v20, %v1645_v10  ;;  %v1877_v60 = vld [vmem:[#allocation7 + $0x1de0] sm:$0xff] }
 0x18d   :  { %7289 = vmatprep.subr.bf16.mxu0 %v9766_v0  ;;  %7330 = vmatprep.subr.bf16.mxu1 %v9894_v31  ;;  %v280_v0 = vrot.slane %v10736_v1, %v10672_v22  ;;  %v9726_v31 = vcombine.high %v1505_v17, %v1509_v18  ;;  %v10094_v58 = vcombine.high %v1873_v53, %v1877_v60  ;;  %v1741_v20 = vld [vmem:[#allocation7 + $0x19a0] sm:$0xff] }
 0x18e   :  { %v10093_v17 = vcombine.low %v1873_v53, %v1877_v60  ;;  %v1845_v53 = vld [vmem:[#allocation7 + $0x1ce0] sm:$0xff] }
 0x190   :  { %7290 = vmatpush2.bf16.msra.mxu0 %v9765_v36  ;;  %7331 = vmatpush2.bf16.msra.mxu1 %v9893_v38  ;;  %v1629_v36 = vld [vmem:[#allocation7 + $0x1620] sm:$0xff]  ;;  %v292_v38 = vrot.slane %v10736_v1, %v10709_v3 }
 0x191   :  { %7291 = vmatprep.subr.bf16.mxu0 %v9758_v39  ;;  %7332 = vmatprep.subr.bf16.mxu1 %v9886_v15  ;;  %v300_v39 = vrot.slane %v10736_v1, %v10712_v54  ;;  %v815_v15 = vpop.f32.mrf.mxu0 }
 0x192   :  { %v816_v61 = vadd.f32 %v815_v15, %v292_v38  ;;  %v1725_v15 = vld [vmem:[#allocation7 + $0x1920] sm:$0xff] }
 0x194   :  { %7292 = vmatpush2.bf16.msra.mxu0 %v9757_v44  ;;  %7333 = vmatpush2.bf16.msra.mxu1 %v9885_v49  ;;  %v672_v44 = vadd.f32 %v10738_v2, %v272_v29  ;;  %v743_v49 = vadd.f32 %v10740_v7, %v280_v0  ;;  %v1737_v7 = vld [vmem:[#allocation7 + $0x1980] sm:$0xff]  ;;  %v902_v10 = vmax.f32 %v816_v61, 0.0 }
 0x195   :  { %7293 = vmatprep.subr.bf16.mxu0 %v9750_v50  ;;  %7334 = vmatprep.subr.bf16.mxu1 %v9878_v51  ;;  %v9846_v50 = vcombine.high %v1625_v35, %v1629_v36  ;;  %v1745_v51 = vld [vmem:[#allocation7 + $0x19c0] sm:$0xff]  ;;  %v9958_v18 = vcombine.high %v1737_v7, %v1741_v20 }
 0x196   :  { %v899_v56 = vmax.f32 %v743_v49, 0.0  ;;  %v9966_v2 = vcombine.high %v1745_v51, %v1749_v52 }
 0x198   :  { %7294 = vmatpush2.bf16.msra.mxu0 %v9749_v63  ;;  %7335 = vmatpush2.bf16.msra.mxu1 %v9877_v5  ;;  %v887_v63 = vadd.f32 %v886_v40, %v300_v39  ;;  %v9717_v5 = vcombine.low %v1497_v33, %v1501_v34  ;;  %v10778_v26 = vpack.c.bf16 %v899_v56, %v899_v56  ;;  %v1861_v33 = vld [vmem:[#allocation7 + $0x1d60] sm:$0xff] }
 0x199   :  { %7295 = vmatprep.subr.bf16.mxu0 %v9742_v6  ;;  %7336 = vmatprep.subr.bf16.mxu1 %v9870_v55  ;;  %v9845_v6 = vcombine.low %v1625_v35, %v1629_v36  ;;  %v897_v55 = vmax.f32 %v672_v44, 0.0  ;;  %v9957_v34 = vcombine.low %v1737_v7, %v1741_v20  ;;  %v1721_v39 = vld [vmem:[#allocation7 + $0x1900] sm:$0xff] }
 0x19a   :  { %v1849_v40 = vld [vmem:[#allocation7 + $0x1d00] sm:$0xff]  ;;  %v9942_v44 = vcombine.high %v1721_v39, %v1725_v15  ;;  %v9941_v60 = vcombine.low %v1721_v39, %v1725_v15 }
 0x19b   :  { %v10776_v19 = vpack.c.bf16 %v897_v55, %v897_v55  ;;  %v1709_v55 = vld [vmem:[#allocation7 + $0x18a0] sm:$0xff] }
 0x19c   :  { %7296 = vmatpush2.bf16.msra.mxu0 %v9741_v12  ;;  %7337 = vmatpush2.bf16.msra.mxu1 %v9869_v13  ;;  %v904_v12 = vmax.f32 %v887_v63, 0.0  ;;  %v1865_v13 = vld [vmem:[#allocation7 + $0x1d80] sm:$0xff] }
 0x19d   :  { %7297 = vmatprep.subr.bf16.mxu0 %v9734_v14  ;;  %7338 = vmatprep.subr.bf16.mxu1 %v9862_v16  ;;  %v1869_v14 = vld [vmem:[#allocation7 + $0x1da0] sm:$0xff]  ;;  %v9965_v16 = vcombine.low %v1745_v51, %v1749_v52 }
 0x19e   :  { %v10086_v29 = vcombine.high %v1865_v13, %v1869_v14  ;;  %v10782_v0 = vpack.c.bf16 %v904_v12, %v904_v12  ;;  %v10085_v35 = vcombine.low %v1865_v13, %v1869_v14  ;;  %v1717_v51 = vld [vmem:[#allocation7 + $0x18e0] sm:$0xff] }
 0x19f   :  { %v1841_v52 = vld [vmem:[#allocation7 + $0x1cc0] sm:$0xff] }
 0x1a0   :  { %7298 = vmatpush2.bf16.msra.mxu0 %v9733_v23  ;;  %7339 = vmatpush2.bf16.msra.mxu1 %v9861_v30  ;;  %v1729_v23 = vld [vmem:[#allocation7 + $0x1940] sm:$0xff]  ;;  %v10780_v30 = vpack.c.bf16 %v902_v10, %v902_v10  ;;  %v10061_v7 = vcombine.low %v1841_v52, %v1845_v53 }
 0x1a1   :  { %7299 = vmatprep.subr.bf16.mxu0 %v9726_v31  ;;  %7340 = vmatprep.subr.bf16.mxu1 %v9854_v32  ;;  %v1733_v31 = vld [vmem:[#allocation7 + $0x1960] sm:$0xff] }
 0x1a2   :  { %v1857_v32 = vld [vmem:[#allocation7 + $0x1d40] sm:$0xff]  ;;  %v9950_v36 = vcombine.high %v1729_v23, %v1733_v31 }
 0x1a3   :  { %v10078_v38 = vcombine.high %v1857_v32, %v1861_v33  ;;  %v1833_v56 = vld [vmem:[#allocation7 + $0x1c80] sm:$0xff] }
 0x1a4   :  { %7300 = vmatpush2.bf16.msra.mxu0 %v9725_v41  ;;  %7341 = vmatpush2.bf16.msra.mxu1 %v9853_v43  ;;  %v1853_v41 = vld [vmem:[#allocation7 + $0x1d20] sm:$0xff]  ;;  %v9949_v43 = vcombine.low %v1729_v23, %v1733_v31 }
 0x1a5   :  { %7301 = vmatprep.subr.bf16.mxu0 %v9718_v11  ;;  %7342 = vmatprep.subr.bf16.mxu1 %v9846_v50  ;;  %v10077_v11 = vcombine.low %v1857_v32, %v1861_v33  ;;  %v10070_v49 = vcombine.high %v1849_v40, %v1853_v41  ;;  %v1713_v50 = vld [vmem:[#allocation7 + $0x18c0] sm:$0xff]  ;;  %v10069_v61 = vcombine.low %v1849_v40, %v1853_v41 }
 0x1a6   :  { %v9934_v63 = vcombine.high %v1713_v50, %v1717_v51  ;;  %v1697_v12 = vld [vmem:[#allocation7 + $0x1840] sm:$0xff] }
 0x1a7   :  { %v1701_v13 = vld [vmem:[#allocation7 + $0x1860] sm:$0xff] }
 0x1a8   :  { %7302 = vmatpush2.bf16.msra.mxu0 %v9717_v5  ;;  %7343 = vmatpush2.bf16.msra.mxu1 %v9845_v6  ;;  %v10062_v5 = vcombine.high %v1841_v52, %v1845_v53  ;;  %v1705_v6 = vld [vmem:[#allocation7 + $0x1880] sm:$0xff] }
 0x1a9   :  { %7353 = vmatprep.subr.bf16.mxu0 %v9966_v2  ;;  %7394 = vmatprep.subr.bf16.mxu1 %v10094_v58  ;;  %v1837_v2 = vld [vmem:[#allocation7 + $0x1ca0] sm:$0xff]  ;;  %v9933_v58 = vcombine.low %v1713_v50, %v1717_v51  ;;  %v9926_v20 = vcombine.high %v1705_v6, %v1709_v55 }
 0x1aa   :  { %v10054_v10 = vcombine.high %v1833_v56, %v1837_v2  ;;  %v1825_v14 = vld [vmem:[#allocation7 + $0x1c40] sm:$0xff] }
 0x1ab   :  { %7304 = vmatmul.mubr.bf16.vlgmr.msra.gmra.mxu0 %v10776_v19  ;;  %7345 = vmatmul.mubr.bf16.vlgmr.msra.gmra.mxu1 %v10778_v26  ;;  %v1689_v31 = vld [vmem:[#allocation7 + $0x1800] sm:$0xff] }
 0x1ac   :  { %7354 = vmatpush1.bf16.msra.mxu0 %v9965_v16  ;;  %7395 = vmatpush1.bf16.msra.mxu1 %v10093_v17  ;;  %v1829_v16 = vld [vmem:[#allocation7 + $0x1c60] sm:$0xff]  ;;  %v9925_v17 = vcombine.low %v1705_v6, %v1709_v55 }
 0x1ad   :  { %7355 = vmatprep.subr.bf16.mxu0 %v9958_v18  ;;  %7396 = vmatprep.subr.bf16.mxu1 %v10086_v29  ;;  %v10053_v18 = vcombine.low %v1833_v56, %v1837_v2  ;;  %v9918_v29 = vcombine.high %v1697_v12, %v1701_v13  ;;  %v10046_v23 = vcombine.high %v1825_v14, %v1829_v16  ;;  %v1693_v32 = vld [vmem:[#allocation7 + $0x1820] sm:$0xff] }
 0x1ae   :  { %7385 = vmatprep.mubr.bf16.mxu0 %v10780_v30  ;;  %7426 = vmatprep.mubr.bf16.mxu1 %v10782_v0  ;;  %v1817_v33 = vld [vmem:[#allocation7 + $0x1c00] sm:$0xff] }
 0x1af   :  { %v1809_v15 = vld [vmem:[#allocation7 + $0x1bc0] sm:$0xff] }
 0x1b0   :  { %7356 = vmatpush1.bf16.msra.mxu0 %v9957_v34  ;;  %7397 = vmatpush1.bf16.msra.mxu1 %v10085_v35  ;;  %v1821_v34 = vld [vmem:[#allocation7 + $0x1c20] sm:$0xff]  ;;  %v9917_v35 = vcombine.low %v1697_v12, %v1701_v13 }
 0x1b1   :  { %7357 = vmatprep.subr.bf16.mxu0 %v9950_v36  ;;  %7398 = vmatprep.subr.bf16.mxu1 %v10078_v38  ;;  %v10045_v36 = vcombine.low %v1825_v14, %v1829_v16  ;;  %v9910_v38 = vcombine.high %v1689_v31, %v1693_v32  ;;  %v10038_v39 = vcombine.high %v1817_v33, %v1821_v34  ;;  %v1813_v40 = vld [vmem:[#allocation7 + $0x1be0] sm:$0xff] }
 0x1b2   :  { %v1937_v41 = vld [vmem:[#allocation7 + $0x1fc0] sm:$0xff] }
 0x1b3   :  { %v1801_v51 = vld [vmem:[#allocation7 + $0x1b80] sm:$0xff] }
 0x1b4   :  { %7358 = vmatpush1.bf16.msra.mxu0 %v9949_v43  ;;  %7399 = vmatpush1.bf16.msra.mxu1 %v10077_v11  ;;  %v1941_v43 = vld [vmem:[#allocation7 + $0x1fe0] sm:$0xff]  ;;  %v9909_v11 = vcombine.low %v1689_v31, %v1693_v32 }
 0x1b5   :  { %7359 = vmatprep.subr.bf16.mxu0 %v9942_v44  ;;  %7400 = vmatprep.subr.bf16.mxu1 %v10070_v49  ;;  %v10037_v44 = vcombine.low %v1817_v33, %v1821_v34  ;;  %v10030_v49 = vcombine.high %v1809_v15, %v1813_v40  ;;  %v10158_v50 = vcombine.high %v1937_v41, %v1941_v43  ;;  %v1805_v52 = vld [vmem:[#allocation7 + $0x1ba0] sm:$0xff] }
 0x1b6   :  { %v1929_v53 = vld [vmem:[#allocation7 + $0x1f80] sm:$0xff] }
 0x1b7   :  { %v1793_v55 = vld [vmem:[#allocation7 + $0x1b40] sm:$0xff] }
 0x1b8   :  { %7360 = vmatpush1.bf16.msra.mxu0 %v9941_v60  ;;  %7401 = vmatpush1.bf16.msra.mxu1 %v10069_v61  ;;  %v1933_v60 = vld [vmem:[#allocation7 + $0x1fa0] sm:$0xff]  ;;  %v10029_v61 = vcombine.low %v1809_v15, %v1813_v40 }
 0x1b9   :  { %7361 = vmatprep.subr.bf16.mxu0 %v9934_v63  ;;  %7402 = vmatprep.subr.bf16.mxu1 %v10062_v5  ;;  %v10157_v63 = vcombine.low %v1937_v41, %v1941_v43  ;;  %v10022_v5 = vcombine.high %v1801_v51, %v1805_v52  ;;  %v10150_v6 = vcombine.high %v1929_v53, %v1933_v60  ;;  %v1797_v56 = vld [vmem:[#allocation7 + $0x1b60] sm:$0xff] }
 0x1ba   :  { %v1921_v2 = vld [vmem:[#allocation7 + $0x1f40] sm:$0xff] }
 0x1bb   :  { %v1785_v13 = vld [vmem:[#allocation7 + $0x1b00] sm:$0xff] }
 0x1bc   :  { %7362 = vmatpush1.bf16.msra.mxu0 %v9933_v58  ;;  %7403 = vmatpush1.bf16.msra.mxu1 %v10061_v7  ;;  %v1925_v58 = vld [vmem:[#allocation7 + $0x1f60] sm:$0xff]  ;;  %v10021_v7 = vcombine.low %v1801_v51, %v1805_v52 }
 0x1bd   :  { %7363 = vmatprep.subr.bf16.mxu0 %v9926_v20  ;;  %7404 = vmatprep.subr.bf16.mxu1 %v10054_v10  ;;  %v10149_v20 = vcombine.low %v1929_v53, %v1933_v60  ;;  %v10014_v10 = vcombine.high %v1793_v55, %v1797_v56  ;;  %v10142_v12 = vcombine.high %v1921_v2, %v1925_v58  ;;  %v1789_v14 = vld [vmem:[#allocation7 + $0x1b20] sm:$0xff] }
 0x1be   :  { %v1913_v16 = vld [vmem:[#allocation7 + $0x1f00] sm:$0xff] }
 0x1bf   :  { %v1777_v32 = vld [vmem:[#allocation7 + $0x1ac0] sm:$0xff] }
 0x1c0   :  { %7364 = vmatpush1.bf16.msra.mxu0 %v9925_v17  ;;  %7405 = vmatpush1.bf16.msra.mxu1 %v10053_v18  ;;  %v1917_v17 = vld [vmem:[#allocation7 + $0x1f20] sm:$0xff]  ;;  %v10013_v18 = vcombine.low %v1793_v55, %v1797_v56  ;;  %v296_v55 = vrot.slane %v10736_v1, %v10729_v59 }
 0x1c1   :  { %7365 = vmatprep.subr.bf16.mxu0 %v9918_v29  ;;  %7406 = vmatprep.subr.bf16.mxu1 %v10046_v23  ;;  %v10141_v29 = vcombine.low %v1921_v2, %v1925_v58  ;;  %v10006_v23 = vcombine.high %v1785_v13, %v1789_v14  ;;  %v10134_v31 = vcombine.high %v1913_v16, %v1917_v17  ;;  %v1781_v33 = vld [vmem:[#allocation7 + $0x1ae0] sm:$0xff] }
 0x1c2   :  { %v1905_v34 = vld [vmem:[#allocation7 + $0x1ec0] sm:$0xff] }
 0x1c3   :  { %v1769_v40 = vld [vmem:[#allocation7 + $0x1a80] sm:$0xff] }
 0x1c4   :  { %7366 = vmatpush1.bf16.msra.mxu0 %v9917_v35  ;;  %7407 = vmatpush1.bf16.msra.mxu1 %v10045_v36  ;;  %v1909_v35 = vld [vmem:[#allocation7 + $0x1ee0] sm:$0xff]  ;;  %v10005_v36 = vcombine.low %v1785_v13, %v1789_v14 }
 0x1c5   :  { %7367 = vmatprep.subr.bf16.mxu0 %v9910_v38  ;;  %7408 = vmatprep.subr.bf16.mxu1 %v10038_v39  ;;  %v10133_v38 = vcombine.low %v1913_v16, %v1917_v17  ;;  %v9998_v39 = vcombine.high %v1777_v32, %v1781_v33  ;;  %v10126_v15 = vcombine.high %v1905_v34, %v1909_v35  ;;  %v1773_v41 = vld [vmem:[#allocation7 + $0x1aa0] sm:$0xff] }
 0x1c6   :  { %v1897_v43 = vld [vmem:[#allocation7 + $0x1e80] sm:$0xff]  ;;  %v885_v16 = vadd.f32 %v10764_v28, %v296_v55  ;;  %v970_v28 = vld [vmem:[#allocation7 + $0x188] sm:$0xff] }
 0x1c7   :  { %v1761_v52 = vld [vmem:[#allocation7 + $0x1a40] sm:$0xff] }
 0x1c8   :  { %7368 = vmatpush1.bf16.msra.mxu0 %v9909_v11  ;;  %7409 = vmatpush1.bf16.msra.mxu1 %v10037_v44  ;;  %v1901_v11 = vld [vmem:[#allocation7 + $0x1ea0] sm:$0xff]  ;;  %v9997_v44 = vcombine.low %v1777_v32, %v1781_v33 }
 0x1c9   :  { %7369 = vmatprep.subr.bf16.mxu0 %v10030_v49  ;;  %7410 = vmatprep.subr.bf16.mxu1 %v10158_v50  ;;  %v10125_v49 = vcombine.low %v1905_v34, %v1909_v35  ;;  %v9990_v50 = vcombine.high %v1769_v40, %v1773_v41  ;;  %v10118_v51 = vcombine.high %v1897_v43, %v1901_v11  ;;  %v1765_v53 = vld [vmem:[#allocation7 + $0x1a60] sm:$0xff] }
 0x1ca   :  { %v1889_v60 = vld [vmem:[#allocation7 + $0x1e40] sm:$0xff]  ;;  %v9982_v56 = vcombine.high %v1761_v52, %v1765_v53  ;;  %v9981_v13 = vcombine.low %v1761_v52, %v1765_v53  ;;  %v962_v53 = vld [vmem:[#allocation7 + $0x148] sm:$0xff] }
 0x1cb   :  { %v1753_v58 = vld [vmem:[#allocation7 + $0x1a00] sm:$0xff] }
 0x1cc   :  { %7370 = vmatpush2.bf16.msra.mxu0 %v10029_v61  ;;  %7411 = vmatpush2.bf16.msra.mxu1 %v10157_v63  ;;  %v1893_v61 = vld [vmem:[#allocation7 + $0x1e60] sm:$0xff]  ;;  %v288_v63 = vrot.slane %v10736_v1, %v10732_v4 }
 0x1cd   :  { %7371 = vmatprep.subr.bf16.mxu0 %v10022_v5  ;;  %7412 = vmatprep.subr.bf16.mxu1 %v10150_v6  ;;  %v9989_v5 = vcombine.low %v1769_v40, %v1773_v41  ;;  %v10117_v6 = vcombine.low %v1897_v43, %v1901_v11  ;;  %v10110_v2 = vcombine.high %v1889_v60, %v1893_v61  ;;  %v1102_v40 = vld [vmem:[#allocation7 + $0x5a8] sm:$0xff] }
 0x1ce   :  { %v10109_v14 = vcombine.low %v1889_v60, %v1893_v61  ;;  %v966_v60 = vld [vmem:[#allocation7 + $0x168] sm:$0xff] }
 0x1d0   :  { %7372 = vmatpush2.bf16.msra.mxu0 %v10021_v7  ;;  %7413 = vmatpush2.bf16.msra.mxu1 %v10149_v20  ;;  %v1757_v7 = vld [vmem:[#allocation7 + $0x1a20] sm:$0xff] }
 0x1d1   :  { %7373 = vmatprep.subr.bf16.mxu0 %v10014_v10  ;;  %7414 = vmatprep.subr.bf16.mxu1 %v10142_v12  ;;  %v1881_v20 = vld [vmem:[#allocation7 + $0x1e00] sm:$0xff]  ;;  %v814_v12 = vadd.f32 %v10762_v27, %v288_v63  ;;  %v9974_v17 = vcombine.high %v1753_v58, %v1757_v7  ;;  %v9973_v32 = vcombine.low %v1753_v58, %v1757_v7  ;;  %v903_v27 = vmax.f32 %v885_v16, 0.0 }
 0x1d2   :  { %v1885_v10 = vld [vmem:[#allocation7 + $0x1e20] sm:$0xff]  ;;  %v9184_v58 = vcombine.high %v962_v53, %v966_v60 }
 0x1d3   :  { %v10102_v1 = vcombine.high %v1881_v20, %v1885_v10  ;;  %v10101_v33 = vcombine.low %v1881_v20, %v1885_v10  ;;  %v901_v34 = vmax.f32 %v814_v12, 0.0  ;;  %v954_v12 = vld [vmem:[#allocation7 + $0x108] sm:$0xff] }
 0x1d4   :  { %7374 = vmatpush2.bf16.msra.mxu0 %v10013_v18  ;;  %7415 = vmatpush2.bf16.msra.mxu1 %v10141_v29  ;;  %v978_v18 = vld [vmem:[#allocation7 + $0x1c8] sm:$0xff] }
 0x1d5   :  { %7375 = vmatprep.subr.bf16.mxu0 %v10006_v23  ;;  %7416 = vmatprep.subr.bf16.mxu1 %v10134_v31  ;;  %v982_v29 = vld [vmem:[#allocation7 + $0x1e8] sm:$0xff]  ;;  %v10795_v11 = vpack.c.bf16 %v901_v34, %v901_v34 }
 0x1d6   :  { %v1106_v23 = vld [vmem:[#allocation7 + $0x5c8] sm:$0xff]  ;;  %v9200_v35 = vcombine.high %v978_v18, %v982_v29  ;;  %v9199_v41 = vcombine.low %v978_v18, %v982_v29  ;;  %v9183_v29 = vcombine.low %v962_v53, %v966_v60 }
 0x1d7   :  { %v1110_v31 = vld [vmem:[#allocation7 + $0x5e8] sm:$0xff] }
 0x1d8   :  { %7376 = vmatpush2.bf16.msra.mxu0 %v10005_v36  ;;  %7417 = vmatpush2.bf16.msra.mxu1 %v10133_v38  ;;  %v9328_v36 = vcombine.high %v1106_v23, %v1110_v31  ;;  %v1945_v38 = vld [vmem:[#allocation8] sm:$0xff] }
 0x1d9   :  { %7377 = vmatprep.subr.bf16.mxu0 %v9998_v39  ;;  %7418 = vmatprep.subr.bf16.mxu1 %v10126_v15  ;;  %v974_v39 = vld [vmem:[#allocation7 + $0x1a8] sm:$0xff]  ;;  %v1950_v43 = vrot.slane %v1945_v38, %v10669_v21 }
 0x1da   :  { %v1098_v15 = vld [vmem:[#allocation7 + $0x588] sm:$0xff]  ;;  %v9191_v55 = vcombine.low %v970_v28, %v974_v39 }
 0x1db   :  { %v9320_v52 = vcombine.high %v1098_v15, %v1102_v40  ;;  %v1090_v21 = vld [vmem:[#allocation7 + $0x548] sm:$0xff] }
 0x1dc   :  { %7378 = vmatpush2.bf16.msra.mxu0 %v9997_v44  ;;  %7419 = vmatpush2.bf16.msra.mxu1 %v10125_v49  ;;  %v10797_v44 = vpack.c.bf16 %v903_v27, %v903_v27  ;;  %v9327_v49 = vcombine.low %v1106_v23, %v1110_v31  ;;  %v946_v27 = vld [vmem:[#allocation7 + $0xc8] sm:$0xff] }
 0x1dd   :  { %7379 = vmatprep.subr.bf16.mxu0 %v9990_v50  ;;  %7420 = vmatprep.subr.bf16.mxu1 %v10118_v51  ;;  %v1954_v50 = vrot.slane %v1945_v38, %v10677_v24  ;;  %v9192_v51 = vcombine.high %v970_v28, %v974_v39  ;;  %v1078_v38 = vld [vmem:[#allocation7 + $0x4e8] sm:$0xff] }
 0x1e0   :  { %7380 = vmatpush2.bf16.msra.mxu0 %v9989_v5  ;;  %7421 = vmatpush2.bf16.msra.mxu1 %v10117_v6  ;;  %v1094_v5 = vld [vmem:[#allocation7 + $0x568] sm:$0xff] }
 0x1e1   :  { %7381 = vmatprep.subr.bf16.mxu0 %v9982_v56  ;;  %7422 = vmatprep.subr.bf16.mxu1 %v10110_v2  ;;  %v9319_v2 = vcombine.low %v1098_v15, %v1102_v40  ;;  %v9312_v10 = vcombine.high %v1090_v21, %v1094_v5 }
 0x1e4   :  { %7382 = vmatpush2.bf16.msra.mxu0 %v9981_v13  ;;  %7423 = vmatpush2.bf16.msra.mxu1 %v10109_v14  ;;  %v958_v13 = vld [vmem:[#allocation7 + $0x128] sm:$0xff] }
 0x1e5   :  { %7383 = vmatprep.subr.bf16.mxu0 %v9974_v17  ;;  %7424 = vmatprep.subr.bf16.mxu1 %v10102_v1  ;;  %v1082_v17 = vld [vmem:[#allocation7 + $0x508] sm:$0xff]  ;;  %v9175_v28 = vcombine.low %v954_v12, %v958_v13 }
 0x1e6   :  { %v1086_v1 = vld [vmem:[#allocation7 + $0x528] sm:$0xff] }
 0x1e7   :  { %v9304_v34 = vcombine.high %v1082_v17, %v1086_v1  ;;  %v9303_v39 = vcombine.low %v1082_v17, %v1086_v1  ;;  %v1042_v17 = vld [vmem:[#allocation7 + $0x3c8] sm:$0xff] }
 0x1e8   :  { %7384 = vmatpush2.bf16.msra.mxu0 %v9973_v32  ;;  %7425 = vmatpush2.bf16.msra.mxu1 %v10101_v33  ;;  %v9311_v32 = vcombine.low %v1090_v21, %v1094_v5  ;;  %v9176_v33 = vcombine.high %v954_v12, %v958_v13  ;;  %v1058_v21 = vld [vmem:[#allocation7 + $0x448] sm:$0xff] }
 0x1e9   :  { %7435 = vmatprep.subr.bf16.mxu0 %v9200_v35  ;;  %7476 = vmatprep.subr.bf16.mxu1 %v9328_v36  ;;  %v950_v35 = vld [vmem:[#allocation7 + $0xe8] sm:$0xff] }
 0x1ea   :  { %v1074_v36 = vld [vmem:[#allocation7 + $0x4c8] sm:$0xff]  ;;  %v9168_v15 = vcombine.high %v946_v27, %v950_v35 }
 0x1eb   :  { %7386 = vmatmul.mubr.bf16.vlgmr.msra.gmra.mxu0 %v10795_v11  ;;  %7427 = vmatmul.mubr.bf16.vlgmr.msra.gmra.mxu1 %v10797_v44  ;;  %v7141_v61 = vpop.f32.mrf.mxu0  ;;  %v7182_v63 = vpop.f32.mrf.mxu1  ;;  %v9296_v40 = vcombine.high %v1074_v36, %v1078_v38  ;;  %v1062_v5 = vld [vmem:[#allocation7 + $0x468] sm:$0xff] }
 0x1ec   :  { %v7142_v6 = vadd.f32 %v7141_v61, %v1950_v43  ;;  %7436 = vmatpush1.bf16.msra.mxu0 %v9199_v41  ;;  %7467 = vmatprep.mubr.bf16.mxu0 %v10692_v46  ;;  %v938_v41 = vld [vmem:[#allocation7 + $0x88] sm:$0xff]  ;;  %v9279_v13 = vcombine.low %v1058_v21, %v1062_v5 }
 0x1ed   :  { %7477 = vmatpush1.bf16.msra.mxu1 %v9327_v49  ;;  %7508 = vmatprep.mubr.bf16.mxu1 %v10694_v47  ;;  %v7143_v24 = vpop.f32.mrf.mxu0  ;;  %v7184_v56 = vpop.f32.mrf.mxu1  ;;  %v942_v43 = vld [vmem:[#allocation7 + $0xa8] sm:$0xff] }
 0x1ee   :  { %v10804_v7 = vadd.f32 %v7182_v63, %v7142_v6  ;;  %v7144_v20 = vadd.f32 %v7143_v24, %v1954_v50  ;;  %7437 = vmatprep.subr.bf16.mxu0 %v9192_v51  ;;  %7478 = vmatprep.subr.bf16.mxu1 %v9320_v52  ;;  %v1066_v49 = vld [vmem:[#allocation7 + $0x488] sm:$0xff]  ;;  %v9167_v51 = vcombine.low %v946_v27, %v950_v35 }
 0x1ef   :  { %v7145_v14 = vpop.f32.mrf.mxu0  ;;  %v7186_v16 = vpop.f32.mrf.mxu1  ;;  %v1070_v50 = vld [vmem:[#allocation7 + $0x4a8] sm:$0xff]  ;;  %v9295_v52 = vcombine.low %v1074_v36, %v1078_v38  ;;  %v9160_v53 = vcombine.high %v938_v41, %v942_v43  ;;  %v9159_v6 = vcombine.low %v938_v41, %v942_v43 }
 0x1f0   :  { %v10806_v18 = vadd.f32 %v7184_v56, %v7144_v20  ;;  %7438 = vmatpush1.bf16.msra.mxu0 %v9191_v55  ;;  %v9288_v60 = vcombine.high %v1066_v49, %v1070_v50  ;;  %v930_v61 = vld [vmem:[#allocation7 + $0x48] sm:$0xff]  ;;  %v9287_v55 = vcombine.low %v1066_v49, %v1070_v50  ;;  %v9280_v56 = vcombine.high %v1058_v21, %v1062_v5 }
 0x1f1   :  { %7479 = vmatpush1.bf16.msra.mxu1 %v9319_v2  ;;  %v7146_v23 = vpop.f32.mrf.mxu0  ;;  %v7187_v31 = vpop.f32.mrf.mxu1  ;;  %7439 = vmatprep.subr.bf16.mxu0 %v9184_v58  ;;  %v934_v63 = vld [vmem:[#allocation7 + $0x68] sm:$0xff] }
 0x1f2   :  { %7480 = vmatprep.subr.bf16.mxu1 %v9312_v10  ;;  %v9152_v24 = vcombine.high %v930_v61, %v934_v63  ;;  %v922_v2 = vld [vmem:[#allocation7 + $0x8] sm:$0xff]  ;;  %v9151_v12 = vcombine.low %v930_v61, %v934_v63 }
 0x1f3   :  { %v926_v58 = vld [vmem:[#allocation7 + $0x28] sm:$0xff] }
 0x1f4   :  { %7440 = vmatpush1.bf16.msra.mxu0 %v9183_v29  ;;  %v1050_v20 = vld [vmem:[#allocation7 + $0x408] sm:$0xff]  ;;  %v9144_v14 = vcombine.high %v922_v2, %v926_v58  ;;  %v9143_v31 = vcombine.low %v922_v2, %v926_v58 }
 0x1f5   :  { %7481 = vmatpush1.bf16.msra.mxu1 %v9311_v32  ;;  %7441 = vmatprep.subr.bf16.mxu0 %v9176_v33  ;;  %v1054_v10 = vld [vmem:[#allocation7 + $0x428] sm:$0xff] }
 0x1f6   :  { %7482 = vmatprep.subr.bf16.mxu1 %v9304_v34  ;;  %v9272_v16 = vcombine.high %v1050_v20, %v1054_v10  ;;  %v1046_v1 = vld [vmem:[#allocation7 + $0x3e8] sm:$0xff]  ;;  %v9271_v32 = vcombine.low %v1050_v20, %v1054_v10 }
 0x1f7   :  { %v1170_v29 = vld [vmem:[#allocation7 + $0x7c8] sm:$0xff]  ;;  %v9264_v33 = vcombine.high %v1042_v17, %v1046_v1 }
 0x1f8   :  { %7442 = vmatpush1.bf16.msra.mxu0 %v9175_v28  ;;  %v1174_v23 = vld [vmem:[#allocation7 + $0x7e8] sm:$0xff]  ;;  %v9263_v28 = vcombine.low %v1042_v17, %v1046_v1 }
 0x1f9   :  { %7483 = vmatpush1.bf16.msra.mxu1 %v9303_v39  ;;  %7443 = vmatprep.subr.bf16.mxu0 %v9168_v15  ;;  %v9392_v34 = vcombine.high %v1170_v29, %v1174_v23  ;;  %v1034_v27 = vld [vmem:[#allocation7 + $0x388] sm:$0xff]  ;;  %v9391_v39 = vcombine.low %v1170_v29, %v1174_v23 }
 0x1fa   :  { %7484 = vmatprep.subr.bf16.mxu1 %v9296_v40  ;;  %v1038_v35 = vld [vmem:[#allocation7 + $0x3a8] sm:$0xff] }
 0x1fb   :  { %v1162_v36 = vld [vmem:[#allocation7 + $0x788] sm:$0xff]  ;;  %v9256_v15 = vcombine.high %v1034_v27, %v1038_v35 }
 0x1fc   :  { %7444 = vmatpush1.bf16.msra.mxu0 %v9167_v51  ;;  %v1166_v38 = vld [vmem:[#allocation7 + $0x7a8] sm:$0xff]  ;;  %v9255_v51 = vcombine.low %v1034_v27, %v1038_v35 }
 0x1fd   :  { %7485 = vmatpush1.bf16.msra.mxu1 %v9295_v52  ;;  %7445 = vmatprep.subr.bf16.mxu0 %v9160_v53  ;;  %v9384_v40 = vcombine.high %v1162_v36, %v1166_v38  ;;  %v1026_v41 = vld [vmem:[#allocation7 + $0x348] sm:$0xff]  ;;  %v9383_v52 = vcombine.low %v1162_v36, %v1166_v38 }
 0x1fe   :  { %7486 = vmatprep.subr.bf16.mxu1 %v9288_v60  ;;  %v1030_v43 = vld [vmem:[#allocation7 + $0x368] sm:$0xff] }
 0x1ff   :  { %v1154_v49 = vld [vmem:[#allocation7 + $0x748] sm:$0xff]  ;;  %v9248_v53 = vcombine.high %v1026_v41, %v1030_v43 }
 0x200   :  { %7446 = vmatpush1.bf16.msra.mxu0 %v9159_v6  ;;  %v1158_v50 = vld [vmem:[#allocation7 + $0x768] sm:$0xff]  ;;  %v9247_v6 = vcombine.low %v1026_v41, %v1030_v43 }
 0x201   :  { %7487 = vmatpush1.bf16.msra.mxu1 %v9287_v55  ;;  %7447 = vmatprep.subr.bf16.mxu0 %v9152_v24  ;;  %v9376_v60 = vcombine.high %v1154_v49, %v1158_v50  ;;  %v1018_v61 = vld [vmem:[#allocation7 + $0x308] sm:$0xff]  ;;  %v9375_v55 = vcombine.low %v1154_v49, %v1158_v50 }
 0x202   :  { %7488 = vmatprep.subr.bf16.mxu1 %v9280_v56  ;;  %v1022_v63 = vld [vmem:[#allocation7 + $0x328] sm:$0xff] }
 0x203   :  { %v1146_v21 = vld [vmem:[#allocation7 + $0x708] sm:$0xff]  ;;  %v9240_v24 = vcombine.high %v1018_v61, %v1022_v63 }
 0x204   :  { %7448 = vmatpush1.bf16.msra.mxu0 %v9151_v12  ;;  %v1150_v5 = vld [vmem:[#allocation7 + $0x728] sm:$0xff]  ;;  %v9239_v12 = vcombine.low %v1018_v61, %v1022_v63 }
 0x205   :  { %7489 = vmatpush1.bf16.msra.mxu1 %v9279_v13  ;;  %7449 = vmatprep.subr.bf16.mxu0 %v9144_v14  ;;  %v9368_v56 = vcombine.high %v1146_v21, %v1150_v5  ;;  %v1010_v2 = vld [vmem:[#allocation7 + $0x2c8] sm:$0xff]  ;;  %v9367_v13 = vcombine.low %v1146_v21, %v1150_v5 }
 0x206   :  { %7490 = vmatprep.subr.bf16.mxu1 %v9272_v16  ;;  %v1014_v58 = vld [vmem:[#allocation7 + $0x2e8] sm:$0xff] }
 0x207   :  { %v1138_v20 = vld [vmem:[#allocation7 + $0x6c8] sm:$0xff]  ;;  %v9232_v14 = vcombine.high %v1010_v2, %v1014_v58 }
 0x208   :  { %7450 = vmatpush1.bf16.msra.mxu0 %v9143_v31  ;;  %v1142_v10 = vld [vmem:[#allocation7 + $0x6e8] sm:$0xff]  ;;  %v9231_v31 = vcombine.low %v1010_v2, %v1014_v58 }
 0x209   :  { %7491 = vmatpush1.bf16.msra.mxu1 %v9271_v32  ;;  %7451 = vmatprep.subr.bf16.mxu0 %v9264_v33  ;;  %v9360_v16 = vcombine.high %v1138_v20, %v1142_v10  ;;  %v1002_v17 = vld [vmem:[#allocation7 + $0x288] sm:$0xff]  ;;  %v9359_v32 = vcombine.low %v1138_v20, %v1142_v10 }
 0x20a   :  { %7492 = vmatprep.subr.bf16.mxu1 %v9392_v34  ;;  %v1006_v1 = vld [vmem:[#allocation7 + $0x2a8] sm:$0xff] }
 0x20b   :  { %v1130_v29 = vld [vmem:[#allocation7 + $0x688] sm:$0xff]  ;;  %v9224_v33 = vcombine.high %v1002_v17, %v1006_v1 }
 0x20c   :  { %7452 = vmatpush2.bf16.msra.mxu0 %v9263_v28  ;;  %v1134_v23 = vld [vmem:[#allocation7 + $0x6a8] sm:$0xff]  ;;  %v9223_v28 = vcombine.low %v1002_v17, %v1006_v1 }
 0x20d   :  { %7493 = vmatpush2.bf16.msra.mxu1 %v9391_v39  ;;  %7453 = vmatprep.subr.bf16.mxu0 %v9256_v15  ;;  %v9352_v34 = vcombine.high %v1130_v29, %v1134_v23  ;;  %v994_v27 = vld [vmem:[#allocation7 + $0x248] sm:$0xff]  ;;  %v9351_v39 = vcombine.low %v1130_v29, %v1134_v23 }
 0x20e   :  { %7494 = vmatprep.subr.bf16.mxu1 %v9384_v40  ;;  %v998_v35 = vld [vmem:[#allocation7 + $0x268] sm:$0xff] }
 0x20f   :  { %v1122_v36 = vld [vmem:[#allocation7 + $0x648] sm:$0xff]  ;;  %v9216_v15 = vcombine.high %v994_v27, %v998_v35 }
 0x210   :  { %7454 = vmatpush2.bf16.msra.mxu0 %v9255_v51  ;;  %v1126_v38 = vld [vmem:[#allocation7 + $0x668] sm:$0xff]  ;;  %v9215_v51 = vcombine.low %v994_v27, %v998_v35 }
 0x211   :  { %7495 = vmatpush2.bf16.msra.mxu1 %v9383_v52  ;;  %7455 = vmatprep.subr.bf16.mxu0 %v9248_v53  ;;  %v9344_v40 = vcombine.high %v1122_v36, %v1126_v38  ;;  %v986_v41 = vld [vmem:[#allocation7 + $0x208] sm:$0xff]  ;;  %v9343_v52 = vcombine.low %v1122_v36, %v1126_v38 }
 0x212   :  { %7496 = vmatprep.subr.bf16.mxu1 %v9376_v60  ;;  %v990_v43 = vld [vmem:[#allocation7 + $0x228] sm:$0xff] }
 0x213   :  { %v1114_v49 = vld [vmem:[#allocation7 + $0x608] sm:$0xff]  ;;  %v9208_v53 = vcombine.high %v986_v41, %v990_v43 }
 0x214   :  { %7456 = vmatpush2.bf16.msra.mxu0 %v9247_v6  ;;  %v1118_v50 = vld [vmem:[#allocation7 + $0x628] sm:$0xff]  ;;  %v9207_v6 = vcombine.low %v986_v41, %v990_v43 }
 0x215   :  { %7497 = vmatpush2.bf16.msra.mxu1 %v9375_v55  ;;  %7457 = vmatprep.subr.bf16.mxu0 %v9240_v24  ;;  %v9336_v60 = vcombine.high %v1114_v49, %v1118_v50  ;;  %v1234_v61 = vld [vmem:[#allocation7 + $0x9c8] sm:$0xff]  ;;  %v9335_v55 = vcombine.low %v1114_v49, %v1118_v50 }
 0x216   :  { %7498 = vmatprep.subr.bf16.mxu1 %v9368_v56  ;;  %v1238_v63 = vld [vmem:[#allocation7 + $0x9e8] sm:$0xff] }
 0x217   :  { %v1362_v21 = vld [vmem:[#allocation7 + $0xdc8] sm:$0xff]  ;;  %v9456_v24 = vcombine.high %v1234_v61, %v1238_v63  ;;  %v9455_v20 = vcombine.low %v1234_v61, %v1238_v63 }
 0x218   :  { %7458 = vmatpush2.bf16.msra.mxu0 %v9239_v12  ;;  %v1366_v5 = vld [vmem:[#allocation7 + $0xde8] sm:$0xff] }
 0x219   :  { %7499 = vmatpush2.bf16.msra.mxu1 %v9367_v13  ;;  %7459 = vmatprep.subr.bf16.mxu0 %v9232_v14  ;;  %v9584_v56 = vcombine.high %v1362_v21, %v1366_v5  ;;  %v1226_v2 = vld [vmem:[#allocation7 + $0x988] sm:$0xff]  ;;  %v9583_v13 = vcombine.low %v1362_v21, %v1366_v5 }
 0x21a   :  { %7500 = vmatprep.subr.bf16.mxu1 %v9360_v16  ;;  %v1230_v58 = vld [vmem:[#allocation7 + $0x9a8] sm:$0xff] }
 0x21b   :  { %v1354_v10 = vld [vmem:[#allocation7 + $0xd88] sm:$0xff]  ;;  %v9448_v14 = vcombine.high %v1226_v2, %v1230_v58 }
 0x21c   :  { %7460 = vmatpush2.bf16.msra.mxu0 %v9231_v31  ;;  %v1358_v12 = vld [vmem:[#allocation7 + $0xda8] sm:$0xff] }
 0x21d   :  { %7501 = vmatpush2.bf16.msra.mxu1 %v9359_v32  ;;  %7461 = vmatprep.subr.bf16.mxu0 %v9224_v33  ;;  %v1218_v16 = vld [vmem:[#allocation7 + $0x948] sm:$0xff]  ;;  %v9576_v23 = vcombine.high %v1354_v10, %v1358_v12  ;;  %v9575_v36 = vcombine.low %v1354_v10, %v1358_v12 }
 0x21e   :  { %7502 = vmatprep.subr.bf16.mxu1 %v9352_v34  ;;  %v1222_v17 = vld [vmem:[#allocation7 + $0x968] sm:$0xff]  ;;  %v9447_v34 = vcombine.low %v1226_v2, %v1230_v58 }
 0x21f   :  { %v1346_v31 = vld [vmem:[#allocation7 + $0xd48] sm:$0xff]  ;;  %v9440_v38 = vcombine.high %v1218_v16, %v1222_v17 }
 0x220   :  { %7462 = vmatpush2.bf16.msra.mxu0 %v9223_v28  ;;  %v1350_v32 = vld [vmem:[#allocation7 + $0xd68] sm:$0xff] }
 0x221   :  { %7503 = vmatpush2.bf16.msra.mxu1 %v9351_v39  ;;  %7463 = vmatprep.subr.bf16.mxu0 %v9216_v15  ;;  %v9568_v15 = vcombine.high %v1346_v31, %v1350_v32  ;;  %v1338_v49 = vld [vmem:[#allocation7 + $0xd08] sm:$0xff]  ;;  %v9567_v61 = vcombine.low %v1346_v31, %v1350_v32 }
 0x222   :  { %7504 = vmatprep.subr.bf16.mxu1 %v9344_v40  ;;  %v1214_v40 = vld [vmem:[#allocation7 + $0x928] sm:$0xff] }
 0x223   :  { %v1342_v50 = vld [vmem:[#allocation7 + $0xd28] sm:$0xff] }
 0x224   :  { %7464 = vmatpush2.bf16.msra.mxu0 %v9215_v51  ;;  %v1202_v21 = vld [vmem:[#allocation7 + $0x8c8] sm:$0xff] }
 0x225   :  { %7505 = vmatpush2.bf16.msra.mxu1 %v9343_v52  ;;  %7465 = vmatprep.subr.bf16.mxu0 %v9208_v53  ;;  %v9439_v52 = vcombine.low %v1218_v16, %v1222_v17  ;;  %v1206_v5 = vld [vmem:[#allocation7 + $0x8e8] sm:$0xff] }
 0x226   :  { %7506 = vmatprep.subr.bf16.mxu1 %v9336_v60  ;;  %v9424_v2 = vcombine.high %v1202_v21, %v1206_v5  ;;  %v1198_v10 = vld [vmem:[#allocation7 + $0x8a8] sm:$0xff] }
 0x227   :  { %v1322_v12 = vld [vmem:[#allocation7 + $0xc88] sm:$0xff] }
 0x228   :  { %7466 = vmatpush2.bf16.msra.mxu0 %v9207_v6  ;;  %v1330_v6 = vld [vmem:[#allocation7 + $0xcc8] sm:$0xff] }
 0x229   :  { %7507 = vmatpush2.bf16.msra.mxu1 %v9335_v55  ;;  %7517 = vmatprep.subr.bf16.mxu0 %v9456_v24  ;;  %v1334_v55 = vld [vmem:[#allocation7 + $0xce8] sm:$0xff] }
 0x22a   :  { %7558 = vmatprep.subr.bf16.mxu1 %v9584_v56  ;;  %v9559_v56 = vcombine.low %v1338_v49, %v1342_v50  ;;  %v9552_v58 = vcombine.high %v1330_v6, %v1334_v55  ;;  %v9551_v16 = vcombine.low %v1330_v6, %v1334_v55  ;;  %v1314_v31 = vld [vmem:[#allocation7 + $0xc48] sm:$0xff] }
 0x22b   :  { %v7223_v1 = vpop.f32.mrf.mxu0  ;;  %v7264_v29 = vpop.f32.mrf.mxu1  ;;  %7468 = vmatmul.mubr.bf16.vlgmr.msra.gmra.mxu0 %v10696_v48  ;;  %v1318_v32 = vld [vmem:[#allocation7 + $0xc68] sm:$0xff] }
 0x22c   :  { %v7224_v33 = vadd.f32 %v7223_v1, %v10804_v7  ;;  %7509 = vmatmul.mubr.bf16.vlgmr.msra.gmra.mxu1 %v10690_v45  ;;  %7518 = vmatpush1.bf16.msra.mxu0 %v9455_v20  ;;  %v1210_v7 = vld [vmem:[#allocation7 + $0x908] sm:$0xff] }
 0x22d   :  { %7549 = vmatprep.mubr.bf16.mxu0 %v10722_v37  ;;  %7559 = vmatpush1.bf16.msra.mxu1 %v9583_v13  ;;  %v7225_v27 = vpop.f32.mrf.mxu0  ;;  %v7266_v35 = vpop.f32.mrf.mxu1  ;;  %v9432_v63 = vcombine.high %v1210_v7, %v1214_v40  ;;  %v9431_v24 = vcombine.low %v1210_v7, %v1214_v40  ;;  %v1194_v20 = vld [vmem:[#allocation7 + $0x888] sm:$0xff]  ;;  %v9535_v40 = vcombine.low %v1314_v31, %v1318_v32 }
 0x22e   :  { %v10812_v28 = vadd.f32 %v7264_v29, %v7224_v33  ;;  %7590 = vmatprep.mubr.bf16.mxu1 %v10724_v42  ;;  %v7226_v39 = vadd.f32 %v7225_v27, %v10806_v18  ;;  %7519 = vmatprep.subr.bf16.mxu0 %v9448_v14  ;;  %v9560_v18 = vcombine.high %v1338_v49, %v1342_v50  ;;  %v1326_v13 = vld [vmem:[#allocation7 + $0xca8] sm:$0xff] }
 0x22f   :  { %v7227_v41 = vpop.f32.mrf.mxu0  ;;  %v7268_v43 = vpop.f32.mrf.mxu1  ;;  %7560 = vmatprep.subr.bf16.mxu1 %v9576_v23  ;;  %v9423_v14 = vcombine.low %v1202_v21, %v1206_v5  ;;  %v9416_v17 = vcombine.high %v1194_v20, %v1198_v10  ;;  %v9544_v1 = vcombine.high %v1322_v12, %v1326_v13  ;;  %v1186_v29 = vld [vmem:[#allocation7 + $0x848] sm:$0xff]  ;;  %v9415_v33 = vcombine.low %v1194_v20, %v1198_v10 }
 0x230   :  { %v10816_v51 = vadd.f32 %v7266_v35, %v7226_v39  ;;  %7520 = vmatpush1.bf16.msra.mxu0 %v9447_v34  ;;  %v1190_v23 = vld [vmem:[#allocation7 + $0x868] sm:$0xff]  ;;  %v9543_v34 = vcombine.low %v1322_v12, %v1326_v13  ;;  %v9536_v35 = vcombine.high %v1314_v31, %v1318_v32 }
 0x231   :  { %7561 = vmatpush1.bf16.msra.mxu1 %v9575_v36  ;;  %v7228_v53 = vpop.f32.mrf.mxu0  ;;  %v7269_v60 = vpop.f32.mrf.mxu1  ;;  %7521 = vmatprep.subr.bf16.mxu0 %v9440_v38  ;;  %v9408_v27 = vcombine.high %v1186_v29, %v1190_v23  ;;  %v1178_v36 = vld [vmem:[#allocation7 + $0x808] sm:$0xff]  ;;  %v9407_v7 = vcombine.low %v1186_v29, %v1190_v23 }
 0x232   :  { %7562 = vmatprep.subr.bf16.mxu1 %v9568_v15  ;;  %v1182_v38 = vld [vmem:[#allocation7 + $0x828] sm:$0xff] }
 0x233   :  { %v1306_v39 = vld [vmem:[#allocation7 + $0xc08] sm:$0xff]  ;;  %v9400_v41 = vcombine.high %v1178_v36, %v1182_v38  ;;  %v9399_v60 = vcombine.low %v1178_v36, %v1182_v38 }
 0x234   :  { %7522 = vmatpush1.bf16.msra.mxu0 %v9439_v52  ;;  %v1310_v15 = vld [vmem:[#allocation7 + $0xc28] sm:$0xff] }
 0x235   :  { %7563 = vmatpush1.bf16.msra.mxu1 %v9567_v61  ;;  %7523 = vmatprep.subr.bf16.mxu0 %v9432_v63  ;;  %v9528_v43 = vcombine.high %v1306_v39, %v1310_v15  ;;  %v1298_v49 = vld [vmem:[#allocation7 + $0xbc8] sm:$0xff]  ;;  %v9527_v61 = vcombine.low %v1306_v39, %v1310_v15 }
 0x236   :  { %7564 = vmatprep.subr.bf16.mxu1 %v9560_v18  ;;  %v1302_v50 = vld [vmem:[#allocation7 + $0xbe8] sm:$0xff] }
 0x237   :  { %v1426_v52 = vld [vmem:[#allocation7 + $0xfc8] sm:$0xff]  ;;  %v9520_v63 = vcombine.high %v1298_v49, %v1302_v50 }
 0x238   :  { %7524 = vmatpush1.bf16.msra.mxu0 %v9431_v24  ;;  %v1430_v53 = vld [vmem:[#allocation7 + $0xfe8] sm:$0xff]  ;;  %v9519_v24 = vcombine.low %v1298_v49, %v1302_v50 }
 0x239   :  { %7565 = vmatpush1.bf16.msra.mxu1 %v9559_v56  ;;  %7525 = vmatprep.subr.bf16.mxu0 %v9424_v2  ;;  %v9648_v18 = vcombine.high %v1426_v52, %v1430_v53  ;;  %v1290_v21 = vld [vmem:[#allocation7 + $0xb88] sm:$0xff]  ;;  %v9647_v56 = vcombine.low %v1426_v52, %v1430_v53 }
 0x23a   :  { %7566 = vmatprep.subr.bf16.mxu1 %v9552_v58  ;;  %v1294_v5 = vld [vmem:[#allocation7 + $0xba8] sm:$0xff] }
 0x23b   :  { %v1418_v6 = vld [vmem:[#allocation7 + $0xf88] sm:$0xff]  ;;  %v9512_v2 = vcombine.high %v1290_v21, %v1294_v5 }
 0x23c   :  { %7526 = vmatpush1.bf16.msra.mxu0 %v9423_v14  ;;  %v1422_v55 = vld [vmem:[#allocation7 + $0xfa8] sm:$0xff]  ;;  %v9511_v14 = vcombine.low %v1290_v21, %v1294_v5 }
 0x23d   :  { %7567 = vmatpush1.bf16.msra.mxu1 %v9551_v16  ;;  %7527 = vmatprep.subr.bf16.mxu0 %v9416_v17  ;;  %v9640_v58 = vcombine.high %v1418_v6, %v1422_v55  ;;  %v1282_v20 = vld [vmem:[#allocation7 + $0xb48] sm:$0xff]  ;;  %v9639_v16 = vcombine.low %v1418_v6, %v1422_v55 }
 0x23e   :  { %7568 = vmatprep.subr.bf16.mxu1 %v9544_v1  ;;  %v1286_v10 = vld [vmem:[#allocation7 + $0xb68] sm:$0xff] }
 0x23f   :  { %v1410_v12 = vld [vmem:[#allocation7 + $0xf48] sm:$0xff]  ;;  %v9504_v17 = vcombine.high %v1282_v20, %v1286_v10 }
 0x240   :  { %7528 = vmatpush1.bf16.msra.mxu0 %v9415_v33  ;;  %v1414_v13 = vld [vmem:[#allocation7 + $0xf68] sm:$0xff]  ;;  %v9503_v33 = vcombine.low %v1282_v20, %v1286_v10 }
 0x241   :  { %7569 = vmatpush1.bf16.msra.mxu1 %v9543_v34  ;;  %7529 = vmatprep.subr.bf16.mxu0 %v9408_v27  ;;  %v9632_v1 = vcombine.high %v1410_v12, %v1414_v13  ;;  %v1274_v29 = vld [vmem:[#allocation7 + $0xb08] sm:$0xff]  ;;  %v9631_v34 = vcombine.low %v1410_v12, %v1414_v13 }
 0x242   :  { %7570 = vmatprep.subr.bf16.mxu1 %v9536_v35  ;;  %v1278_v23 = vld [vmem:[#allocation7 + $0xb28] sm:$0xff] }
 0x243   :  { %v1402_v31 = vld [vmem:[#allocation7 + $0xf08] sm:$0xff]  ;;  %v9496_v27 = vcombine.high %v1274_v29, %v1278_v23 }
 0x244   :  { %7530 = vmatpush1.bf16.msra.mxu0 %v9407_v7  ;;  %v1406_v32 = vld [vmem:[#allocation7 + $0xf28] sm:$0xff]  ;;  %v9495_v7 = vcombine.low %v1274_v29, %v1278_v23 }
 0x245   :  { %7571 = vmatpush1.bf16.msra.mxu1 %v9535_v40  ;;  %7531 = vmatprep.subr.bf16.mxu0 %v9400_v41  ;;  %v9624_v35 = vcombine.high %v1402_v31, %v1406_v32  ;;  %v1266_v36 = vld [vmem:[#allocation7 + $0xac8] sm:$0xff]  ;;  %v9623_v40 = vcombine.low %v1402_v31, %v1406_v32 }
 0x246   :  { %7572 = vmatprep.subr.bf16.mxu1 %v9528_v43  ;;  %v1270_v38 = vld [vmem:[#allocation7 + $0xae8] sm:$0xff] }
 0x247   :  { %v1394_v39 = vld [vmem:[#allocation7 + $0xec8] sm:$0xff]  ;;  %v9488_v41 = vcombine.high %v1266_v36, %v1270_v38 }
 0x248   :  { %7532 = vmatpush1.bf16.msra.mxu0 %v9399_v60  ;;  %v1398_v15 = vld [vmem:[#allocation7 + $0xee8] sm:$0xff]  ;;  %v9487_v60 = vcombine.low %v1266_v36, %v1270_v38 }
 0x249   :  { %7573 = vmatpush1.bf16.msra.mxu1 %v9527_v61  ;;  %7533 = vmatprep.subr.bf16.mxu0 %v9520_v63  ;;  %v9616_v43 = vcombine.high %v1394_v39, %v1398_v15  ;;  %v1258_v49 = vld [vmem:[#allocation7 + $0xa88] sm:$0xff]  ;;  %v9615_v61 = vcombine.low %v1394_v39, %v1398_v15 }
 0x24a   :  { %7574 = vmatprep.subr.bf16.mxu1 %v9648_v18  ;;  %v1262_v50 = vld [vmem:[#allocation7 + $0xaa8] sm:$0xff] }
 0x24b   :  { %v1386_v52 = vld [vmem:[#allocation7 + $0xe88] sm:$0xff]  ;;  %v9480_v63 = vcombine.high %v1258_v49, %v1262_v50 }
 0x24c   :  { %7534 = vmatpush2.bf16.msra.mxu0 %v9519_v24  ;;  %v1390_v53 = vld [vmem:[#allocation7 + $0xea8] sm:$0xff]  ;;  %v9479_v24 = vcombine.low %v1258_v49, %v1262_v50 }
 0x24d   :  { %7575 = vmatpush2.bf16.msra.mxu1 %v9647_v56  ;;  %7535 = vmatprep.subr.bf16.mxu0 %v9512_v2  ;;  %v9608_v18 = vcombine.high %v1386_v52, %v1390_v53  ;;  %v1250_v21 = vld [vmem:[#allocation7 + $0xa48] sm:$0xff]  ;;  %v9607_v56 = vcombine.low %v1386_v52, %v1390_v53 }
 0x24e   :  { %7576 = vmatprep.subr.bf16.mxu1 %v9640_v58  ;;  %v1254_v5 = vld [vmem:[#allocation7 + $0xa68] sm:$0xff] }
 0x24f   :  { %v1378_v6 = vld [vmem:[#allocation7 + $0xe48] sm:$0xff]  ;;  %v9472_v2 = vcombine.high %v1250_v21, %v1254_v5 }
 0x250   :  { %7536 = vmatpush2.bf16.msra.mxu0 %v9511_v14  ;;  %v1382_v55 = vld [vmem:[#allocation7 + $0xe68] sm:$0xff]  ;;  %v9471_v14 = vcombine.low %v1250_v21, %v1254_v5 }
 0x251   :  { %7577 = vmatpush2.bf16.msra.mxu1 %v9639_v16  ;;  %7537 = vmatprep.subr.bf16.mxu0 %v9504_v17  ;;  %v9600_v58 = vcombine.high %v1378_v6, %v1382_v55  ;;  %v1242_v20 = vld [vmem:[#allocation7 + $0xa08] sm:$0xff]  ;;  %v9599_v16 = vcombine.low %v1378_v6, %v1382_v55 }
 0x252   :  { %7578 = vmatprep.subr.bf16.mxu1 %v9632_v1  ;;  %v1246_v10 = vld [vmem:[#allocation7 + $0xa28] sm:$0xff] }
 0x253   :  { %v1370_v12 = vld [vmem:[#allocation7 + $0xe08] sm:$0xff]  ;;  %v9464_v17 = vcombine.high %v1242_v20, %v1246_v10 }
 0x254   :  { %7538 = vmatpush2.bf16.msra.mxu0 %v9503_v33  ;;  %v1374_v13 = vld [vmem:[#allocation7 + $0xe28] sm:$0xff]  ;;  %v9463_v33 = vcombine.low %v1242_v20, %v1246_v10 }
 0x255   :  { %7579 = vmatpush2.bf16.msra.mxu1 %v9631_v34  ;;  %7539 = vmatprep.subr.bf16.mxu0 %v9496_v27  ;;  %v9592_v1 = vcombine.high %v1370_v12, %v1374_v13  ;;  %v1490_v29 = vld [vmem:[#allocation7 + $0x11c8] sm:$0xff]  ;;  %v9591_v34 = vcombine.low %v1370_v12, %v1374_v13 }
 0x256   :  { %7580 = vmatprep.subr.bf16.mxu1 %v9624_v35  ;;  %v1494_v23 = vld [vmem:[#allocation7 + $0x11e8] sm:$0xff] }
 0x257   :  { %v1618_v31 = vld [vmem:[#allocation7 + $0x15c8] sm:$0xff]  ;;  %v9712_v27 = vcombine.high %v1490_v29, %v1494_v23  ;;  %v9711_v39 = vcombine.low %v1490_v29, %v1494_v23 }
 0x258   :  { %7540 = vmatpush2.bf16.msra.mxu0 %v9495_v7  ;;  %v1622_v32 = vld [vmem:[#allocation7 + $0x15e8] sm:$0xff] }
 0x259   :  { %7581 = vmatpush2.bf16.msra.mxu1 %v9623_v40  ;;  %7541 = vmatprep.subr.bf16.mxu0 %v9488_v41  ;;  %v9840_v35 = vcombine.high %v1618_v31, %v1622_v32  ;;  %v1482_v36 = vld [vmem:[#allocation7 + $0x1188] sm:$0xff]  ;;  %v9839_v40 = vcombine.low %v1618_v31, %v1622_v32 }
 0x25a   :  { %7582 = vmatprep.subr.bf16.mxu1 %v9616_v43  ;;  %v1486_v38 = vld [vmem:[#allocation7 + $0x11a8] sm:$0xff] }
 0x25b   :  { %v1610_v15 = vld [vmem:[#allocation7 + $0x1588] sm:$0xff]  ;;  %v9704_v41 = vcombine.high %v1482_v36, %v1486_v38 }
 0x25c   :  { %7542 = vmatpush2.bf16.msra.mxu0 %v9487_v60  ;;  %v1614_v7 = vld [vmem:[#allocation7 + $0x15a8] sm:$0xff] }
 0x25d   :  { %7583 = vmatpush2.bf16.msra.mxu1 %v9615_v61  ;;  %7543 = vmatprep.subr.bf16.mxu0 %v9480_v63  ;;  %v1474_v43 = vld [vmem:[#allocation7 + $0x1148] sm:$0xff]  ;;  %v9832_v53 = vcombine.high %v1610_v15, %v1614_v7  ;;  %v9831_v6 = vcombine.low %v1610_v15, %v1614_v7 }
 0x25e   :  { %7584 = vmatprep.subr.bf16.mxu1 %v9608_v18  ;;  %v1478_v49 = vld [vmem:[#allocation7 + $0x1168] sm:$0xff]  ;;  %v9703_v18 = vcombine.low %v1482_v36, %v1486_v38 }
 0x25f   :  { %v1602_v60 = vld [vmem:[#allocation7 + $0x1548] sm:$0xff]  ;;  %v9696_v55 = vcombine.high %v1474_v43, %v1478_v49 }
 0x260   :  { %7544 = vmatpush2.bf16.msra.mxu0 %v9479_v24  ;;  %v1606_v61 = vld [vmem:[#allocation7 + $0x1568] sm:$0xff] }
 0x261   :  { %7585 = vmatpush2.bf16.msra.mxu1 %v9607_v56  ;;  %7545 = vmatprep.subr.bf16.mxu0 %v9472_v2  ;;  %v9824_v2 = vcombine.high %v1602_v60, %v1606_v61  ;;  %v1594_v12 = vld [vmem:[#allocation7 + $0x1508] sm:$0xff]  ;;  %v9823_v29 = vcombine.low %v1602_v60, %v1606_v61 }
 0x262   :  { %7586 = vmatprep.subr.bf16.mxu1 %v9600_v58  ;;  %v1470_v58 = vld [vmem:[#allocation7 + $0x1128] sm:$0xff] }
 0x263   :  { %v1598_v13 = vld [vmem:[#allocation7 + $0x1528] sm:$0xff] }
 0x264   :  { %7546 = vmatpush2.bf16.msra.mxu0 %v9471_v14  ;;  %v1458_v31 = vld [vmem:[#allocation7 + $0x10c8] sm:$0xff] }
 0x265   :  { %7587 = vmatpush2.bf16.msra.mxu1 %v9599_v16  ;;  %7547 = vmatprep.subr.bf16.mxu0 %v9464_v17  ;;  %v9695_v16 = vcombine.low %v1474_v43, %v1478_v49  ;;  %v1462_v32 = vld [vmem:[#allocation7 + $0x10e8] sm:$0xff] }
 0x266   :  { %7588 = vmatprep.subr.bf16.mxu1 %v9592_v1  ;;  %v9680_v36 = vcombine.high %v1458_v31, %v1462_v32  ;;  %v1454_v15 = vld [vmem:[#allocation7 + $0x10a8] sm:$0xff] }
 0x267   :  { %v1578_v7 = vld [vmem:[#allocation7 + $0x1488] sm:$0xff] }
 0x268   :  { %7548 = vmatpush2.bf16.msra.mxu0 %v9463_v33  ;;  %v1586_v33 = vld [vmem:[#allocation7 + $0x14c8] sm:$0xff] }
 0x269   :  { %7589 = vmatpush2.bf16.msra.mxu1 %v9591_v34  ;;  %7599 = vmatprep.subr.bf16.mxu0 %v9712_v27  ;;  %v1590_v34 = vld [vmem:[#allocation7 + $0x14e8] sm:$0xff] }
 0x26a   :  { %7640 = vmatprep.subr.bf16.mxu1 %v9840_v35  ;;  %v9815_v35 = vcombine.low %v1594_v12, %v1598_v13  ;;  %v9808_v38 = vcombine.high %v1586_v33, %v1590_v34  ;;  %v9807_v43 = vcombine.low %v1586_v33, %v1590_v34  ;;  %v1570_v60 = vld [vmem:[#allocation7 + $0x1448] sm:$0xff] }
 0x26b   :  { %v7305_v50 = vpop.f32.mrf.mxu0  ;;  %v7346_v52 = vpop.f32.mrf.mxu1  ;;  %7550 = vmatmul.mubr.bf16.vlgmr.msra.gmra.mxu0 %v10752_v62  ;;  %v1574_v61 = vld [vmem:[#allocation7 + $0x1468] sm:$0xff] }
 0x26c   :  { %v7306_v63 = vadd.f32 %v7305_v50, %v10812_v28  ;;  %7591 = vmatmul.mubr.bf16.vlgmr.msra.gmra.mxu1 %v10750_v57  ;;  %7600 = vmatpush1.bf16.msra.mxu0 %v9711_v39  ;;  %v1466_v28 = vld [vmem:[#allocation7 + $0x1108] sm:$0xff] }
 0x26d   :  { %7631 = vmatprep.mubr.bf16.mxu0 %v10754_v8  ;;  %7641 = vmatpush1.bf16.msra.mxu1 %v9839_v40  ;;  %v7307_v21 = vpop.f32.mrf.mxu0  ;;  %v7348_v5 = vpop.f32.mrf.mxu1  ;;  %v9688_v23 = vcombine.high %v1466_v28, %v1470_v58  ;;  %v9687_v27 = vcombine.low %v1466_v28, %v1470_v58  ;;  %v1450_v39 = vld [vmem:[#allocation7 + $0x1088] sm:$0xff]  ;;  %v9791_v58 = vcombine.low %v1570_v60, %v1574_v61 }
 0x26e   :  { %v10822_v24 = vadd.f32 %v7346_v52, %v7306_v63  ;;  %7672 = vmatprep.mubr.bf16.mxu1 %v10756_v9  ;;  %v7308_v56 = vadd.f32 %v7307_v21, %v10816_v51  ;;  %7601 = vmatprep.subr.bf16.mxu0 %v9704_v41  ;;  %v9816_v51 = vcombine.high %v1594_v12, %v1598_v13  ;;  %v1582_v40 = vld [vmem:[#allocation7 + $0x14a8] sm:$0xff] }
 0x26f   :  { %v7309_v20 = vpop.f32.mrf.mxu0  ;;  %v7350_v10 = vpop.f32.mrf.mxu1  ;;  %7642 = vmatprep.subr.bf16.mxu1 %v9832_v53  ;;  %v9679_v41 = vcombine.low %v1458_v31, %v1462_v32  ;;  %v9672_v49 = vcombine.high %v1450_v39, %v1454_v15  ;;  %v9800_v50 = vcombine.high %v1578_v7, %v1582_v40  ;;  %v1442_v52 = vld [vmem:[#allocation7 + $0x1048] sm:$0xff]  ;;  %v9671_v63 = vcombine.low %v1450_v39, %v1454_v15 }
 0x270   :  { %v10826_v14 = vadd.f32 %v7348_v5, %v7308_v56  ;;  %7602 = vmatpush1.bf16.msra.mxu0 %v9703_v18  ;;  %v1446_v53 = vld [vmem:[#allocation7 + $0x1068] sm:$0xff]  ;;  %v9799_v18 = vcombine.low %v1578_v7, %v1582_v40  ;;  %v9792_v5 = vcombine.high %v1570_v60, %v1574_v61 }
 0x271   :  { %7643 = vmatpush1.bf16.msra.mxu1 %v9831_v6  ;;  %v7310_v17 = vpop.f32.mrf.mxu0  ;;  %v7351_v1 = vpop.f32.mrf.mxu1  ;;  %7603 = vmatprep.subr.bf16.mxu0 %v9696_v55  ;;  %v9664_v21 = vcombine.high %v1442_v52, %v1446_v53  ;;  %v1434_v6 = vld [vmem:[#allocation7 + $0x1008] sm:$0xff]  ;;  %v9663_v28 = vcombine.low %v1442_v52, %v1446_v53 }
 0x272   :  { %7644 = vmatprep.subr.bf16.mxu1 %v9824_v2  ;;  %v1438_v55 = vld [vmem:[#allocation7 + $0x1028] sm:$0xff] }
 0x273   :  { %v1562_v56 = vld [vmem:[#allocation7 + $0x1408] sm:$0xff]  ;;  %v9656_v20 = vcombine.high %v1434_v6, %v1438_v55  ;;  %v9655_v1 = vcombine.low %v1434_v6, %v1438_v55 }
 0x274   :  { %7604 = vmatpush1.bf16.msra.mxu0 %v9695_v16  ;;  %v1566_v2 = vld [vmem:[#allocation7 + $0x1428] sm:$0xff] }
 0x275   :  { %7645 = vmatpush1.bf16.msra.mxu1 %v9823_v29  ;;  %7605 = vmatprep.subr.bf16.mxu0 %v9688_v23  ;;  %v9784_v10 = vcombine.high %v1562_v56, %v1566_v2  ;;  %v1554_v12 = vld [vmem:[#allocation7 + $0x13c8] sm:$0xff]  ;;  %v9783_v29 = vcombine.low %v1562_v56, %v1566_v2 }
 0x276   :  { %7646 = vmatprep.subr.bf16.mxu1 %v9816_v51  ;;  %v1558_v13 = vld [vmem:[#allocation7 + $0x13e8] sm:$0xff] }
 0x277   :  { %v1682_v16 = vld [vmem:[#allocation7 + $0x17c8] sm:$0xff]  ;;  %v9776_v23 = vcombine.high %v1554_v12, %v1558_v13 }
 0x278   :  { %7606 = vmatpush1.bf16.msra.mxu0 %v9687_v27  ;;  %v1686_v17 = vld [vmem:[#allocation7 + $0x17e8] sm:$0xff]  ;;  %v9775_v27 = vcombine.low %v1554_v12, %v1558_v13 }
 0x279   :  { %7647 = vmatpush1.bf16.msra.mxu1 %v9815_v35  ;;  %7607 = vmatprep.subr.bf16.mxu0 %v9680_v36  ;;  %v9904_v51 = vcombine.high %v1682_v16, %v1686_v17  ;;  %v1546_v31 = vld [vmem:[#allocation7 + $0x1388] sm:$0xff]  ;;  %v9903_v35 = vcombine.low %v1682_v16, %v1686_v17 }
 0x27a   :  { %7648 = vmatprep.subr.bf16.mxu1 %v9808_v38  ;;  %v1550_v32 = vld [vmem:[#allocation7 + $0x13a8] sm:$0xff] }
 0x27b   :  { %v1674_v33 = vld [vmem:[#allocation7 + $0x1788] sm:$0xff]  ;;  %v9768_v36 = vcombine.high %v1546_v31, %v1550_v32 }
 0x27c   :  { %7608 = vmatpush1.bf16.msra.mxu0 %v9679_v41  ;;  %v1678_v34 = vld [vmem:[#allocation7 + $0x17a8] sm:$0xff]  ;;  %v9767_v41 = vcombine.low %v1546_v31, %v1550_v32 }
 0x27d   :  { %7649 = vmatpush1.bf16.msra.mxu1 %v9807_v43  ;;  %7609 = vmatprep.subr.bf16.mxu0 %v9672_v49  ;;  %v9896_v38 = vcombine.high %v1674_v33, %v1678_v34  ;;  %v1538_v39 = vld [vmem:[#allocation7 + $0x1348] sm:$0xff]  ;;  %v9895_v43 = vcombine.low %v1674_v33, %v1678_v34 }
 0x27e   :  { %7650 = vmatprep.subr.bf16.mxu1 %v9800_v50  ;;  %v1542_v15 = vld [vmem:[#allocation7 + $0x1368] sm:$0xff] }
 0x27f   :  { %v1666_v7 = vld [vmem:[#allocation7 + $0x1748] sm:$0xff]  ;;  %v9760_v49 = vcombine.high %v1538_v39, %v1542_v15 }
 0x280   :  { %7610 = vmatpush1.bf16.msra.mxu0 %v9671_v63  ;;  %v1670_v40 = vld [vmem:[#allocation7 + $0x1768] sm:$0xff]  ;;  %v9759_v63 = vcombine.low %v1538_v39, %v1542_v15 }
 0x281   :  { %7651 = vmatpush1.bf16.msra.mxu1 %v9799_v18  ;;  %7611 = vmatprep.subr.bf16.mxu0 %v9664_v21  ;;  %v9888_v50 = vcombine.high %v1666_v7, %v1670_v40  ;;  %v1530_v52 = vld [vmem:[#allocation7 + $0x1308] sm:$0xff]  ;;  %v9887_v18 = vcombine.low %v1666_v7, %v1670_v40 }
 0x282   :  { %7652 = vmatprep.subr.bf16.mxu1 %v9792_v5  ;;  %v1534_v53 = vld [vmem:[#allocation7 + $0x1328] sm:$0xff] }
 0x283   :  { %v1658_v60 = vld [vmem:[#allocation7 + $0x1708] sm:$0xff]  ;;  %v9752_v21 = vcombine.high %v1530_v52, %v1534_v53 }
 0x284   :  { %7612 = vmatpush1.bf16.msra.mxu0 %v9663_v28  ;;  %v1662_v61 = vld [vmem:[#allocation7 + $0x1728] sm:$0xff]  ;;  %v9751_v28 = vcombine.low %v1530_v52, %v1534_v53 }
 0x285   :  { %7653 = vmatpush1.bf16.msra.mxu1 %v9791_v58  ;;  %7613 = vmatprep.subr.bf16.mxu0 %v9656_v20  ;;  %v9880_v5 = vcombine.high %v1658_v60, %v1662_v61  ;;  %v1522_v6 = vld [vmem:[#allocation7 + $0x12c8] sm:$0xff]  ;;  %v9879_v58 = vcombine.low %v1658_v60, %v1662_v61 }
 0x286   :  { %7654 = vmatprep.subr.bf16.mxu1 %v9784_v10  ;;  %v1526_v55 = vld [vmem:[#allocation7 + $0x12e8] sm:$0xff] }
 0x287   :  { %v1650_v56 = vld [vmem:[#allocation7 + $0x16c8] sm:$0xff]  ;;  %v9744_v20 = vcombine.high %v1522_v6, %v1526_v55 }
 0x288   :  { %7614 = vmatpush1.bf16.msra.mxu0 %v9655_v1  ;;  %v1654_v2 = vld [vmem:[#allocation7 + $0x16e8] sm:$0xff]  ;;  %v9743_v1 = vcombine.low %v1522_v6, %v1526_v55 }
 0x289   :  { %7655 = vmatpush1.bf16.msra.mxu1 %v9783_v29  ;;  %7615 = vmatprep.subr.bf16.mxu0 %v9776_v23  ;;  %v9872_v10 = vcombine.high %v1650_v56, %v1654_v2  ;;  %v1514_v12 = vld [vmem:[#allocation7 + $0x1288] sm:$0xff]  ;;  %v9871_v29 = vcombine.low %v1650_v56, %v1654_v2 }
 0x28a   :  { %7656 = vmatprep.subr.bf16.mxu1 %v9904_v51  ;;  %v1518_v13 = vld [vmem:[#allocation7 + $0x12a8] sm:$0xff] }
 0x28b   :  { %v1642_v16 = vld [vmem:[#allocation7 + $0x1688] sm:$0xff]  ;;  %v9736_v23 = vcombine.high %v1514_v12, %v1518_v13 }
 0x28c   :  { %7616 = vmatpush2.bf16.msra.mxu0 %v9775_v27  ;;  %v1646_v17 = vld [vmem:[#allocation7 + $0x16a8] sm:$0xff]  ;;  %v9735_v27 = vcombine.low %v1514_v12, %v1518_v13 }
 0x28d   :  { %7657 = vmatpush2.bf16.msra.mxu1 %v9903_v35  ;;  %7617 = vmatprep.subr.bf16.mxu0 %v9768_v36  ;;  %v9864_v51 = vcombine.high %v1642_v16, %v1646_v17  ;;  %v1506_v31 = vld [vmem:[#allocation7 + $0x1248] sm:$0xff]  ;;  %v9863_v35 = vcombine.low %v1642_v16, %v1646_v17 }
 0x28e   :  { %7658 = vmatprep.subr.bf16.mxu1 %v9896_v38  ;;  %v1510_v32 = vld [vmem:[#allocation7 + $0x1268] sm:$0xff] }
 0x28f   :  { %v1634_v33 = vld [vmem:[#allocation7 + $0x1648] sm:$0xff]  ;;  %v9728_v36 = vcombine.high %v1506_v31, %v1510_v32 }
 0x290   :  { %7618 = vmatpush2.bf16.msra.mxu0 %v9767_v41  ;;  %v1638_v34 = vld [vmem:[#allocation7 + $0x1668] sm:$0xff]  ;;  %v9727_v41 = vcombine.low %v1506_v31, %v1510_v32 }
 0x291   :  { %7659 = vmatpush2.bf16.msra.mxu1 %v9895_v43  ;;  %7619 = vmatprep.subr.bf16.mxu0 %v9760_v49  ;;  %v9856_v38 = vcombine.high %v1634_v33, %v1638_v34  ;;  %v1498_v39 = vld [vmem:[#allocation7 + $0x1208] sm:$0xff]  ;;  %v9855_v43 = vcombine.low %v1634_v33, %v1638_v34 }
 0x292   :  { %7660 = vmatprep.subr.bf16.mxu1 %v9888_v50  ;;  %v1502_v15 = vld [vmem:[#allocation7 + $0x1228] sm:$0xff] }
 0x293   :  { %v1626_v7 = vld [vmem:[#allocation7 + $0x1608] sm:$0xff]  ;;  %v9720_v49 = vcombine.high %v1498_v39, %v1502_v15 }
 0x294   :  { %7620 = vmatpush2.bf16.msra.mxu0 %v9759_v63  ;;  %v1630_v40 = vld [vmem:[#allocation7 + $0x1628] sm:$0xff]  ;;  %v9719_v63 = vcombine.low %v1498_v39, %v1502_v15 }
 0x295   :  { %7661 = vmatpush2.bf16.msra.mxu1 %v9887_v18  ;;  %7621 = vmatprep.subr.bf16.mxu0 %v9752_v21  ;;  %v9848_v50 = vcombine.high %v1626_v7, %v1630_v40  ;;  %v1746_v52 = vld [vmem:[#allocation7 + $0x19c8] sm:$0xff]  ;;  %v9847_v18 = vcombine.low %v1626_v7, %v1630_v40 }
 0x296   :  { %7662 = vmatprep.subr.bf16.mxu1 %v9880_v5  ;;  %v1750_v53 = vld [vmem:[#allocation7 + $0x19e8] sm:$0xff] }
 0x297   :  { %v1874_v60 = vld [vmem:[#allocation7 + $0x1dc8] sm:$0xff]  ;;  %v9968_v21 = vcombine.high %v1746_v52, %v1750_v53  ;;  %v9967_v56 = vcombine.low %v1746_v52, %v1750_v53 }
 0x298   :  { %7622 = vmatpush2.bf16.msra.mxu0 %v9751_v28  ;;  %v1878_v61 = vld [vmem:[#allocation7 + $0x1de8] sm:$0xff] }
 0x299   :  { %7663 = vmatpush2.bf16.msra.mxu1 %v9879_v58  ;;  %7623 = vmatprep.subr.bf16.mxu0 %v9744_v20  ;;  %v10096_v5 = vcombine.high %v1874_v60, %v1878_v61  ;;  %v1738_v6 = vld [vmem:[#allocation7 + $0x1988] sm:$0xff]  ;;  %v10095_v58 = vcombine.low %v1874_v60, %v1878_v61 }
 0x29a   :  { %7664 = vmatprep.subr.bf16.mxu1 %v9872_v10  ;;  %v1742_v55 = vld [vmem:[#allocation7 + $0x19a8] sm:$0xff] }
 0x29b   :  { %v1866_v2 = vld [vmem:[#allocation7 + $0x1d88] sm:$0xff]  ;;  %v9960_v20 = vcombine.high %v1738_v6, %v1742_v55 }
 0x29c   :  { %7624 = vmatpush2.bf16.msra.mxu0 %v9743_v1  ;;  %v1870_v28 = vld [vmem:[#allocation7 + $0x1da8] sm:$0xff] }
 0x29d   :  { %7665 = vmatpush2.bf16.msra.mxu1 %v9871_v29  ;;  %7625 = vmatprep.subr.bf16.mxu0 %v9736_v23  ;;  %v1730_v10 = vld [vmem:[#allocation7 + $0x1948] sm:$0xff]  ;;  %v10088_v17 = vcombine.high %v1866_v2, %v1870_v28  ;;  %v10087_v33 = vcombine.low %v1866_v2, %v1870_v28 }
 0x29e   :  { %7666 = vmatprep.subr.bf16.mxu1 %v9864_v51  ;;  %v1734_v12 = vld [vmem:[#allocation7 + $0x1968] sm:$0xff]  ;;  %v9959_v51 = vcombine.low %v1738_v6, %v1742_v55 }
 0x29f   :  { %v1858_v1 = vld [vmem:[#allocation7 + $0x1d48] sm:$0xff]  ;;  %v9952_v34 = vcombine.high %v1730_v10, %v1734_v12 }
 0x2a0   :  { %7626 = vmatpush2.bf16.msra.mxu0 %v9735_v27  ;;  %v1862_v29 = vld [vmem:[#allocation7 + $0x1d68] sm:$0xff] }
 0x2a1   :  { %7667 = vmatpush2.bf16.msra.mxu1 %v9863_v35  ;;  %7627 = vmatprep.subr.bf16.mxu0 %v9728_v36  ;;  %v10080_v36 = vcombine.high %v1858_v1, %v1862_v29  ;;  %v1850_v7 = vld [vmem:[#allocation7 + $0x1d08] sm:$0xff]  ;;  %v10079_v52 = vcombine.low %v1858_v1, %v1862_v29 }
 0x2a2   :  { %7668 = vmatprep.subr.bf16.mxu1 %v9856_v38  ;;  %v1726_v38 = vld [vmem:[#allocation7 + $0x1928] sm:$0xff] }
 0x2a3   :  { %v1854_v40 = vld [vmem:[#allocation7 + $0x1d28] sm:$0xff] }
 0x2a4   :  { %7628 = vmatpush2.bf16.msra.mxu0 %v9727_v41  ;;  %v1714_v60 = vld [vmem:[#allocation7 + $0x18c8] sm:$0xff] }
 0x2a5   :  { %7669 = vmatpush2.bf16.msra.mxu1 %v9855_v43  ;;  %7629 = vmatprep.subr.bf16.mxu0 %v9720_v49  ;;  %v9951_v43 = vcombine.low %v1730_v10, %v1734_v12  ;;  %v1718_v61 = vld [vmem:[#allocation7 + $0x18e8] sm:$0xff] }
 0x2a6   :  { %7670 = vmatprep.subr.bf16.mxu1 %v9848_v50  ;;  %v9936_v6 = vcombine.high %v1714_v60, %v1718_v61  ;;  %v1710_v2 = vld [vmem:[#allocation7 + $0x18a8] sm:$0xff] }
 0x2a7   :  { %v1834_v28 = vld [vmem:[#allocation7 + $0x1c88] sm:$0xff] }
 0x2a8   :  { %7630 = vmatpush2.bf16.msra.mxu0 %v9719_v63  ;;  %v1842_v63 = vld [vmem:[#allocation7 + $0x1cc8] sm:$0xff] }
 0x2a9   :  { %7671 = vmatpush2.bf16.msra.mxu1 %v9847_v18  ;;  %7681 = vmatprep.subr.bf16.mxu0 %v9968_v21  ;;  %v1846_v18 = vld [vmem:[#allocation7 + $0x1ce8] sm:$0xff] }
 0x2aa   :  { %7722 = vmatprep.subr.bf16.mxu1 %v10096_v5  ;;  %v10071_v5 = vcombine.low %v1850_v7, %v1854_v40  ;;  %v10064_v55 = vcombine.high %v1842_v63, %v1846_v18  ;;  %v10063_v10 = vcombine.low %v1842_v63, %v1846_v18  ;;  %v1826_v1 = vld [vmem:[#allocation7 + $0x1c48] sm:$0xff] }
 0x2ab   :  { %v7387_v13 = vpop.f32.mrf.mxu0  ;;  %v7428_v16 = vpop.f32.mrf.mxu1  ;;  %7632 = vmatmul.mubr.bf16.vlgmr.msra.gmra.mxu0 %v10776_v19  ;;  %v1830_v29 = vld [vmem:[#allocation7 + $0x1c68] sm:$0xff] }
 0x2ac   :  { %v7388_v23 = vadd.f32 %v7387_v13, %v10822_v24  ;;  %7673 = vmatmul.mubr.bf16.vlgmr.msra.gmra.mxu1 %v10778_v26  ;;  %7682 = vmatpush1.bf16.msra.mxu0 %v9967_v56  ;;  %v1722_v24 = vld [vmem:[#allocation7 + $0x1908] sm:$0xff] }
 0x2ad   :  { %7713 = vmatprep.mubr.bf16.mxu0 %v10780_v30  ;;  %7723 = vmatpush1.bf16.msra.mxu1 %v10095_v58  ;;  %v7389_v31 = vpop.f32.mrf.mxu0  ;;  %v7430_v32 = vpop.f32.mrf.mxu1  ;;  %v9944_v53 = vcombine.high %v1722_v24, %v1726_v38  ;;  %v9943_v21 = vcombine.low %v1722_v24, %v1726_v38  ;;  %v1706_v56 = vld [vmem:[#allocation7 + $0x1888] sm:$0xff]  ;;  %v10047_v38 = vcombine.low %v1826_v1, %v1830_v29 }
 0x2ae   :  { %v10832_v27 = vadd.f32 %v7428_v16, %v7388_v23  ;;  %7754 = vmatprep.mubr.bf16.mxu1 %v10782_v0  ;;  %v7390_v35 = vadd.f32 %v7389_v31, %v10826_v14  ;;  %7683 = vmatprep.subr.bf16.mxu0 %v9960_v20  ;;  %v10072_v14 = vcombine.high %v1850_v7, %v1854_v40  ;;  %v1838_v58 = vld [vmem:[#allocation7 + $0x1ca8] sm:$0xff] }
 0x2af   :  { %v7391_v39 = vpop.f32.mrf.mxu0  ;;  %v7432_v15 = vpop.f32.mrf.mxu1  ;;  %7724 = vmatprep.subr.bf16.mxu1 %v10088_v17  ;;  %v9935_v20 = vcombine.low %v1714_v60, %v1718_v61  ;;  %v9928_v12 = vcombine.high %v1706_v56, %v1710_v2  ;;  %v10056_v13 = vcombine.high %v1834_v28, %v1838_v58  ;;  %v1698_v16 = vld [vmem:[#allocation7 + $0x1848] sm:$0xff]  ;;  %v9927_v23 = vcombine.low %v1706_v56, %v1710_v2 }
 0x2b0   :  { %v10836_v41 = vadd.f32 %v7430_v32, %v7390_v35  ;;  %7684 = vmatpush1.bf16.msra.mxu0 %v9959_v51  ;;  %v1702_v17 = vld [vmem:[#allocation7 + $0x1868] sm:$0xff]  ;;  %v10055_v51 = vcombine.low %v1834_v28, %v1838_v58  ;;  %v10048_v32 = vcombine.high %v1826_v1, %v1830_v29 }
 0x2b1   :  { %7725 = vmatpush1.bf16.msra.mxu1 %v10087_v33  ;;  %v7392_v49 = vpop.f32.mrf.mxu0  ;;  %v7433_v50 = vpop.f32.mrf.mxu1  ;;  %7685 = vmatprep.subr.bf16.mxu0 %v9952_v34  ;;  %v9920_v31 = vcombine.high %v1698_v16, %v1702_v17  ;;  %v1690_v33 = vld [vmem:[#allocation7 + $0x1808] sm:$0xff]  ;;  %v9919_v24 = vcombine.low %v1698_v16, %v1702_v17 }
 0x2b2   :  { %7726 = vmatprep.subr.bf16.mxu1 %v10080_v36  ;;  %v1694_v34 = vld [vmem:[#allocation7 + $0x1828] sm:$0xff] }
 0x2b3   :  { %v1818_v35 = vld [vmem:[#allocation7 + $0x1c08] sm:$0xff]  ;;  %v9912_v39 = vcombine.high %v1690_v33, %v1694_v34  ;;  %v9911_v50 = vcombine.low %v1690_v33, %v1694_v34 }
 0x2b4   :  { %7686 = vmatpush1.bf16.msra.mxu0 %v9951_v43  ;;  %v1822_v36 = vld [vmem:[#allocation7 + $0x1c28] sm:$0xff] }
 0x2b5   :  { %7727 = vmatpush1.bf16.msra.mxu1 %v10079_v52  ;;  %7687 = vmatprep.subr.bf16.mxu0 %v9944_v53  ;;  %v10040_v15 = vcombine.high %v1818_v35, %v1822_v36  ;;  %v1810_v7 = vld [vmem:[#allocation7 + $0x1bc8] sm:$0xff]  ;;  %v10039_v52 = vcombine.low %v1818_v35, %v1822_v36 }
 0x2b6   :  { %7728 = vmatprep.subr.bf16.mxu1 %v10072_v14  ;;  %v1814_v40 = vld [vmem:[#allocation7 + $0x1be8] sm:$0xff] }
 0x2b7   :  { %v1938_v43 = vld [vmem:[#allocation7 + $0x1fc8] sm:$0xff]  ;;  %v10032_v53 = vcombine.high %v1810_v7, %v1814_v40 }
 0x2b8   :  { %7688 = vmatpush1.bf16.msra.mxu0 %v9943_v21  ;;  %v1942_v49 = vld [vmem:[#allocation7 + $0x1fe8] sm:$0xff]  ;;  %v10031_v21 = vcombine.low %v1810_v7, %v1814_v40 }
 0x2b9   :  { %7729 = vmatpush1.bf16.msra.mxu1 %v10071_v5  ;;  %7689 = vmatprep.subr.bf16.mxu0 %v9936_v6  ;;  %v10160_v14 = vcombine.high %v1938_v43, %v1942_v49  ;;  %v1802_v60 = vld [vmem:[#allocation7 + $0x1b88] sm:$0xff]  ;;  %v10159_v5 = vcombine.low %v1938_v43, %v1942_v49 }
 0x2ba   :  { %7730 = vmatprep.subr.bf16.mxu1 %v10064_v55  ;;  %v1806_v61 = vld [vmem:[#allocation7 + $0x1ba8] sm:$0xff] }
 0x2bb   :  { %v1930_v63 = vld [vmem:[#allocation7 + $0x1f88] sm:$0xff]  ;;  %v10024_v6 = vcombine.high %v1802_v60, %v1806_v61 }
 0x2bc   :  { %7690 = vmatpush1.bf16.msra.mxu0 %v9935_v20  ;;  %v1934_v18 = vld [vmem:[#allocation7 + $0x1fa8] sm:$0xff]  ;;  %v10023_v20 = vcombine.low %v1802_v60, %v1806_v61 }
 0x2bd   :  { %7731 = vmatpush1.bf16.msra.mxu1 %v10063_v10  ;;  %7691 = vmatprep.subr.bf16.mxu0 %v9928_v12  ;;  %v10152_v55 = vcombine.high %v1930_v63, %v1934_v18  ;;  %v1794_v56 = vld [vmem:[#allocation7 + $0x1b48] sm:$0xff]  ;;  %v10151_v10 = vcombine.low %v1930_v63, %v1934_v18 }
 0x2be   :  { %7732 = vmatprep.subr.bf16.mxu1 %v10056_v13  ;;  %v1798_v2 = vld [vmem:[#allocation7 + $0x1b68] sm:$0xff] }
 0x2bf   :  { %v1922_v28 = vld [vmem:[#allocation7 + $0x1f48] sm:$0xff]  ;;  %v10016_v12 = vcombine.high %v1794_v56, %v1798_v2 }
 0x2c0   :  { %7692 = vmatpush1.bf16.msra.mxu0 %v9927_v23  ;;  %v1926_v58 = vld [vmem:[#allocation7 + $0x1f68] sm:$0xff]  ;;  %v10015_v23 = vcombine.low %v1794_v56, %v1798_v2 }
 0x2c1   :  { %7733 = vmatpush1.bf16.msra.mxu1 %v10055_v51  ;;  %7693 = vmatprep.subr.bf16.mxu0 %v9920_v31  ;;  %v10144_v13 = vcombine.high %v1922_v28, %v1926_v58  ;;  %v1786_v16 = vld [vmem:[#allocation7 + $0x1b08] sm:$0xff]  ;;  %v10143_v51 = vcombine.low %v1922_v28, %v1926_v58 }
 0x2c2   :  { %7734 = vmatprep.subr.bf16.mxu1 %v10048_v32  ;;  %v1790_v17 = vld [vmem:[#allocation7 + $0x1b28] sm:$0xff] }
 0x2c3   :  { %v1914_v1 = vld [vmem:[#allocation7 + $0x1f08] sm:$0xff]  ;;  %v10008_v31 = vcombine.high %v1786_v16, %v1790_v17 }
 0x2c4   :  { %7694 = vmatpush1.bf16.msra.mxu0 %v9919_v24  ;;  %v1918_v29 = vld [vmem:[#allocation7 + $0x1f28] sm:$0xff]  ;;  %v10007_v24 = vcombine.low %v1786_v16, %v1790_v17  ;;  %v979_v16 = vld [vmem:[#allocation7 + $0x1d0] sm:$0xff] }
 0x2c5   :  { %7735 = vmatpush1.bf16.msra.mxu1 %v10047_v38  ;;  %7695 = vmatprep.subr.bf16.mxu0 %v9912_v39  ;;  %v10136_v32 = vcombine.high %v1914_v1, %v1918_v29  ;;  %v1778_v33 = vld [vmem:[#allocation7 + $0x1ac8] sm:$0xff]  ;;  %v10135_v38 = vcombine.low %v1914_v1, %v1918_v29  ;;  %v983_v17 = vld [vmem:[#allocation7 + $0x1f0] sm:$0xff] }
 0x2c6   :  { %7736 = vmatprep.subr.bf16.mxu1 %v10040_v15  ;;  %v1782_v34 = vld [vmem:[#allocation7 + $0x1ae8] sm:$0xff]  ;;  %v1107_v1 = vld [vmem:[#allocation7 + $0x5d0] sm:$0xff] }
 0x2c7   :  { %v1906_v35 = vld [vmem:[#allocation7 + $0x1ec8] sm:$0xff]  ;;  %v10000_v39 = vcombine.high %v1778_v33, %v1782_v34  ;;  %v1111_v29 = vld [vmem:[#allocation7 + $0x5f0] sm:$0xff] }
 0x2c8   :  { %7696 = vmatpush1.bf16.msra.mxu0 %v9911_v50  ;;  %v1910_v36 = vld [vmem:[#allocation7 + $0x1ee8] sm:$0xff]  ;;  %v9999_v50 = vcombine.low %v1778_v33, %v1782_v34  ;;  %v971_v33 = vld [vmem:[#allocation7 + $0x190] sm:$0xff] }
 0x2c9   :  { %7737 = vmatpush1.bf16.msra.mxu1 %v10039_v52  ;;  %7697 = vmatprep.subr.bf16.mxu0 %v10032_v53  ;;  %v10128_v15 = vcombine.high %v1906_v35, %v1910_v36  ;;  %v1770_v7 = vld [vmem:[#allocation7 + $0x1a88] sm:$0xff]  ;;  %v10127_v52 = vcombine.low %v1906_v35, %v1910_v36  ;;  %v975_v34 = vld [vmem:[#allocation7 + $0x1b0] sm:$0xff]  ;;  %v10396_v35 = vld [vmem:[#allocation8] sm:$0xff] }
 0x2ca   :  { %7738 = vmatprep.subr.bf16.mxu1 %v10160_v14  ;;  %v1774_v40 = vld [vmem:[#allocation7 + $0x1aa8] sm:$0xff]  ;;  %v1958_v36 = vrot.slane %v10396_v35, %v10672_v22 }
 0x2cb   :  { %v1898_v43 = vld [vmem:[#allocation7 + $0x1e88] sm:$0xff]  ;;  %v9992_v53 = vcombine.high %v1770_v7, %v1774_v40 }
 0x2cc   :  { %7698 = vmatpush2.bf16.msra.mxu0 %v10031_v21  ;;  %v1902_v49 = vld [vmem:[#allocation7 + $0x1ea8] sm:$0xff]  ;;  %v9991_v21 = vcombine.low %v1770_v7, %v1774_v40  ;;  %v1962_v7 = vrot.slane %v10396_v35, %v10680_v25  ;;  %v9194_v40 = vcombine.high %v971_v33, %v975_v34 }
 0x2cd   :  { %7739 = vmatpush2.bf16.msra.mxu1 %v10159_v5  ;;  %7699 = vmatprep.subr.bf16.mxu0 %v10024_v6  ;;  %v10120_v14 = vcombine.high %v1898_v43, %v1902_v49  ;;  %v1762_v60 = vld [vmem:[#allocation7 + $0x1a48] sm:$0xff]  ;;  %v10119_v5 = vcombine.low %v1898_v43, %v1902_v49  ;;  %v963_v43 = vld [vmem:[#allocation7 + $0x150] sm:$0xff] }
 0x2ce   :  { %7740 = vmatprep.subr.bf16.mxu1 %v10152_v55  ;;  %v1766_v61 = vld [vmem:[#allocation7 + $0x1a68] sm:$0xff]  ;;  %v967_v49 = vld [vmem:[#allocation7 + $0x170] sm:$0xff] }
 0x2cf   :  { %v1890_v63 = vld [vmem:[#allocation7 + $0x1e48] sm:$0xff]  ;;  %v9984_v6 = vcombine.high %v1762_v60, %v1766_v61 }
 0x2d0   :  { %7700 = vmatpush2.bf16.msra.mxu0 %v10023_v20  ;;  %v1894_v18 = vld [vmem:[#allocation7 + $0x1e68] sm:$0xff]  ;;  %v9983_v20 = vcombine.low %v1762_v60, %v1766_v61  ;;  %v9193_v61 = vcombine.low %v971_v33, %v975_v34  ;;  %v1079_v33 = vld [vmem:[#allocation7 + $0x4f0] sm:$0xff] }
 0x2d1   :  { %7741 = vmatpush2.bf16.msra.mxu1 %v10151_v10  ;;  %7701 = vmatprep.subr.bf16.mxu0 %v10016_v12  ;;  %v10112_v55 = vcombine.high %v1890_v63, %v1894_v18  ;;  %v1754_v56 = vld [vmem:[#allocation7 + $0x1a08] sm:$0xff]  ;;  %v10111_v10 = vcombine.low %v1890_v63, %v1894_v18  ;;  %v9186_v18 = vcombine.high %v963_v43, %v967_v49 }
 0x2d2   :  { %7742 = vmatprep.subr.bf16.mxu1 %v10144_v13  ;;  %v1758_v2 = vld [vmem:[#allocation7 + $0x1a28] sm:$0xff] }
 0x2d3   :  { %v1882_v28 = vld [vmem:[#allocation7 + $0x1e08] sm:$0xff]  ;;  %v9976_v12 = vcombine.high %v1754_v56, %v1758_v2 }
 0x2d4   :  { %7702 = vmatpush2.bf16.msra.mxu0 %v10015_v23  ;;  %v1886_v58 = vld [vmem:[#allocation7 + $0x1e28] sm:$0xff]  ;;  %v9975_v23 = vcombine.low %v1754_v56, %v1758_v2  ;;  %v955_v56 = vld [vmem:[#allocation7 + $0x110] sm:$0xff] }
 0x2d5   :  { %7743 = vmatpush2.bf16.msra.mxu1 %v10143_v51  ;;  %7703 = vmatprep.subr.bf16.mxu0 %v10008_v31  ;;  %v10104_v13 = vcombine.high %v1882_v28, %v1886_v58  ;;  %v10103_v51 = vcombine.low %v1882_v28, %v1886_v58  ;;  %v9202_v31 = vcombine.high %v979_v16, %v983_v17  ;;  %v959_v2 = vld [vmem:[#allocation7 + $0x130] sm:$0xff] }
 0x2d6   :  { %7744 = vmatprep.subr.bf16.mxu1 %v10136_v32  ;;  %v9330_v32 = vcombine.high %v1107_v1, %v1111_v29  ;;  %v1083_v58 = vld [vmem:[#allocation7 + $0x510] sm:$0xff]  ;;  %v9177_v34 = vcombine.low %v955_v56, %v959_v2 }
 0x2d8   :  { %7704 = vmatpush2.bf16.msra.mxu0 %v10007_v24  ;;  %v9201_v24 = vcombine.low %v979_v16, %v983_v17 }
 0x2d9   :  { %7745 = vmatpush2.bf16.msra.mxu1 %v10135_v38  ;;  %7705 = vmatprep.subr.bf16.mxu0 %v10000_v39  ;;  %v1099_v38 = vld [vmem:[#allocation7 + $0x590] sm:$0xff] }
 0x2da   :  { %7746 = vmatprep.subr.bf16.mxu1 %v10128_v15  ;;  %v1103_v39 = vld [vmem:[#allocation7 + $0x5b0] sm:$0xff]  ;;  %v9329_v15 = vcombine.low %v1107_v1, %v1111_v29  ;;  %v9178_v1 = vcombine.high %v955_v56, %v959_v2 }
 0x2db   :  { %v9321_v25 = vcombine.low %v1099_v38, %v1103_v39 }
 0x2dc   :  { %7706 = vmatpush2.bf16.msra.mxu0 %v9999_v50 }
 0x2dd   :  { %7747 = vmatpush2.bf16.msra.mxu1 %v10127_v52  ;;  %7707 = vmatprep.subr.bf16.mxu0 %v9992_v53  ;;  %v9322_v52 = vcombine.high %v1099_v38, %v1103_v39  ;;  %v1091_v53 = vld [vmem:[#allocation7 + $0x550] sm:$0xff] }
 0x2de   :  { %7748 = vmatprep.subr.bf16.mxu1 %v10120_v14  ;;  %v1095_v14 = vld [vmem:[#allocation7 + $0x570] sm:$0xff] }
 0x2df   :  { %v9313_v17 = vcombine.low %v1091_v53, %v1095_v14  ;;  %v939_v38 = vld [vmem:[#allocation7 + $0x90] sm:$0xff] }
 0x2e0   :  { %7708 = vmatpush2.bf16.msra.mxu0 %v9991_v21  ;;  %v943_v39 = vld [vmem:[#allocation7 + $0xb0] sm:$0xff] }
 0x2e1   :  { %7749 = vmatpush2.bf16.msra.mxu1 %v10119_v5  ;;  %7709 = vmatprep.subr.bf16.mxu0 %v9984_v6 }
 0x2e2   :  { %7750 = vmatprep.subr.bf16.mxu1 %v10112_v55  ;;  %v9314_v55 = vcombine.high %v1091_v53, %v1095_v14  ;;  %v935_v53 = vld [vmem:[#allocation7 + $0x70] sm:$0xff] }
 0x2e3   :  { %v1059_v14 = vld [vmem:[#allocation7 + $0x450] sm:$0xff] }
 0x2e4   :  { %7710 = vmatpush2.bf16.msra.mxu0 %v9983_v20  ;;  %v1087_v20 = vld [vmem:[#allocation7 + $0x530] sm:$0xff] }
 0x2e5   :  { %7751 = vmatpush2.bf16.msra.mxu1 %v10111_v10  ;;  %7711 = vmatprep.subr.bf16.mxu0 %v9976_v12  ;;  %v9305_v35 = vcombine.low %v1083_v58, %v1087_v20 }
 0x2e6   :  { %7752 = vmatprep.subr.bf16.mxu1 %v10104_v13  ;;  %v9185_v13 = vcombine.low %v963_v43, %v967_v49  ;;  %v9162_v49 = vcombine.high %v939_v38, %v943_v39 }
 0x2e8   :  { %7712 = vmatpush2.bf16.msra.mxu0 %v9975_v23  ;;  %v9306_v23 = vcombine.high %v1083_v58, %v1087_v20  ;;  %v1043_v20 = vld [vmem:[#allocation7 + $0x3d0] sm:$0xff] }
 0x2e9   :  { %7753 = vmatpush2.bf16.msra.mxu1 %v10103_v51  ;;  %7763 = vmatprep.subr.bf16.mxu0 %v9202_v31  ;;  %v947_v51 = vld [vmem:[#allocation7 + $0xd0] sm:$0xff] }
 0x2ea   :  { %7804 = vmatprep.subr.bf16.mxu1 %v9330_v32  ;;  %v951_v31 = vld [vmem:[#allocation7 + $0xf0] sm:$0xff] }
 0x2eb   :  { %v7469_v50 = vpop.f32.mrf.mxu0  ;;  %7714 = vmatmul.mubr.bf16.vlgmr.msra.gmra.mxu0 %v10795_v11  ;;  %v1075_v32 = vld [vmem:[#allocation7 + $0x4d0] sm:$0xff] }
 0x2ec   :  { %v7470_v60 = vadd.f32 %v7469_v50, %v1958_v36  ;;  %v7510_v22 = vpop.f32.mrf.mxu1  ;;  %7755 = vmatmul.mubr.bf16.vlgmr.msra.gmra.mxu1 %v10797_v44  ;;  %7764 = vmatpush1.bf16.msra.mxu0 %v9201_v24  ;;  %v9170_v36 = vcombine.high %v947_v51, %v951_v31  ;;  %v9298_v24 = vcombine.high %v1075_v32, %v1079_v33 }
 0x2ed   :  { %7795 = vmatprep.mubr.bf16.mxu0 %v10692_v46  ;;  %7805 = vmatpush1.bf16.msra.mxu1 %v9329_v15  ;;  %v7471_v63 = vpop.f32.mrf.mxu0  ;;  %v1067_v15 = vld [vmem:[#allocation7 + $0x490] sm:$0xff]  ;;  %v9297_v43 = vcombine.low %v1075_v32, %v1079_v33 }
 0x2ee   :  { %v10843_v21 = vadd.f32 %v7510_v22, %v7470_v60  ;;  %7836 = vmatprep.mubr.bf16.mxu1 %v10694_v47  ;;  %v7472_v5 = vadd.f32 %v7471_v63, %v1962_v7  ;;  %v7512_v6 = vpop.f32.mrf.mxu1  ;;  %7765 = vmatprep.subr.bf16.mxu0 %v9194_v40  ;;  %v1071_v7 = vld [vmem:[#allocation7 + $0x4b0] sm:$0xff]  ;;  %v9169_v40 = vcombine.low %v947_v51, %v951_v31 }
 0x2ef   :  { %v7473_v28 = vpop.f32.mrf.mxu0  ;;  %7806 = vmatprep.subr.bf16.mxu1 %v9322_v52  ;;  %v9290_v50 = vcombine.high %v1067_v15, %v1071_v7  ;;  %v931_v52 = vld [vmem:[#allocation7 + $0x50] sm:$0xff]  ;;  %v9161_v22 = vcombine.low %v939_v38, %v943_v39 }
 0x2f0   :  { %v10846_v10 = vadd.f32 %v7512_v6, %v7472_v5  ;;  %v7514_v12 = vpop.f32.mrf.mxu1  ;;  %7766 = vmatpush1.bf16.msra.mxu0 %v9193_v61  ;;  %v1063_v60 = vld [vmem:[#allocation7 + $0x470] sm:$0xff]  ;;  %v9289_v61 = vcombine.low %v1067_v15, %v1071_v7  ;;  %v9154_v63 = vcombine.high %v931_v52, %v935_v53  ;;  %v9153_v56 = vcombine.low %v931_v52, %v935_v53 }
 0x2f1   :  { %7807 = vmatpush1.bf16.msra.mxu1 %v9321_v25  ;;  %v7474_v16 = vpop.f32.mrf.mxu0  ;;  %7767 = vmatprep.subr.bf16.mxu0 %v9186_v18  ;;  %v9282_v25 = vcombine.high %v1059_v14, %v1063_v60  ;;  %v923_v18 = vld [vmem:[#allocation7 + $0x10] sm:$0xff]  ;;  %v9281_v2 = vcombine.low %v1059_v14, %v1063_v60 }
 0x2f2   :  { %v7515_v29 = vpop.f32.mrf.mxu1  ;;  %7808 = vmatprep.subr.bf16.mxu1 %v9314_v55  ;;  %v927_v5 = vld [vmem:[#allocation7 + $0x30] sm:$0xff] }
 0x2f3   :  { %v1051_v6 = vld [vmem:[#allocation7 + $0x410] sm:$0xff]  ;;  %v9146_v28 = vcombine.high %v923_v18, %v927_v5 }
 0x2f4   :  { %7768 = vmatpush1.bf16.msra.mxu0 %v9185_v13  ;;  %v1055_v55 = vld [vmem:[#allocation7 + $0x430] sm:$0xff] }
 0x2f5   :  { %7809 = vmatpush1.bf16.msra.mxu1 %v9313_v17  ;;  %7769 = vmatprep.subr.bf16.mxu0 %v9178_v1  ;;  %v9274_v58 = vcombine.high %v1051_v6, %v1055_v55  ;;  %v1047_v12 = vld [vmem:[#allocation7 + $0x3f0] sm:$0xff]  ;;  %v9145_v17 = vcombine.low %v923_v18, %v927_v5  ;;  %v9273_v1 = vcombine.low %v1051_v6, %v1055_v55 }
 0x2f6   :  { %7810 = vmatprep.subr.bf16.mxu1 %v9306_v23  ;;  %v1171_v13 = vld [vmem:[#allocation7 + $0x7d0] sm:$0xff]  ;;  %v9266_v29 = vcombine.high %v1043_v20, %v1047_v12 }
 0x2f7   :  { %v1175_v16 = vld [vmem:[#allocation7 + $0x7f0] sm:$0xff] }
 0x2f8   :  { %7770 = vmatpush1.bf16.msra.mxu0 %v9177_v34  ;;  %v9394_v23 = vcombine.high %v1171_v13, %v1175_v16  ;;  %v1035_v51 = vld [vmem:[#allocation7 + $0x390] sm:$0xff]  ;;  %v9265_v34 = vcombine.low %v1043_v20, %v1047_v12 }
 0x2f9   :  { %7811 = vmatpush1.bf16.msra.mxu1 %v9305_v35  ;;  %7771 = vmatprep.subr.bf16.mxu0 %v9170_v36  ;;  %v1039_v31 = vld [vmem:[#allocation7 + $0x3b0] sm:$0xff]  ;;  %v9393_v35 = vcombine.low %v1171_v13, %v1175_v16 }
 0x2fa   :  { %7812 = vmatprep.subr.bf16.mxu1 %v9298_v24  ;;  %v1163_v32 = vld [vmem:[#allocation7 + $0x790] sm:$0xff]  ;;  %v9258_v36 = vcombine.high %v1035_v51, %v1039_v31 }
 0x2fb   :  { %v1167_v33 = vld [vmem:[#allocation7 + $0x7b0] sm:$0xff] }
 0x2fc   :  { %7772 = vmatpush1.bf16.msra.mxu0 %v9169_v40  ;;  %v9386_v24 = vcombine.high %v1163_v32, %v1167_v33  ;;  %v1027_v38 = vld [vmem:[#allocation7 + $0x350] sm:$0xff]  ;;  %v9257_v40 = vcombine.low %v1035_v51, %v1039_v31 }
 0x2fd   :  { %7813 = vmatpush1.bf16.msra.mxu1 %v9297_v43  ;;  %7773 = vmatprep.subr.bf16.mxu0 %v9162_v49  ;;  %v1031_v39 = vld [vmem:[#allocation7 + $0x370] sm:$0xff]  ;;  %v9385_v43 = vcombine.low %v1163_v32, %v1167_v33 }
 0x2fe   :  { %7814 = vmatprep.subr.bf16.mxu1 %v9290_v50  ;;  %v1155_v15 = vld [vmem:[#allocation7 + $0x750] sm:$0xff]  ;;  %v9250_v49 = vcombine.high %v1027_v38, %v1031_v39 }
 0x2ff   :  { %v1159_v7 = vld [vmem:[#allocation7 + $0x770] sm:$0xff] }
 0x300   :  { %7774 = vmatpush1.bf16.msra.mxu0 %v9161_v22  ;;  %v9378_v50 = vcombine.high %v1155_v15, %v1159_v7  ;;  %v1019_v52 = vld [vmem:[#allocation7 + $0x310] sm:$0xff]  ;;  %v9249_v22 = vcombine.low %v1027_v38, %v1031_v39 }
 0x301   :  { %7815 = vmatpush1.bf16.msra.mxu1 %v9289_v61  ;;  %7775 = vmatprep.subr.bf16.mxu0 %v9154_v63  ;;  %v1023_v53 = vld [vmem:[#allocation7 + $0x330] sm:$0xff]  ;;  %v9377_v61 = vcombine.low %v1155_v15, %v1159_v7 }
 0x302   :  { %7816 = vmatprep.subr.bf16.mxu1 %v9282_v25  ;;  %v1147_v14 = vld [vmem:[#allocation7 + $0x710] sm:$0xff]  ;;  %v9242_v63 = vcombine.high %v1019_v52, %v1023_v53 }
 0x303   :  { %v1151_v60 = vld [vmem:[#allocation7 + $0x730] sm:$0xff] }
 0x304   :  { %7776 = vmatpush1.bf16.msra.mxu0 %v9153_v56  ;;  %v9370_v25 = vcombine.high %v1147_v14, %v1151_v60  ;;  %v1011_v18 = vld [vmem:[#allocation7 + $0x2d0] sm:$0xff]  ;;  %v9241_v56 = vcombine.low %v1019_v52, %v1023_v53 }
 0x305   :  { %7817 = vmatpush1.bf16.msra.mxu1 %v9281_v2  ;;  %7777 = vmatprep.subr.bf16.mxu0 %v9146_v28  ;;  %v1015_v5 = vld [vmem:[#allocation7 + $0x2f0] sm:$0xff]  ;;  %v9369_v2 = vcombine.low %v1147_v14, %v1151_v60 }
 0x306   :  { %7818 = vmatprep.subr.bf16.mxu1 %v9274_v58  ;;  %v1139_v6 = vld [vmem:[#allocation7 + $0x6d0] sm:$0xff]  ;;  %v9234_v28 = vcombine.high %v1011_v18, %v1015_v5 }
 0x307   :  { %v1143_v55 = vld [vmem:[#allocation7 + $0x6f0] sm:$0xff] }
 0x308   :  { %7778 = vmatpush1.bf16.msra.mxu0 %v9145_v17  ;;  %v9362_v58 = vcombine.high %v1139_v6, %v1143_v55  ;;  %v1003_v20 = vld [vmem:[#allocation7 + $0x290] sm:$0xff]  ;;  %v9233_v17 = vcombine.low %v1011_v18, %v1015_v5 }
 0x309   :  { %7819 = vmatpush1.bf16.msra.mxu1 %v9273_v1  ;;  %7779 = vmatprep.subr.bf16.mxu0 %v9266_v29  ;;  %v1007_v12 = vld [vmem:[#allocation7 + $0x2b0] sm:$0xff]  ;;  %v9361_v1 = vcombine.low %v1139_v6, %v1143_v55 }
 0x30a   :  { %7820 = vmatprep.subr.bf16.mxu1 %v9394_v23  ;;  %v1131_v13 = vld [vmem:[#allocation7 + $0x690] sm:$0xff]  ;;  %v9226_v29 = vcombine.high %v1003_v20, %v1007_v12 }
 0x30b   :  { %v1135_v16 = vld [vmem:[#allocation7 + $0x6b0] sm:$0xff] }
 0x30c   :  { %7780 = vmatpush2.bf16.msra.mxu0 %v9265_v34  ;;  %v9354_v23 = vcombine.high %v1131_v13, %v1135_v16  ;;  %v995_v51 = vld [vmem:[#allocation7 + $0x250] sm:$0xff]  ;;  %v9225_v34 = vcombine.low %v1003_v20, %v1007_v12 }
 0x30d   :  { %7821 = vmatpush2.bf16.msra.mxu1 %v9393_v35  ;;  %7781 = vmatprep.subr.bf16.mxu0 %v9258_v36  ;;  %v999_v31 = vld [vmem:[#allocation7 + $0x270] sm:$0xff]  ;;  %v9353_v35 = vcombine.low %v1131_v13, %v1135_v16 }
 0x30e   :  { %7822 = vmatprep.subr.bf16.mxu1 %v9386_v24  ;;  %v1123_v32 = vld [vmem:[#allocation7 + $0x650] sm:$0xff]  ;;  %v9218_v36 = vcombine.high %v995_v51, %v999_v31 }
 0x30f   :  { %v1127_v33 = vld [vmem:[#allocation7 + $0x670] sm:$0xff] }
 0x310   :  { %7782 = vmatpush2.bf16.msra.mxu0 %v9257_v40  ;;  %v9346_v24 = vcombine.high %v1123_v32, %v1127_v33  ;;  %v987_v38 = vld [vmem:[#allocation7 + $0x210] sm:$0xff]  ;;  %v9217_v40 = vcombine.low %v995_v51, %v999_v31 }
 0x311   :  { %7823 = vmatpush2.bf16.msra.mxu1 %v9385_v43  ;;  %7783 = vmatprep.subr.bf16.mxu0 %v9250_v49  ;;  %v991_v39 = vld [vmem:[#allocation7 + $0x230] sm:$0xff]  ;;  %v9345_v43 = vcombine.low %v1123_v32, %v1127_v33 }
 0x312   :  { %7824 = vmatprep.subr.bf16.mxu1 %v9378_v50  ;;  %v1115_v15 = vld [vmem:[#allocation7 + $0x610] sm:$0xff]  ;;  %v9210_v49 = vcombine.high %v987_v38, %v991_v39 }
 0x313   :  { %v1119_v7 = vld [vmem:[#allocation7 + $0x630] sm:$0xff] }
 0x314   :  { %7784 = vmatpush2.bf16.msra.mxu0 %v9249_v22  ;;  %v9338_v50 = vcombine.high %v1115_v15, %v1119_v7  ;;  %v1235_v52 = vld [vmem:[#allocation7 + $0x9d0] sm:$0xff]  ;;  %v9209_v22 = vcombine.low %v987_v38, %v991_v39 }
 0x315   :  { %7825 = vmatpush2.bf16.msra.mxu1 %v9377_v61  ;;  %7785 = vmatprep.subr.bf16.mxu0 %v9242_v63  ;;  %v1239_v53 = vld [vmem:[#allocation7 + $0x9f0] sm:$0xff]  ;;  %v9337_v61 = vcombine.low %v1115_v15, %v1119_v7 }
 0x316   :  { %7826 = vmatprep.subr.bf16.mxu1 %v9370_v25  ;;  %v1363_v14 = vld [vmem:[#allocation7 + $0xdd0] sm:$0xff]  ;;  %v9458_v63 = vcombine.high %v1235_v52, %v1239_v53  ;;  %v9457_v6 = vcombine.low %v1235_v52, %v1239_v53 }
 0x317   :  { %v1367_v60 = vld [vmem:[#allocation7 + $0xdf0] sm:$0xff] }
 0x318   :  { %7786 = vmatpush2.bf16.msra.mxu0 %v9241_v56  ;;  %v9586_v25 = vcombine.high %v1363_v14, %v1367_v60  ;;  %v1227_v18 = vld [vmem:[#allocation7 + $0x990] sm:$0xff] }
 0x319   :  { %7827 = vmatpush2.bf16.msra.mxu1 %v9369_v2  ;;  %7787 = vmatprep.subr.bf16.mxu0 %v9234_v28  ;;  %v1231_v5 = vld [vmem:[#allocation7 + $0x9b0] sm:$0xff]  ;;  %v9585_v2 = vcombine.low %v1363_v14, %v1367_v60 }
 0x31a   :  { %7828 = vmatprep.subr.bf16.mxu1 %v9362_v58  ;;  %v1355_v55 = vld [vmem:[#allocation7 + $0xd90] sm:$0xff]  ;;  %v9450_v28 = vcombine.high %v1227_v18, %v1231_v5 }
 0x31b   :  { %v1359_v56 = vld [vmem:[#allocation7 + $0xdb0] sm:$0xff] }
 0x31c   :  { %7788 = vmatpush2.bf16.msra.mxu0 %v9233_v17  ;;  %v1219_v58 = vld [vmem:[#allocation7 + $0x950] sm:$0xff]  ;;  %v9578_v13 = vcombine.high %v1355_v55, %v1359_v56  ;;  %v9577_v31 = vcombine.low %v1355_v55, %v1359_v56 }
 0x31d   :  { %7829 = vmatpush2.bf16.msra.mxu1 %v9361_v1  ;;  %7789 = vmatprep.subr.bf16.mxu0 %v9226_v29  ;;  %v1223_v20 = vld [vmem:[#allocation7 + $0x970] sm:$0xff] }
 0x31e   :  { %7830 = vmatprep.subr.bf16.mxu1 %v9354_v23  ;;  %v1347_v16 = vld [vmem:[#allocation7 + $0xd50] sm:$0xff]  ;;  %v9449_v23 = vcombine.low %v1227_v18, %v1231_v5  ;;  %v9442_v32 = vcombine.high %v1219_v58, %v1223_v20 }
 0x31f   :  { %v1351_v17 = vld [vmem:[#allocation7 + $0xd70] sm:$0xff] }
 0x320   :  { %7790 = vmatpush2.bf16.msra.mxu0 %v9225_v34  ;;  %v1339_v39 = vld [vmem:[#allocation7 + $0xd10] sm:$0xff] }
 0x321   :  { %7831 = vmatpush2.bf16.msra.mxu1 %v9353_v35  ;;  %7791 = vmatprep.subr.bf16.mxu0 %v9218_v36  ;;  %v1211_v36 = vld [vmem:[#allocation7 + $0x910] sm:$0xff] }
 0x322   :  { %7832 = vmatprep.subr.bf16.mxu1 %v9346_v24  ;;  %v1215_v24 = vld [vmem:[#allocation7 + $0x930] sm:$0xff] }
 0x323   :  { %v1343_v15 = vld [vmem:[#allocation7 + $0xd30] sm:$0xff]  ;;  %v9434_v52 = vcombine.high %v1211_v36, %v1215_v24 }
 0x324   :  { %7792 = vmatpush2.bf16.msra.mxu0 %v9217_v40  ;;  %v9562_v53 = vcombine.high %v1339_v39, %v1343_v15  ;;  %v1203_v14 = vld [vmem:[#allocation7 + $0x8d0] sm:$0xff] }
 0x325   :  { %7833 = vmatpush2.bf16.msra.mxu1 %v9345_v43  ;;  %7793 = vmatprep.subr.bf16.mxu0 %v9210_v49  ;;  %v9441_v43 = vcombine.low %v1219_v58, %v1223_v20  ;;  %v1207_v60 = vld [vmem:[#allocation7 + $0x8f0] sm:$0xff] }
 0x326   :  { %7834 = vmatprep.subr.bf16.mxu1 %v9338_v50  ;;  %v9569_v50 = vcombine.low %v1347_v16, %v1351_v17  ;;  %v9426_v18 = vcombine.high %v1203_v14, %v1207_v60  ;;  %v1199_v55 = vld [vmem:[#allocation7 + $0x8b0] sm:$0xff] }
 0x327   :  { %v1323_v56 = vld [vmem:[#allocation7 + $0xc90] sm:$0xff] }
 0x328   :  { %7794 = vmatpush2.bf16.msra.mxu0 %v9209_v22  ;;  %v1331_v22 = vld [vmem:[#allocation7 + $0xcd0] sm:$0xff] }
 0x329   :  { %7835 = vmatpush2.bf16.msra.mxu1 %v9337_v61  ;;  %7845 = vmatprep.subr.bf16.mxu0 %v9458_v63  ;;  %v1335_v61 = vld [vmem:[#allocation7 + $0xcf0] sm:$0xff]  ;;  %v9433_v63 = vcombine.low %v1211_v36, %v1215_v24 }
 0x32a   :  { %7886 = vmatprep.subr.bf16.mxu1 %v9586_v25  ;;  %v9561_v25 = vcombine.low %v1339_v39, %v1343_v15  ;;  %v9554_v5 = vcombine.high %v1331_v22, %v1335_v61  ;;  %v9553_v58 = vcombine.low %v1331_v22, %v1335_v61  ;;  %v1299_v15 = vld [vmem:[#allocation7 + $0xbd0] sm:$0xff] }
 0x32b   :  { %v7551_v12 = vpop.f32.mrf.mxu0  ;;  %7796 = vmatmul.mubr.bf16.vlgmr.msra.gmra.mxu0 %v10696_v48  ;;  %v1419_v22 = vld [vmem:[#allocation7 + $0xf90] sm:$0xff] }
 0x32c   :  { %v7552_v1 = vadd.f32 %v7551_v12, %v10843_v21  ;;  %v7592_v29 = vpop.f32.mrf.mxu1  ;;  %7837 = vmatmul.mubr.bf16.vlgmr.msra.gmra.mxu1 %v10690_v45  ;;  %7846 = vmatpush1.bf16.msra.mxu0 %v9457_v6  ;;  %v9570_v21 = vcombine.high %v1347_v16, %v1351_v17  ;;  %v1195_v6 = vld [vmem:[#allocation7 + $0x890] sm:$0xff] }
 0x32d   :  { %7877 = vmatprep.mubr.bf16.mxu0 %v10722_v37  ;;  %7887 = vmatpush1.bf16.msra.mxu1 %v9585_v2  ;;  %v7553_v51 = vpop.f32.mrf.mxu0  ;;  %v1327_v2 = vld [vmem:[#allocation7 + $0xcb0] sm:$0xff]  ;;  %v9418_v20 = vcombine.high %v1195_v6, %v1199_v55 }
 0x32e   :  { %v10852_v33 = vadd.f32 %v7592_v29, %v7552_v1  ;;  %7918 = vmatprep.mubr.bf16.mxu1 %v10724_v42  ;;  %v7554_v34 = vadd.f32 %v7553_v51, %v10846_v10  ;;  %v7594_v35 = vpop.f32.mrf.mxu1  ;;  %7847 = vmatprep.subr.bf16.mxu0 %v9450_v28  ;;  %v9425_v28 = vcombine.low %v1203_v14, %v1207_v60  ;;  %v1191_v16 = vld [vmem:[#allocation7 + $0x870] sm:$0xff] }
 0x32f   :  { %v7555_v38 = vpop.f32.mrf.mxu0  ;;  %7888 = vmatprep.subr.bf16.mxu1 %v9578_v13  ;;  %v9546_v12 = vcombine.high %v1323_v56, %v1327_v2  ;;  %v1187_v13 = vld [vmem:[#allocation7 + $0x850] sm:$0xff]  ;;  %v9417_v29 = vcombine.low %v1195_v6, %v1199_v55 }
 0x330   :  { %v10856_v7 = vadd.f32 %v7594_v35, %v7554_v34  ;;  %v7596_v40 = vpop.f32.mrf.mxu1  ;;  %7848 = vmatpush1.bf16.msra.mxu0 %v9449_v23  ;;  %v1315_v17 = vld [vmem:[#allocation7 + $0xc50] sm:$0xff]  ;;  %v9545_v23 = vcombine.low %v1323_v56, %v1327_v2  ;;  %v9410_v51 = vcombine.high %v1187_v13, %v1191_v16  ;;  %v9409_v36 = vcombine.low %v1187_v13, %v1191_v16 }
 0x331   :  { %7889 = vmatpush1.bf16.msra.mxu1 %v9577_v31  ;;  %v7556_v49 = vpop.f32.mrf.mxu0  ;;  %7849 = vmatprep.subr.bf16.mxu0 %v9442_v32  ;;  %v1319_v1 = vld [vmem:[#allocation7 + $0xc70] sm:$0xff] }
 0x332   :  { %v7597_v10 = vpop.f32.mrf.mxu1  ;;  %7890 = vmatprep.subr.bf16.mxu1 %v9570_v21  ;;  %v9538_v31 = vcombine.high %v1315_v17, %v1319_v1  ;;  %v1179_v32 = vld [vmem:[#allocation7 + $0x810] sm:$0xff]  ;;  %v9537_v24 = vcombine.low %v1315_v17, %v1319_v1 }
 0x333   :  { %v1183_v34 = vld [vmem:[#allocation7 + $0x830] sm:$0xff] }
 0x334   :  { %7850 = vmatpush1.bf16.msra.mxu0 %v9441_v43  ;;  %v1307_v35 = vld [vmem:[#allocation7 + $0xc10] sm:$0xff]  ;;  %v9402_v38 = vcombine.high %v1179_v32, %v1183_v34 }
 0x335   :  { %7891 = vmatpush1.bf16.msra.mxu1 %v9569_v50  ;;  %7851 = vmatprep.subr.bf16.mxu0 %v9434_v52  ;;  %v1311_v21 = vld [vmem:[#allocation7 + $0xc30] sm:$0xff]  ;;  %v9401_v50 = vcombine.low %v1179_v32, %v1183_v34 }
 0x336   :  { %7892 = vmatprep.subr.bf16.mxu1 %v9562_v53  ;;  %v9530_v39 = vcombine.high %v1307_v35, %v1311_v21  ;;  %v1303_v40 = vld [vmem:[#allocation7 + $0xbf0] sm:$0xff]  ;;  %v9529_v52 = vcombine.low %v1307_v35, %v1311_v21 }
 0x337   :  { %v1427_v43 = vld [vmem:[#allocation7 + $0xfd0] sm:$0xff]  ;;  %v9522_v10 = vcombine.high %v1299_v15, %v1303_v40 }
 0x338   :  { %7852 = vmatpush1.bf16.msra.mxu0 %v9433_v63  ;;  %v1431_v49 = vld [vmem:[#allocation7 + $0xff0] sm:$0xff]  ;;  %v9521_v63 = vcombine.low %v1299_v15, %v1303_v40 }
 0x339   :  { %7893 = vmatpush1.bf16.msra.mxu1 %v9561_v25  ;;  %7853 = vmatprep.subr.bf16.mxu0 %v9426_v18  ;;  %v9650_v53 = vcombine.high %v1427_v43, %v1431_v49  ;;  %v1291_v14 = vld [vmem:[#allocation7 + $0xb90] sm:$0xff]  ;;  %v9649_v25 = vcombine.low %v1427_v43, %v1431_v49 }
 0x33a   :  { %7894 = vmatprep.subr.bf16.mxu1 %v9554_v5  ;;  %v1295_v60 = vld [vmem:[#allocation7 + $0xbb0] sm:$0xff] }
 0x33b   :  { %v1423_v61 = vld [vmem:[#allocation7 + $0xfb0] sm:$0xff]  ;;  %v9514_v18 = vcombine.high %v1291_v14, %v1295_v60 }
 0x33c   :  { %7854 = vmatpush1.bf16.msra.mxu0 %v9425_v28  ;;  %v9642_v5 = vcombine.high %v1419_v22, %v1423_v61  ;;  %v1283_v6 = vld [vmem:[#allocation7 + $0xb50] sm:$0xff]  ;;  %v9513_v28 = vcombine.low %v1291_v14, %v1295_v60 }
 0x33d   :  { %7895 = vmatpush1.bf16.msra.mxu1 %v9553_v58  ;;  %7855 = vmatprep.subr.bf16.mxu0 %v9418_v20  ;;  %v1287_v55 = vld [vmem:[#allocation7 + $0xb70] sm:$0xff]  ;;  %v9641_v58 = vcombine.low %v1419_v22, %v1423_v61 }
 0x33e   :  { %7896 = vmatprep.subr.bf16.mxu1 %v9546_v12  ;;  %v1411_v56 = vld [vmem:[#allocation7 + $0xf50] sm:$0xff]  ;;  %v9506_v20 = vcombine.high %v1283_v6, %v1287_v55 }
 0x33f   :  { %v1415_v2 = vld [vmem:[#allocation7 + $0xf70] sm:$0xff] }
 0x340   :  { %7856 = vmatpush1.bf16.msra.mxu0 %v9417_v29  ;;  %v9634_v12 = vcombine.high %v1411_v56, %v1415_v2  ;;  %v1275_v13 = vld [vmem:[#allocation7 + $0xb10] sm:$0xff]  ;;  %v9505_v29 = vcombine.low %v1283_v6, %v1287_v55 }
 0x341   :  { %7897 = vmatpush1.bf16.msra.mxu1 %v9545_v23  ;;  %7857 = vmatprep.subr.bf16.mxu0 %v9410_v51  ;;  %v1279_v16 = vld [vmem:[#allocation7 + $0xb30] sm:$0xff]  ;;  %v9633_v23 = vcombine.low %v1411_v56, %v1415_v2 }
 0x342   :  { %7898 = vmatprep.subr.bf16.mxu1 %v9538_v31  ;;  %v1403_v17 = vld [vmem:[#allocation7 + $0xf10] sm:$0xff]  ;;  %v9498_v51 = vcombine.high %v1275_v13, %v1279_v16 }
 0x343   :  { %v1407_v1 = vld [vmem:[#allocation7 + $0xf30] sm:$0xff] }
 0x344   :  { %7858 = vmatpush1.bf16.msra.mxu0 %v9409_v36  ;;  %v9626_v31 = vcombine.high %v1403_v17, %v1407_v1  ;;  %v1267_v32 = vld [vmem:[#allocation7 + $0xad0] sm:$0xff]  ;;  %v9497_v36 = vcombine.low %v1275_v13, %v1279_v16 }
 0x345   :  { %7899 = vmatpush1.bf16.msra.mxu1 %v9537_v24  ;;  %7859 = vmatprep.subr.bf16.mxu0 %v9402_v38  ;;  %v1271_v34 = vld [vmem:[#allocation7 + $0xaf0] sm:$0xff]  ;;  %v9625_v24 = vcombine.low %v1403_v17, %v1407_v1 }
 0x346   :  { %7900 = vmatprep.subr.bf16.mxu1 %v9530_v39  ;;  %v1395_v35 = vld [vmem:[#allocation7 + $0xed0] sm:$0xff]  ;;  %v9490_v38 = vcombine.high %v1267_v32, %v1271_v34 }
 0x347   :  { %v1399_v21 = vld [vmem:[#allocation7 + $0xef0] sm:$0xff] }
 0x348   :  { %7860 = vmatpush1.bf16.msra.mxu0 %v9401_v50  ;;  %v9618_v39 = vcombine.high %v1395_v35, %v1399_v21  ;;  %v1259_v15 = vld [vmem:[#allocation7 + $0xa90] sm:$0xff]  ;;  %v9489_v50 = vcombine.low %v1267_v32, %v1271_v34 }
 0x349   :  { %7901 = vmatpush1.bf16.msra.mxu1 %v9529_v52  ;;  %7861 = vmatprep.subr.bf16.mxu0 %v9522_v10  ;;  %v1263_v40 = vld [vmem:[#allocation7 + $0xab0] sm:$0xff]  ;;  %v9617_v52 = vcombine.low %v1395_v35, %v1399_v21 }
 0x34a   :  { %7902 = vmatprep.subr.bf16.mxu1 %v9650_v53  ;;  %v1387_v43 = vld [vmem:[#allocation7 + $0xe90] sm:$0xff]  ;;  %v9482_v10 = vcombine.high %v1259_v15, %v1263_v40 }
 0x34b   :  { %v1391_v49 = vld [vmem:[#allocation7 + $0xeb0] sm:$0xff] }
 0x34c   :  { %7862 = vmatpush2.bf16.msra.mxu0 %v9521_v63  ;;  %v9610_v53 = vcombine.high %v1387_v43, %v1391_v49  ;;  %v1251_v14 = vld [vmem:[#allocation7 + $0xa50] sm:$0xff]  ;;  %v9481_v63 = vcombine.low %v1259_v15, %v1263_v40 }
 0x34d   :  { %7903 = vmatpush2.bf16.msra.mxu1 %v9649_v25  ;;  %7863 = vmatprep.subr.bf16.mxu0 %v9514_v18  ;;  %v1255_v60 = vld [vmem:[#allocation7 + $0xa70] sm:$0xff]  ;;  %v9609_v25 = vcombine.low %v1387_v43, %v1391_v49 }
 0x34e   :  { %7904 = vmatprep.subr.bf16.mxu1 %v9642_v5  ;;  %v1379_v22 = vld [vmem:[#allocation7 + $0xe50] sm:$0xff]  ;;  %v9474_v18 = vcombine.high %v1251_v14, %v1255_v60 }
 0x34f   :  { %v1383_v61 = vld [vmem:[#allocation7 + $0xe70] sm:$0xff] }
 0x350   :  { %7864 = vmatpush2.bf16.msra.mxu0 %v9513_v28  ;;  %v9602_v5 = vcombine.high %v1379_v22, %v1383_v61  ;;  %v1243_v6 = vld [vmem:[#allocation7 + $0xa10] sm:$0xff]  ;;  %v9473_v28 = vcombine.low %v1251_v14, %v1255_v60 }
 0x351   :  { %7905 = vmatpush2.bf16.msra.mxu1 %v9641_v58  ;;  %7865 = vmatprep.subr.bf16.mxu0 %v9506_v20  ;;  %v1247_v55 = vld [vmem:[#allocation7 + $0xa30] sm:$0xff]  ;;  %v9601_v58 = vcombine.low %v1379_v22, %v1383_v61 }
 0x352   :  { %7906 = vmatprep.subr.bf16.mxu1 %v9634_v12  ;;  %v1371_v56 = vld [vmem:[#allocation7 + $0xe10] sm:$0xff]  ;;  %v9466_v20 = vcombine.high %v1243_v6, %v1247_v55 }
 0x353   :  { %v1375_v2 = vld [vmem:[#allocation7 + $0xe30] sm:$0xff] }
 0x354   :  { %7866 = vmatpush2.bf16.msra.mxu0 %v9505_v29  ;;  %v9594_v12 = vcombine.high %v1371_v56, %v1375_v2  ;;  %v1491_v13 = vld [vmem:[#allocation7 + $0x11d0] sm:$0xff]  ;;  %v9465_v29 = vcombine.low %v1243_v6, %v1247_v55 }
 0x355   :  { %7907 = vmatpush2.bf16.msra.mxu1 %v9633_v23  ;;  %7867 = vmatprep.subr.bf16.mxu0 %v9498_v51  ;;  %v1495_v16 = vld [vmem:[#allocation7 + $0x11f0] sm:$0xff]  ;;  %v9593_v23 = vcombine.low %v1371_v56, %v1375_v2 }
 0x356   :  { %7908 = vmatprep.subr.bf16.mxu1 %v9626_v31  ;;  %v1619_v17 = vld [vmem:[#allocation7 + $0x15d0] sm:$0xff]  ;;  %v9714_v51 = vcombine.high %v1491_v13, %v1495_v16  ;;  %v9713_v35 = vcombine.low %v1491_v13, %v1495_v16 }
 0x357   :  { %v1623_v1 = vld [vmem:[#allocation7 + $0x15f0] sm:$0xff] }
 0x358   :  { %7868 = vmatpush2.bf16.msra.mxu0 %v9497_v36  ;;  %v9842_v31 = vcombine.high %v1619_v17, %v1623_v1  ;;  %v1483_v32 = vld [vmem:[#allocation7 + $0x1190] sm:$0xff] }
 0x359   :  { %7909 = vmatpush2.bf16.msra.mxu1 %v9625_v24  ;;  %7869 = vmatprep.subr.bf16.mxu0 %v9490_v38  ;;  %v1487_v34 = vld [vmem:[#allocation7 + $0x11b0] sm:$0xff]  ;;  %v9841_v24 = vcombine.low %v1619_v17, %v1623_v1 }
 0x35a   :  { %7910 = vmatprep.subr.bf16.mxu1 %v9618_v39  ;;  %v1611_v21 = vld [vmem:[#allocation7 + $0x1590] sm:$0xff]  ;;  %v9706_v38 = vcombine.high %v1483_v32, %v1487_v34 }
 0x35b   :  { %v1615_v36 = vld [vmem:[#allocation7 + $0x15b0] sm:$0xff] }
 0x35c   :  { %7870 = vmatpush2.bf16.msra.mxu0 %v9489_v50  ;;  %v1475_v39 = vld [vmem:[#allocation7 + $0x1150] sm:$0xff]  ;;  %v9834_v43 = vcombine.high %v1611_v21, %v1615_v36  ;;  %v9833_v60 = vcombine.low %v1611_v21, %v1615_v36 }
 0x35d   :  { %7911 = vmatpush2.bf16.msra.mxu1 %v9617_v52  ;;  %7871 = vmatprep.subr.bf16.mxu0 %v9482_v10  ;;  %v1479_v15 = vld [vmem:[#allocation7 + $0x1170] sm:$0xff] }
 0x35e   :  { %7912 = vmatprep.subr.bf16.mxu1 %v9610_v53  ;;  %v1603_v49 = vld [vmem:[#allocation7 + $0x1550] sm:$0xff]  ;;  %v9705_v53 = vcombine.low %v1483_v32, %v1487_v34  ;;  %v9698_v22 = vcombine.high %v1475_v39, %v1479_v15 }
 0x35f   :  { %v1607_v50 = vld [vmem:[#allocation7 + $0x1570] sm:$0xff] }
 0x360   :  { %7872 = vmatpush2.bf16.msra.mxu0 %v9481_v63  ;;  %v1595_v55 = vld [vmem:[#allocation7 + $0x1510] sm:$0xff] }
 0x361   :  { %7913 = vmatpush2.bf16.msra.mxu1 %v9609_v25  ;;  %7873 = vmatprep.subr.bf16.mxu0 %v9474_v18  ;;  %v1467_v18 = vld [vmem:[#allocation7 + $0x1110] sm:$0xff] }
 0x362   :  { %7914 = vmatprep.subr.bf16.mxu1 %v9602_v5  ;;  %v1471_v5 = vld [vmem:[#allocation7 + $0x1130] sm:$0xff] }
 0x363   :  { %v1599_v56 = vld [vmem:[#allocation7 + $0x1530] sm:$0xff]  ;;  %v9690_v13 = vcombine.high %v1467_v18, %v1471_v5 }
 0x364   :  { %7874 = vmatpush2.bf16.msra.mxu0 %v9473_v28  ;;  %v9818_v16 = vcombine.high %v1595_v55, %v1599_v56  ;;  %v1459_v17 = vld [vmem:[#allocation7 + $0x10d0] sm:$0xff] }
 0x365   :  { %7915 = vmatpush2.bf16.msra.mxu1 %v9601_v58  ;;  %7875 = vmatprep.subr.bf16.mxu0 %v9466_v20  ;;  %v9697_v58 = vcombine.low %v1475_v39, %v1479_v15  ;;  %v1463_v1 = vld [vmem:[#allocation7 + $0x10f0] sm:$0xff] }
 0x366   :  { %7916 = vmatprep.subr.bf16.mxu1 %v9594_v12  ;;  %v9825_v12 = vcombine.low %v1603_v49, %v1607_v50  ;;  %v9682_v32 = vcombine.high %v1459_v17, %v1463_v1  ;;  %v1455_v21 = vld [vmem:[#allocation7 + $0x10b0] sm:$0xff] }
 0x367   :  { %v1579_v36 = vld [vmem:[#allocation7 + $0x1490] sm:$0xff] }
 0x368   :  { %7876 = vmatpush2.bf16.msra.mxu0 %v9465_v29  ;;  %v1587_v29 = vld [vmem:[#allocation7 + $0x14d0] sm:$0xff] }
 0x369   :  { %7917 = vmatpush2.bf16.msra.mxu1 %v9593_v23  ;;  %7927 = vmatprep.subr.bf16.mxu0 %v9714_v51  ;;  %v1591_v23 = vld [vmem:[#allocation7 + $0x14f0] sm:$0xff]  ;;  %v9689_v51 = vcombine.low %v1467_v18, %v1471_v5 }
 0x36a   :  { %7968 = vmatprep.subr.bf16.mxu1 %v9842_v31  ;;  %v9817_v31 = vcombine.low %v1595_v55, %v1599_v56  ;;  %v9810_v34 = vcombine.high %v1587_v29, %v1591_v23  ;;  %v9809_v39 = vcombine.low %v1587_v29, %v1591_v23  ;;  %v1555_v56 = vld [vmem:[#allocation7 + $0x13d0] sm:$0xff] }
 0x36b   :  { %v7633_v40 = vpop.f32.mrf.mxu0  ;;  %7878 = vmatmul.mubr.bf16.vlgmr.msra.gmra.mxu0 %v10752_v62  ;;  %v1675_v29 = vld [vmem:[#allocation7 + $0x1790] sm:$0xff] }
 0x36c   :  { %v7634_v52 = vadd.f32 %v7633_v40, %v10852_v33  ;;  %v7674_v10 = vpop.f32.mrf.mxu1  ;;  %7919 = vmatmul.mubr.bf16.vlgmr.msra.gmra.mxu1 %v10750_v57  ;;  %7928 = vmatpush1.bf16.msra.mxu0 %v9713_v35  ;;  %v9826_v33 = vcombine.high %v1603_v49, %v1607_v50  ;;  %v1451_v35 = vld [vmem:[#allocation7 + $0x1090] sm:$0xff] }
 0x36d   :  { %7959 = vmatprep.mubr.bf16.mxu0 %v10754_v8  ;;  %7969 = vmatpush1.bf16.msra.mxu1 %v9841_v24  ;;  %v7635_v14 = vpop.f32.mrf.mxu0  ;;  %v1583_v24 = vld [vmem:[#allocation7 + $0x14b0] sm:$0xff]  ;;  %v9674_v15 = vcombine.high %v1451_v35, %v1455_v21 }
 0x36e   :  { %v10862_v61 = vadd.f32 %v7674_v10, %v7634_v52  ;;  %8000 = vmatprep.mubr.bf16.mxu1 %v10756_v9  ;;  %v7636_v63 = vadd.f32 %v7635_v14, %v10856_v7  ;;  %v7676_v25 = vpop.f32.mrf.mxu1  ;;  %7929 = vmatprep.subr.bf16.mxu0 %v9706_v38  ;;  %v9681_v38 = vcombine.low %v1459_v17, %v1463_v1  ;;  %v1447_v49 = vld [vmem:[#allocation7 + $0x1070] sm:$0xff] }
 0x36f   :  { %v7637_v6 = vpop.f32.mrf.mxu0  ;;  %7970 = vmatprep.subr.bf16.mxu1 %v9834_v43  ;;  %v9802_v40 = vcombine.high %v1579_v36, %v1583_v24  ;;  %v1443_v43 = vld [vmem:[#allocation7 + $0x1050] sm:$0xff]  ;;  %v9673_v10 = vcombine.low %v1451_v35, %v1455_v21 }
 0x370   :  { %v10866_v2 = vadd.f32 %v7676_v25, %v7636_v63  ;;  %v7678_v28 = vpop.f32.mrf.mxu1  ;;  %7930 = vmatpush1.bf16.msra.mxu0 %v9705_v53  ;;  %v1571_v50 = vld [vmem:[#allocation7 + $0x1450] sm:$0xff]  ;;  %v9801_v53 = vcombine.low %v1579_v36, %v1583_v24  ;;  %v9666_v14 = vcombine.high %v1443_v43, %v1447_v49  ;;  %v9665_v18 = vcombine.low %v1443_v43, %v1447_v49 }
 0x371   :  { %7971 = vmatpush1.bf16.msra.mxu1 %v9833_v60  ;;  %v7638_v20 = vpop.f32.mrf.mxu0  ;;  %7931 = vmatprep.subr.bf16.mxu0 %v9698_v22  ;;  %v1575_v52 = vld [vmem:[#allocation7 + $0x1470] sm:$0xff] }
 0x372   :  { %v7679_v7 = vpop.f32.mrf.mxu1  ;;  %7972 = vmatprep.subr.bf16.mxu1 %v9826_v33  ;;  %v9794_v60 = vcombine.high %v1571_v50, %v1575_v52  ;;  %v1435_v22 = vld [vmem:[#allocation7 + $0x1010] sm:$0xff]  ;;  %v9793_v5 = vcombine.low %v1571_v50, %v1575_v52 }
 0x373   :  { %v1439_v63 = vld [vmem:[#allocation7 + $0x1030] sm:$0xff] }
 0x374   :  { %7932 = vmatpush1.bf16.msra.mxu0 %v9697_v58  ;;  %v1563_v25 = vld [vmem:[#allocation7 + $0x1410] sm:$0xff]  ;;  %v9658_v6 = vcombine.high %v1435_v22, %v1439_v63 }
 0x375   :  { %7973 = vmatpush1.bf16.msra.mxu1 %v9825_v12  ;;  %7933 = vmatprep.subr.bf16.mxu0 %v9690_v13  ;;  %v1567_v33 = vld [vmem:[#allocation7 + $0x1430] sm:$0xff]  ;;  %v9657_v12 = vcombine.low %v1435_v22, %v1439_v63 }
 0x376   :  { %7974 = vmatprep.subr.bf16.mxu1 %v9818_v16  ;;  %v9786_v55 = vcombine.high %v1563_v25, %v1567_v33  ;;  %v1559_v28 = vld [vmem:[#allocation7 + $0x13f0] sm:$0xff]  ;;  %v9785_v13 = vcombine.low %v1563_v25, %v1567_v33 }
 0x377   :  { %v1683_v58 = vld [vmem:[#allocation7 + $0x17d0] sm:$0xff]  ;;  %v9778_v7 = vcombine.high %v1555_v56, %v1559_v28 }
 0x378   :  { %7934 = vmatpush1.bf16.msra.mxu0 %v9689_v51  ;;  %v1687_v20 = vld [vmem:[#allocation7 + $0x17f0] sm:$0xff]  ;;  %v9777_v51 = vcombine.low %v1555_v56, %v1559_v28 }
 0x379   :  { %7975 = vmatpush1.bf16.msra.mxu1 %v9817_v31  ;;  %7935 = vmatprep.subr.bf16.mxu0 %v9682_v32  ;;  %v9906_v16 = vcombine.high %v1683_v58, %v1687_v20  ;;  %v1547_v17 = vld [vmem:[#allocation7 + $0x1390] sm:$0xff]  ;;  %v9905_v31 = vcombine.low %v1683_v58, %v1687_v20 }
 0x37a   :  { %7976 = vmatprep.subr.bf16.mxu1 %v9810_v34  ;;  %v1551_v1 = vld [vmem:[#allocation7 + $0x13b0] sm:$0xff] }
 0x37b   :  { %v1679_v23 = vld [vmem:[#allocation7 + $0x17b0] sm:$0xff]  ;;  %v9770_v32 = vcombine.high %v1547_v17, %v1551_v1 }
 0x37c   :  { %7936 = vmatpush1.bf16.msra.mxu0 %v9681_v38  ;;  %v9898_v34 = vcombine.high %v1675_v29, %v1679_v23  ;;  %v1539_v35 = vld [vmem:[#allocation7 + $0x1350] sm:$0xff]  ;;  %v9769_v38 = vcombine.low %v1547_v17, %v1551_v1 }
 0x37d   :  { %7977 = vmatpush1.bf16.msra.mxu1 %v9809_v39  ;;  %7937 = vmatprep.subr.bf16.mxu0 %v9674_v15  ;;  %v1543_v21 = vld [vmem:[#allocation7 + $0x1370] sm:$0xff]  ;;  %v9897_v39 = vcombine.low %v1675_v29, %v1679_v23 }
 0x37e   :  { %7978 = vmatprep.subr.bf16.mxu1 %v9802_v40  ;;  %v1667_v36 = vld [vmem:[#allocation7 + $0x1750] sm:$0xff]  ;;  %v9762_v15 = vcombine.high %v1539_v35, %v1543_v21 }
 0x37f   :  { %v1671_v24 = vld [vmem:[#allocation7 + $0x1770] sm:$0xff] }
 0x380   :  { %7938 = vmatpush1.bf16.msra.mxu0 %v9673_v10  ;;  %v9890_v40 = vcombine.high %v1667_v36, %v1671_v24  ;;  %v1531_v43 = vld [vmem:[#allocation7 + $0x1310] sm:$0xff]  ;;  %v9761_v10 = vcombine.low %v1539_v35, %v1543_v21 }
 0x381   :  { %7979 = vmatpush1.bf16.msra.mxu1 %v9801_v53  ;;  %7939 = vmatprep.subr.bf16.mxu0 %v9666_v14  ;;  %v1535_v49 = vld [vmem:[#allocation7 + $0x1330] sm:$0xff]  ;;  %v9889_v53 = vcombine.low %v1667_v36, %v1671_v24 }
 0x382   :  { %7980 = vmatprep.subr.bf16.mxu1 %v9794_v60  ;;  %v1659_v50 = vld [vmem:[#allocation7 + $0x1710] sm:$0xff]  ;;  %v9754_v14 = vcombine.high %v1531_v43, %v1535_v49 }
 0x383   :  { %v1663_v52 = vld [vmem:[#allocation7 + $0x1730] sm:$0xff] }
 0x384   :  { %7940 = vmatpush1.bf16.msra.mxu0 %v9665_v18  ;;  %v9882_v60 = vcombine.high %v1659_v50, %v1663_v52  ;;  %v1523_v22 = vld [vmem:[#allocation7 + $0x12d0] sm:$0xff]  ;;  %v9753_v18 = vcombine.low %v1531_v43, %v1535_v49 }
 0x385   :  { %7981 = vmatpush1.bf16.msra.mxu1 %v9793_v5  ;;  %7941 = vmatprep.subr.bf16.mxu0 %v9658_v6  ;;  %v1527_v63 = vld [vmem:[#allocation7 + $0x12f0] sm:$0xff]  ;;  %v9881_v5 = vcombine.low %v1659_v50, %v1663_v52 }
 0x386   :  { %7982 = vmatprep.subr.bf16.mxu1 %v9786_v55  ;;  %v1651_v25 = vld [vmem:[#allocation7 + $0x16d0] sm:$0xff]  ;;  %v9746_v6 = vcombine.high %v1523_v22, %v1527_v63 }
 0x387   :  { %v1655_v33 = vld [vmem:[#allocation7 + $0x16f0] sm:$0xff] }
 0x388   :  { %7942 = vmatpush1.bf16.msra.mxu0 %v9657_v12  ;;  %v9874_v55 = vcombine.high %v1651_v25, %v1655_v33  ;;  %v1515_v56 = vld [vmem:[#allocation7 + $0x1290] sm:$0xff]  ;;  %v9745_v12 = vcombine.low %v1523_v22, %v1527_v63 }
 0x389   :  { %7983 = vmatpush1.bf16.msra.mxu1 %v9785_v13  ;;  %7943 = vmatprep.subr.bf16.mxu0 %v9778_v7  ;;  %v1519_v28 = vld [vmem:[#allocation7 + $0x12b0] sm:$0xff]  ;;  %v9873_v13 = vcombine.low %v1651_v25, %v1655_v33 }
 0x38a   :  { %7984 = vmatprep.subr.bf16.mxu1 %v9906_v16  ;;  %v1643_v58 = vld [vmem:[#allocation7 + $0x1690] sm:$0xff]  ;;  %v9738_v7 = vcombine.high %v1515_v56, %v1519_v28 }
 0x38b   :  { %v1647_v20 = vld [vmem:[#allocation7 + $0x16b0] sm:$0xff] }
 0x38c   :  { %7944 = vmatpush2.bf16.msra.mxu0 %v9777_v51  ;;  %v9866_v16 = vcombine.high %v1643_v58, %v1647_v20  ;;  %v1507_v17 = vld [vmem:[#allocation7 + $0x1250] sm:$0xff]  ;;  %v9737_v51 = vcombine.low %v1515_v56, %v1519_v28 }
 0x38d   :  { %7985 = vmatpush2.bf16.msra.mxu1 %v9905_v31  ;;  %7945 = vmatprep.subr.bf16.mxu0 %v9770_v32  ;;  %v1511_v1 = vld [vmem:[#allocation7 + $0x1270] sm:$0xff]  ;;  %v9865_v31 = vcombine.low %v1643_v58, %v1647_v20 }
 0x38e   :  { %7986 = vmatprep.subr.bf16.mxu1 %v9898_v34  ;;  %v1635_v29 = vld [vmem:[#allocation7 + $0x1650] sm:$0xff]  ;;  %v9730_v32 = vcombine.high %v1507_v17, %v1511_v1 }
 0x38f   :  { %v1639_v23 = vld [vmem:[#allocation7 + $0x1670] sm:$0xff] }
 0x390   :  { %7946 = vmatpush2.bf16.msra.mxu0 %v9769_v38  ;;  %v9858_v34 = vcombine.high %v1635_v29, %v1639_v23  ;;  %v1499_v35 = vld [vmem:[#allocation7 + $0x1210] sm:$0xff]  ;;  %v9729_v38 = vcombine.low %v1507_v17, %v1511_v1 }
 0x391   :  { %7987 = vmatpush2.bf16.msra.mxu1 %v9897_v39  ;;  %7947 = vmatprep.subr.bf16.mxu0 %v9762_v15  ;;  %v1503_v21 = vld [vmem:[#allocation7 + $0x1230] sm:$0xff]  ;;  %v9857_v39 = vcombine.low %v1635_v29, %v1639_v23 }
 0x392   :  { %7988 = vmatprep.subr.bf16.mxu1 %v9890_v40  ;;  %v1627_v36 = vld [vmem:[#allocation7 + $0x1610] sm:$0xff]  ;;  %v9722_v15 = vcombine.high %v1499_v35, %v1503_v21 }
 0x393   :  { %v1631_v24 = vld [vmem:[#allocation7 + $0x1630] sm:$0xff] }
 0x394   :  { %7948 = vmatpush2.bf16.msra.mxu0 %v9761_v10  ;;  %v9850_v40 = vcombine.high %v1627_v36, %v1631_v24  ;;  %v1747_v43 = vld [vmem:[#allocation7 + $0x19d0] sm:$0xff]  ;;  %v9721_v10 = vcombine.low %v1499_v35, %v1503_v21 }
 0x395   :  { %7989 = vmatpush2.bf16.msra.mxu1 %v9889_v53  ;;  %7949 = vmatprep.subr.bf16.mxu0 %v9754_v14  ;;  %v1751_v49 = vld [vmem:[#allocation7 + $0x19f0] sm:$0xff]  ;;  %v9849_v53 = vcombine.low %v1627_v36, %v1631_v24 }
 0x396   :  { %7990 = vmatprep.subr.bf16.mxu1 %v9882_v60  ;;  %v1875_v50 = vld [vmem:[#allocation7 + $0x1dd0] sm:$0xff]  ;;  %v9970_v14 = vcombine.high %v1747_v43, %v1751_v49  ;;  %v9969_v25 = vcombine.low %v1747_v43, %v1751_v49 }
 0x397   :  { %v1879_v52 = vld [vmem:[#allocation7 + $0x1df0] sm:$0xff] }
 0x398   :  { %7950 = vmatpush2.bf16.msra.mxu0 %v9753_v18  ;;  %v10098_v60 = vcombine.high %v1875_v50, %v1879_v52  ;;  %v1739_v22 = vld [vmem:[#allocation7 + $0x1990] sm:$0xff] }
 0x399   :  { %7991 = vmatpush2.bf16.msra.mxu1 %v9881_v5  ;;  %7951 = vmatprep.subr.bf16.mxu0 %v9746_v6  ;;  %v1743_v63 = vld [vmem:[#allocation7 + $0x19b0] sm:$0xff]  ;;  %v10097_v5 = vcombine.low %v1875_v50, %v1879_v52 }
 0x39a   :  { %7992 = vmatprep.subr.bf16.mxu1 %v9874_v55  ;;  %v1867_v33 = vld [vmem:[#allocation7 + $0x1d90] sm:$0xff]  ;;  %v9962_v6 = vcombine.high %v1739_v22, %v1743_v63 }
 0x39b   :  { %v1871_v18 = vld [vmem:[#allocation7 + $0x1db0] sm:$0xff] }
 0x39c   :  { %7952 = vmatpush2.bf16.msra.mxu0 %v9745_v12  ;;  %v1731_v55 = vld [vmem:[#allocation7 + $0x1950] sm:$0xff]  ;;  %v10090_v58 = vcombine.high %v1867_v33, %v1871_v18  ;;  %v10089_v1 = vcombine.low %v1867_v33, %v1871_v18 }
 0x39d   :  { %7993 = vmatpush2.bf16.msra.mxu1 %v9873_v13  ;;  %7953 = vmatprep.subr.bf16.mxu0 %v9738_v7  ;;  %v1735_v56 = vld [vmem:[#allocation7 + $0x1970] sm:$0xff] }
 0x39e   :  { %7994 = vmatprep.subr.bf16.mxu1 %v9866_v16  ;;  %v1859_v20 = vld [vmem:[#allocation7 + $0x1d50] sm:$0xff]  ;;  %v9961_v16 = vcombine.low %v1739_v22, %v1743_v63  ;;  %v9954_v29 = vcombine.high %v1731_v55, %v1735_v56 }
 0x39f   :  { %v1863_v12 = vld [vmem:[#allocation7 + $0x1d70] sm:$0xff] }
 0x3a0   :  { %7954 = vmatpush2.bf16.msra.mxu0 %v9737_v51  ;;  %v1851_v21 = vld [vmem:[#allocation7 + $0x1d10] sm:$0xff] }
 0x3a1   :  { %7995 = vmatpush2.bf16.msra.mxu1 %v9865_v31  ;;  %7955 = vmatprep.subr.bf16.mxu0 %v9730_v32  ;;  %v1723_v32 = vld [vmem:[#allocation7 + $0x1910] sm:$0xff] }
 0x3a2   :  { %7996 = vmatprep.subr.bf16.mxu1 %v9858_v34  ;;  %v1727_v34 = vld [vmem:[#allocation7 + $0x1930] sm:$0xff] }
 0x3a3   :  { %v1855_v36 = vld [vmem:[#allocation7 + $0x1d30] sm:$0xff]  ;;  %v9946_v43 = vcombine.high %v1723_v32, %v1727_v34 }
 0x3a4   :  { %7956 = vmatpush2.bf16.msra.mxu0 %v9729_v38  ;;  %v10074_v49 = vcombine.high %v1851_v21, %v1855_v36  ;;  %v1715_v50 = vld [vmem:[#allocation7 + $0x18d0] sm:$0xff] }
 0x3a5   :  { %7997 = vmatpush2.bf16.msra.mxu1 %v9857_v39  ;;  %7957 = vmatprep.subr.bf16.mxu0 %v9722_v15  ;;  %v9953_v39 = vcombine.low %v1731_v55, %v1735_v56  ;;  %v1719_v52 = vld [vmem:[#allocation7 + $0x18f0] sm:$0xff] }
 0x3a6   :  { %7998 = vmatprep.subr.bf16.mxu1 %v9850_v40  ;;  %v10081_v40 = vcombine.low %v1859_v20, %v1863_v12  ;;  %v9938_v22 = vcombine.high %v1715_v50, %v1719_v52  ;;  %v1711_v33 = vld [vmem:[#allocation7 + $0x18b0] sm:$0xff] }
 0x3a7   :  { %v1835_v18 = vld [vmem:[#allocation7 + $0x1c90] sm:$0xff] }
 0x3a8   :  { %7958 = vmatpush2.bf16.msra.mxu0 %v9721_v10  ;;  %v1843_v10 = vld [vmem:[#allocation7 + $0x1cd0] sm:$0xff] }
 0x3a9   :  { %7999 = vmatpush2.bf16.msra.mxu1 %v9849_v53  ;;  %8009 = vmatprep.subr.bf16.mxu0 %v9970_v14  ;;  %v1847_v53 = vld [vmem:[#allocation7 + $0x1cf0] sm:$0xff]  ;;  %v9945_v14 = vcombine.low %v1723_v32, %v1727_v34 }
 0x3aa   :  { %8050 = vmatprep.subr.bf16.mxu1 %v10098_v60  ;;  %v10073_v60 = vcombine.low %v1851_v21, %v1855_v36  ;;  %v10066_v63 = vcombine.high %v1843_v10, %v1847_v53  ;;  %v10065_v55 = vcombine.low %v1843_v10, %v1847_v53  ;;  %v1811_v36 = vld [vmem:[#allocation7 + $0x1bd0] sm:$0xff] }
 0x3ab   :  { %v7715_v28 = vpop.f32.mrf.mxu0  ;;  %7960 = vmatmul.mubr.bf16.vlgmr.msra.gmra.mxu0 %v10776_v19  ;;  %v1931_v10 = vld [vmem:[#allocation7 + $0x1f90] sm:$0xff] }
 0x3ac   :  { %v7716_v13 = vadd.f32 %v7715_v28, %v10862_v61  ;;  %v7756_v7 = vpop.f32.mrf.mxu1  ;;  %8001 = vmatmul.mubr.bf16.vlgmr.msra.gmra.mxu1 %v10778_v26  ;;  %8010 = vmatpush1.bf16.msra.mxu0 %v9969_v25  ;;  %v10082_v61 = vcombine.high %v1859_v20, %v1863_v12  ;;  %v1707_v25 = vld [vmem:[#allocation7 + $0x1890] sm:$0xff] }
 0x3ad   :  { %8041 = vmatprep.mubr.bf16.mxu0 %v10780_v30  ;;  %8051 = vmatpush1.bf16.msra.mxu1 %v10097_v5  ;;  %v7717_v17 = vpop.f32.mrf.mxu0  ;;  %v1839_v5 = vld [vmem:[#allocation7 + $0x1cb0] sm:$0xff]  ;;  %v9930_v56 = vcombine.high %v1707_v25, %v1711_v33 }
 0x3ae   :  { %v10872_v23 = vadd.f32 %v7756_v7, %v7716_v13  ;;  %8082 = vmatprep.mubr.bf16.mxu1 %v10782_v0  ;;  %v7718_v51 = vadd.f32 %v7717_v17, %v10866_v2  ;;  %v7758_v31 = vpop.f32.mrf.mxu1  ;;  %8011 = vmatprep.subr.bf16.mxu0 %v9962_v6  ;;  %v9937_v6 = vcombine.low %v1715_v50, %v1719_v52  ;;  %v1703_v20 = vld [vmem:[#allocation7 + $0x1870] sm:$0xff] }
 0x3af   :  { %v7719_v35 = vpop.f32.mrf.mxu0  ;;  %8052 = vmatprep.subr.bf16.mxu1 %v10090_v58  ;;  %v10058_v28 = vcombine.high %v1835_v18, %v1839_v5  ;;  %v1699_v58 = vld [vmem:[#allocation7 + $0x1850] sm:$0xff]  ;;  %v9929_v7 = vcombine.low %v1707_v25, %v1711_v33 }
 0x3b0   :  { %v10876_v24 = vadd.f32 %v7758_v31, %v7718_v51  ;;  %v7760_v38 = vpop.f32.mrf.mxu1  ;;  %8012 = vmatpush1.bf16.msra.mxu0 %v9961_v16  ;;  %v1827_v12 = vld [vmem:[#allocation7 + $0x1c50] sm:$0xff]  ;;  %v10057_v16 = vcombine.low %v1835_v18, %v1839_v5  ;;  %v9922_v17 = vcombine.high %v1699_v58, %v1703_v20  ;;  %v9921_v32 = vcombine.low %v1699_v58, %v1703_v20 }
 0x3b1   :  { %8053 = vmatpush1.bf16.msra.mxu1 %v10089_v1  ;;  %v7720_v15 = vpop.f32.mrf.mxu0  ;;  %8013 = vmatprep.subr.bf16.mxu0 %v9954_v29  ;;  %v1831_v13 = vld [vmem:[#allocation7 + $0x1c70] sm:$0xff] }
 0x3b2   :  { %v7761_v2 = vpop.f32.mrf.mxu1  ;;  %8054 = vmatprep.subr.bf16.mxu1 %v10082_v61  ;;  %v10050_v1 = vcombine.high %v1827_v12, %v1831_v13  ;;  %v1691_v29 = vld [vmem:[#allocation7 + $0x1810] sm:$0xff]  ;;  %v10049_v34 = vcombine.low %v1827_v12, %v1831_v13 }
 0x3b3   :  { %v1695_v51 = vld [vmem:[#allocation7 + $0x1830] sm:$0xff] }
 0x3b4   :  { %8014 = vmatpush1.bf16.msra.mxu0 %v9953_v39  ;;  %v1819_v31 = vld [vmem:[#allocation7 + $0x1c10] sm:$0xff]  ;;  %v9914_v35 = vcombine.high %v1691_v29, %v1695_v51 }
 0x3b5   :  { %8055 = vmatpush1.bf16.msra.mxu1 %v10081_v40  ;;  %8015 = vmatprep.subr.bf16.mxu0 %v9946_v43  ;;  %v1823_v61 = vld [vmem:[#allocation7 + $0x1c30] sm:$0xff]  ;;  %v9913_v40 = vcombine.low %v1691_v29, %v1695_v51 }
 0x3b6   :  { %8056 = vmatprep.subr.bf16.mxu1 %v10074_v49  ;;  %v10042_v21 = vcombine.high %v1819_v31, %v1823_v61  ;;  %v1815_v38 = vld [vmem:[#allocation7 + $0x1bf0] sm:$0xff]  ;;  %v10041_v43 = vcombine.low %v1819_v31, %v1823_v61 }
 0x3b7   :  { %v1939_v39 = vld [vmem:[#allocation7 + $0x1fd0] sm:$0xff]  ;;  %v10034_v2 = vcombine.high %v1811_v36, %v1815_v38 }
 0x3b8   :  { %8016 = vmatpush1.bf16.msra.mxu0 %v9945_v14  ;;  %v1943_v15 = vld [vmem:[#allocation7 + $0x1ff0] sm:$0xff]  ;;  %v10033_v14 = vcombine.low %v1811_v36, %v1815_v38 }
 0x3b9   :  { %8057 = vmatpush1.bf16.msra.mxu1 %v10073_v60  ;;  %8017 = vmatprep.subr.bf16.mxu0 %v9938_v22  ;;  %v10162_v49 = vcombine.high %v1939_v39, %v1943_v15  ;;  %v1803_v50 = vld [vmem:[#allocation7 + $0x1b90] sm:$0xff]  ;;  %v10161_v60 = vcombine.low %v1939_v39, %v1943_v15 }
 0x3ba   :  { %8058 = vmatprep.subr.bf16.mxu1 %v10066_v63  ;;  %v1807_v52 = vld [vmem:[#allocation7 + $0x1bb0] sm:$0xff] }
 0x3bb   :  { %v1935_v53 = vld [vmem:[#allocation7 + $0x1fb0] sm:$0xff]  ;;  %v10026_v22 = vcombine.high %v1803_v50, %v1807_v52 }
 0x3bc   :  { %8018 = vmatpush1.bf16.msra.mxu0 %v9937_v6  ;;  %v10154_v63 = vcombine.high %v1931_v10, %v1935_v53  ;;  %v1795_v25 = vld [vmem:[#allocation7 + $0x1b50] sm:$0xff]  ;;  %v10025_v6 = vcombine.low %v1803_v50, %v1807_v52 }
 0x3bd   :  { %8059 = vmatpush1.bf16.msra.mxu1 %v10065_v55  ;;  %8019 = vmatprep.subr.bf16.mxu0 %v9930_v56  ;;  %v1799_v33 = vld [vmem:[#allocation7 + $0x1b70] sm:$0xff]  ;;  %v10153_v55 = vcombine.low %v1931_v10, %v1935_v53 }
 0x3be   :  { %8060 = vmatprep.subr.bf16.mxu1 %v10058_v28  ;;  %v1923_v18 = vld [vmem:[#allocation7 + $0x1f50] sm:$0xff]  ;;  %v10018_v56 = vcombine.high %v1795_v25, %v1799_v33 }
 0x3bf   :  { %v1927_v5 = vld [vmem:[#allocation7 + $0x1f70] sm:$0xff] }
 0x3c0   :  { %8020 = vmatpush1.bf16.msra.mxu0 %v9929_v7  ;;  %v10146_v28 = vcombine.high %v1923_v18, %v1927_v5  ;;  %v1787_v58 = vld [vmem:[#allocation7 + $0x1b10] sm:$0xff]  ;;  %v10017_v7 = vcombine.low %v1795_v25, %v1799_v33 }
 0x3c1   :  { %8061 = vmatpush1.bf16.msra.mxu1 %v10057_v16  ;;  %8021 = vmatprep.subr.bf16.mxu0 %v9922_v17  ;;  %v1791_v20 = vld [vmem:[#allocation7 + $0x1b30] sm:$0xff]  ;;  %v10145_v16 = vcombine.low %v1923_v18, %v1927_v5 }
 0x3c2   :  { %8062 = vmatprep.subr.bf16.mxu1 %v10050_v1  ;;  %v1915_v12 = vld [vmem:[#allocation7 + $0x1f10] sm:$0xff]  ;;  %v10010_v17 = vcombine.high %v1787_v58, %v1791_v20 }
 0x3c3   :  { %v1919_v13 = vld [vmem:[#allocation7 + $0x1f30] sm:$0xff] }
 0x3c4   :  { %8022 = vmatpush1.bf16.msra.mxu0 %v9921_v32  ;;  %v10138_v1 = vcombine.high %v1915_v12, %v1919_v13  ;;  %v1779_v29 = vld [vmem:[#allocation7 + $0x1ad0] sm:$0xff]  ;;  %v10009_v32 = vcombine.low %v1787_v58, %v1791_v20  ;;  %v980_v58 = vld [vmem:[#allocation7 + $0x1d8] sm:$0xff] }
 0x3c5   :  { %8063 = vmatpush1.bf16.msra.mxu1 %v10049_v34  ;;  %8023 = vmatprep.subr.bf16.mxu0 %v9914_v35  ;;  %v1783_v51 = vld [vmem:[#allocation7 + $0x1af0] sm:$0xff]  ;;  %v10137_v34 = vcombine.low %v1915_v12, %v1919_v13  ;;  %v984_v20 = vld [vmem:[#allocation7 + $0x1f8] sm:$0xff] }
 0x3c6   :  { %8064 = vmatprep.subr.bf16.mxu1 %v10042_v21  ;;  %v1907_v31 = vld [vmem:[#allocation7 + $0x1ed0] sm:$0xff]  ;;  %v10002_v35 = vcombine.high %v1779_v29, %v1783_v51  ;;  %v1108_v12 = vld [vmem:[#allocation7 + $0x5d8] sm:$0xff] }
 0x3c7   :  { %v1911_v61 = vld [vmem:[#allocation7 + $0x1ef0] sm:$0xff]  ;;  %v1112_v13 = vld [vmem:[#allocation7 + $0x5f8] sm:$0xff] }
 0x3c8   :  { %8024 = vmatpush1.bf16.msra.mxu0 %v9913_v40  ;;  %v10130_v21 = vcombine.high %v1907_v31, %v1911_v61  ;;  %v1771_v36 = vld [vmem:[#allocation7 + $0x1a90] sm:$0xff]  ;;  %v10001_v40 = vcombine.low %v1779_v29, %v1783_v51  ;;  %v972_v29 = vld [vmem:[#allocation7 + $0x198] sm:$0xff] }
 0x3c9   :  { %8065 = vmatpush1.bf16.msra.mxu1 %v10041_v43  ;;  %8025 = vmatprep.subr.bf16.mxu0 %v10034_v2  ;;  %v1775_v38 = vld [vmem:[#allocation7 + $0x1ab0] sm:$0xff]  ;;  %v10129_v43 = vcombine.low %v1907_v31, %v1911_v61  ;;  %v976_v51 = vld [vmem:[#allocation7 + $0x1b8] sm:$0xff]  ;;  %v10397_v31 = vld [vmem:[#allocation8] sm:$0xff] }
 0x3ca   :  { %8066 = vmatprep.subr.bf16.mxu1 %v10162_v49  ;;  %v1899_v39 = vld [vmem:[#allocation7 + $0x1e90] sm:$0xff]  ;;  %v9994_v2 = vcombine.high %v1771_v36, %v1775_v38  ;;  %v1966_v61 = vrot.slane %v10397_v31, %v10732_v4 }
 0x3cb   :  { %v1903_v15 = vld [vmem:[#allocation7 + $0x1eb0] sm:$0xff] }
 0x3cc   :  { %8026 = vmatpush2.bf16.msra.mxu0 %v10033_v14  ;;  %v10122_v49 = vcombine.high %v1899_v39, %v1903_v15  ;;  %v1763_v50 = vld [vmem:[#allocation7 + $0x1a50] sm:$0xff]  ;;  %v9993_v14 = vcombine.low %v1771_v36, %v1775_v38  ;;  %v1970_v36 = vrot.slane %v10397_v31, %v10709_v3  ;;  %v9196_v38 = vcombine.high %v972_v29, %v976_v51 }
 0x3cd   :  { %8067 = vmatpush2.bf16.msra.mxu1 %v10161_v60  ;;  %8027 = vmatprep.subr.bf16.mxu0 %v10026_v22  ;;  %v1767_v52 = vld [vmem:[#allocation7 + $0x1a70] sm:$0xff]  ;;  %v10121_v60 = vcombine.low %v1899_v39, %v1903_v15  ;;  %v964_v39 = vld [vmem:[#allocation7 + $0x158] sm:$0xff] }
 0x3ce   :  { %8068 = vmatprep.subr.bf16.mxu1 %v10154_v63  ;;  %v1891_v10 = vld [vmem:[#allocation7 + $0x1e50] sm:$0xff]  ;;  %v9986_v22 = vcombine.high %v1763_v50, %v1767_v52  ;;  %v968_v15 = vld [vmem:[#allocation7 + $0x178] sm:$0xff] }
 0x3cf   :  { %v1895_v53 = vld [vmem:[#allocation7 + $0x1e70] sm:$0xff] }
 0x3d0   :  { %8028 = vmatpush2.bf16.msra.mxu0 %v10025_v6  ;;  %v10114_v63 = vcombine.high %v1891_v10, %v1895_v53  ;;  %v1755_v25 = vld [vmem:[#allocation7 + $0x1a10] sm:$0xff]  ;;  %v9985_v6 = vcombine.low %v1763_v50, %v1767_v52  ;;  %v9195_v52 = vcombine.low %v972_v29, %v976_v51 }
 0x3d1   :  { %8069 = vmatpush2.bf16.msra.mxu1 %v10153_v55  ;;  %8029 = vmatprep.subr.bf16.mxu0 %v10018_v56  ;;  %v1759_v33 = vld [vmem:[#allocation7 + $0x1a30] sm:$0xff]  ;;  %v10113_v55 = vcombine.low %v1891_v10, %v1895_v53  ;;  %v9188_v53 = vcombine.high %v964_v39, %v968_v15 }
 0x3d2   :  { %8070 = vmatprep.subr.bf16.mxu1 %v10146_v28  ;;  %v1883_v18 = vld [vmem:[#allocation7 + $0x1e10] sm:$0xff]  ;;  %v9978_v56 = vcombine.high %v1755_v25, %v1759_v33 }
 0x3d3   :  { %v1887_v5 = vld [vmem:[#allocation7 + $0x1e30] sm:$0xff] }
 0x3d4   :  { %8030 = vmatpush2.bf16.msra.mxu0 %v10017_v7  ;;  %v10106_v28 = vcombine.high %v1883_v18, %v1887_v5  ;;  %v9977_v7 = vcombine.low %v1755_v25, %v1759_v33  ;;  %v956_v25 = vld [vmem:[#allocation7 + $0x118] sm:$0xff] }
 0x3d5   :  { %8071 = vmatpush2.bf16.msra.mxu1 %v10145_v16  ;;  %8031 = vmatprep.subr.bf16.mxu0 %v10010_v17  ;;  %v10105_v16 = vcombine.low %v1883_v18, %v1887_v5  ;;  %v9204_v17 = vcombine.high %v980_v58, %v984_v20  ;;  %v960_v33 = vld [vmem:[#allocation7 + $0x138] sm:$0xff] }
 0x3d6   :  { %8072 = vmatprep.subr.bf16.mxu1 %v10138_v1  ;;  %v9332_v1 = vcombine.high %v1108_v12, %v1112_v13  ;;  %v1084_v5 = vld [vmem:[#allocation7 + $0x518] sm:$0xff] }
 0x3d8   :  { %8032 = vmatpush2.bf16.msra.mxu0 %v10009_v32  ;;  %v9203_v32 = vcombine.low %v980_v58, %v984_v20 }
 0x3d9   :  { %8073 = vmatpush2.bf16.msra.mxu1 %v10137_v34  ;;  %8033 = vmatprep.subr.bf16.mxu0 %v10002_v35  ;;  %v1100_v34 = vld [vmem:[#allocation7 + $0x598] sm:$0xff] }
 0x3da   :  { %8074 = vmatprep.subr.bf16.mxu1 %v10130_v21  ;;  %v1104_v35 = vld [vmem:[#allocation7 + $0x5b8] sm:$0xff]  ;;  %v9331_v21 = vcombine.low %v1108_v12, %v1112_v13 }
 0x3db   :  { %v9323_v3 = vcombine.low %v1100_v34, %v1104_v35  ;;  %v948_v13 = vld [vmem:[#allocation7 + $0xd8] sm:$0xff] }
 0x3dc   :  { %8034 = vmatpush2.bf16.msra.mxu0 %v10001_v40 }
 0x3dd   :  { %8075 = vmatpush2.bf16.msra.mxu1 %v10129_v43  ;;  %8035 = vmatprep.subr.bf16.mxu0 %v9994_v2  ;;  %v9324_v43 = vcombine.high %v1100_v34, %v1104_v35  ;;  %v1092_v2 = vld [vmem:[#allocation7 + $0x558] sm:$0xff] }
 0x3de   :  { %8076 = vmatprep.subr.bf16.mxu1 %v10122_v49  ;;  %v1096_v49 = vld [vmem:[#allocation7 + $0x578] sm:$0xff] }
 0x3df   :  { %v9315_v58 = vcombine.low %v1092_v2, %v1096_v49  ;;  %v1068_v34 = vld [vmem:[#allocation7 + $0x498] sm:$0xff] }
 0x3e0   :  { %8036 = vmatpush2.bf16.msra.mxu0 %v9993_v14  ;;  %v1072_v35 = vld [vmem:[#allocation7 + $0x4b8] sm:$0xff] }
 0x3e1   :  { %8077 = vmatpush2.bf16.msra.mxu1 %v10121_v60  ;;  %8037 = vmatprep.subr.bf16.mxu0 %v9986_v22 }
 0x3e2   :  { %8078 = vmatprep.subr.bf16.mxu1 %v10114_v63  ;;  %v9316_v63 = vcombine.high %v1092_v2, %v1096_v49  ;;  %v1064_v2 = vld [vmem:[#allocation7 + $0x478] sm:$0xff] }
 0x3e4   :  { %8038 = vmatpush2.bf16.msra.mxu0 %v9985_v6  ;;  %v1088_v6 = vld [vmem:[#allocation7 + $0x538] sm:$0xff] }
 0x3e5   :  { %8079 = vmatpush2.bf16.msra.mxu1 %v10113_v55  ;;  %8039 = vmatprep.subr.bf16.mxu0 %v9978_v56  ;;  %v9187_v56 = vcombine.low %v964_v39, %v968_v15  ;;  %v9308_v12 = vcombine.high %v1084_v5, %v1088_v6  ;;  %v9307_v29 = vcombine.low %v1084_v5, %v1088_v6  ;;  %v932_v15 = vld [vmem:[#allocation7 + $0x58] sm:$0xff] }
 0x3e6   :  { %8080 = vmatprep.subr.bf16.mxu1 %v10106_v28  ;;  %v9292_v39 = vcombine.high %v1068_v34, %v1072_v35  ;;  %v1048_v5 = vld [vmem:[#allocation7 + $0x3f8] sm:$0xff] }
 0x3e7   :  { %v1172_v6 = vld [vmem:[#allocation7 + $0x7d8] sm:$0xff] }
 0x3e8   :  { %8040 = vmatpush2.bf16.msra.mxu0 %v9977_v7  ;;  %v952_v7 = vld [vmem:[#allocation7 + $0xf8] sm:$0xff] }
 0x3e9   :  { %8081 = vmatpush2.bf16.msra.mxu1 %v10105_v16  ;;  %8091 = vmatprep.subr.bf16.mxu0 %v9204_v17  ;;  %v1076_v16 = vld [vmem:[#allocation7 + $0x4d8] sm:$0xff]  ;;  %v9172_v51 = vcombine.high %v948_v13, %v952_v7 }
 0x3ea   :  { %8132 = vmatprep.subr.bf16.mxu1 %v9332_v1  ;;  %v1080_v17 = vld [vmem:[#allocation7 + $0x4f8] sm:$0xff]  ;;  %v9179_v1 = vcombine.low %v956_v25, %v960_v33 }
 0x3eb   :  { %v7797_v40 = vpop.f32.mrf.mxu0  ;;  %8042 = vmatmul.mubr.bf16.vlgmr.msra.gmra.mxu0 %v10795_v11  ;;  %v9300_v31 = vcombine.high %v1076_v16, %v1080_v17 }
 0x3ec   :  { %v7798_v50 = vadd.f32 %v7797_v40, %v1966_v61  ;;  %v7838_v4 = vpop.f32.mrf.mxu1  ;;  %8083 = vmatmul.mubr.bf16.vlgmr.msra.gmra.mxu1 %v10797_v44  ;;  %8092 = vmatpush1.bf16.msra.mxu0 %v9203_v32  ;;  %v940_v61 = vld [vmem:[#allocation7 + $0x98] sm:$0xff] }
 0x3ed   :  { %8123 = vmatprep.mubr.bf16.mxu0 %v10692_v46  ;;  %8133 = vmatpush1.bf16.msra.mxu1 %v9331_v21  ;;  %v7799_v10 = vpop.f32.mrf.mxu0  ;;  %v944_v32 = vld [vmem:[#allocation7 + $0xb8] sm:$0xff]  ;;  %v9171_v21 = vcombine.low %v948_v13, %v952_v7 }
 0x3ee   :  { %v10883_v14 = vadd.f32 %v7838_v4, %v7798_v50  ;;  %8164 = vmatprep.mubr.bf16.mxu1 %v10694_v47  ;;  %v7800_v60 = vadd.f32 %v7799_v10, %v1970_v36  ;;  %v7840_v22 = vpop.f32.mrf.mxu1  ;;  %8093 = vmatprep.subr.bf16.mxu0 %v9196_v38  ;;  %v9180_v47 = vcombine.high %v956_v25, %v960_v33  ;;  %v936_v40 = vld [vmem:[#allocation7 + $0x78] sm:$0xff] }
 0x3ef   :  { %v7801_v18 = vpop.f32.mrf.mxu0  ;;  %8134 = vmatprep.subr.bf16.mxu1 %v9324_v43  ;;  %v9299_v36 = vcombine.low %v1076_v16, %v1080_v17  ;;  %v9164_v38 = vcombine.high %v940_v61, %v944_v32  ;;  %v1060_v43 = vld [vmem:[#allocation7 + $0x458] sm:$0xff]  ;;  %v9163_v49 = vcombine.low %v940_v61, %v944_v32  ;;  %v9291_v50 = vcombine.low %v1068_v34, %v1072_v35 }
 0x3f0   :  { %v10886_v55 = vadd.f32 %v7840_v22, %v7800_v60  ;;  %v7842_v46 = vpop.f32.mrf.mxu1  ;;  %8094 = vmatpush1.bf16.msra.mxu0 %v9195_v52  ;;  %v9156_v4 = vcombine.high %v932_v15, %v936_v40  ;;  %v9284_v52 = vcombine.high %v1060_v43, %v1064_v2  ;;  %v924_v10 = vld [vmem:[#allocation7 + $0x18] sm:$0xff]  ;;  %v9155_v22 = vcombine.low %v932_v15, %v936_v40 }
 0x3f1   :  { %8135 = vmatpush1.bf16.msra.mxu1 %v9323_v3  ;;  %v7802_v28 = vpop.f32.mrf.mxu0  ;;  %8095 = vmatprep.subr.bf16.mxu0 %v9188_v53  ;;  %v928_v3 = vld [vmem:[#allocation7 + $0x38] sm:$0xff] }
 0x3f2   :  { %v7843_v20 = vpop.f32.mrf.mxu1  ;;  %8136 = vmatprep.subr.bf16.mxu1 %v9316_v63  ;;  %v1052_v53 = vld [vmem:[#allocation7 + $0x418] sm:$0xff]  ;;  %v9283_v63 = vcombine.low %v1060_v43, %v1064_v2  ;;  %v9148_v25 = vcombine.high %v924_v10, %v928_v3 }
 0x3f3   :  { %v1056_v60 = vld [vmem:[#allocation7 + $0x438] sm:$0xff] }
 0x3f4   :  { %8096 = vmatpush1.bf16.msra.mxu0 %v9187_v56  ;;  %v9276_v33 = vcombine.high %v1052_v53, %v1056_v60  ;;  %v1044_v18 = vld [vmem:[#allocation7 + $0x3d8] sm:$0xff]  ;;  %v9147_v56 = vcombine.low %v924_v10, %v928_v3  ;;  %v9275_v28 = vcombine.low %v1052_v53, %v1056_v60 }
 0x3f5   :  { %8137 = vmatpush1.bf16.msra.mxu1 %v9315_v58  ;;  %8097 = vmatprep.subr.bf16.mxu0 %v9180_v47  ;;  %v1176_v46 = vld [vmem:[#allocation7 + $0x7f8] sm:$0xff]  ;;  %v9268_v58 = vcombine.high %v1044_v18, %v1048_v5  ;;  %v9267_v16 = vcombine.low %v1044_v18, %v1048_v5 }
 0x3f6   :  { %8138 = vmatprep.subr.bf16.mxu1 %v9308_v12  ;;  %v9396_v47 = vcombine.high %v1172_v6, %v1176_v46  ;;  %v1036_v20 = vld [vmem:[#allocation7 + $0x398] sm:$0xff]  ;;  %v9395_v17 = vcombine.low %v1172_v6, %v1176_v46 }
 0x3f7   :  { %v1040_v12 = vld [vmem:[#allocation7 + $0x3b8] sm:$0xff] }
 0x3f8   :  { %8098 = vmatpush1.bf16.msra.mxu0 %v9179_v1  ;;  %v1164_v13 = vld [vmem:[#allocation7 + $0x798] sm:$0xff]  ;;  %v9260_v1 = vcombine.high %v1036_v20, %v1040_v12  ;;  %v9259_v34 = vcombine.low %v1036_v20, %v1040_v12 }
 0x3f9   :  { %8139 = vmatpush1.bf16.msra.mxu1 %v9307_v29  ;;  %8099 = vmatprep.subr.bf16.mxu0 %v9172_v51  ;;  %v1168_v7 = vld [vmem:[#allocation7 + $0x7b8] sm:$0xff] }
 0x3fa   :  { %8140 = vmatprep.subr.bf16.mxu1 %v9300_v31  ;;  %v9388_v29 = vcombine.high %v1164_v13, %v1168_v7  ;;  %v1028_v51 = vld [vmem:[#allocation7 + $0x358] sm:$0xff]  ;;  %v9387_v35 = vcombine.low %v1164_v13, %v1168_v7 }
 0x3fb   :  { %v1032_v31 = vld [vmem:[#allocation7 + $0x378] sm:$0xff] }
 0x3fc   :  { %8100 = vmatpush1.bf16.msra.mxu0 %v9171_v21  ;;  %v1156_v61 = vld [vmem:[#allocation7 + $0x758] sm:$0xff]  ;;  %v9252_v21 = vcombine.high %v1028_v51, %v1032_v31  ;;  %v9251_v43 = vcombine.low %v1028_v51, %v1032_v31 }
 0x3fd   :  { %8141 = vmatpush1.bf16.msra.mxu1 %v9299_v36  ;;  %8101 = vmatprep.subr.bf16.mxu0 %v9164_v38  ;;  %v1160_v32 = vld [vmem:[#allocation7 + $0x778] sm:$0xff] }
 0x3fe   :  { %8142 = vmatprep.subr.bf16.mxu1 %v9292_v39  ;;  %v9380_v36 = vcombine.high %v1156_v61, %v1160_v32  ;;  %v1020_v38 = vld [vmem:[#allocation7 + $0x318] sm:$0xff]  ;;  %v9379_v2 = vcombine.low %v1156_v61, %v1160_v32 }
 0x3ff   :  { %v1024_v39 = vld [vmem:[#allocation7 + $0x338] sm:$0xff] }
 0x400   :  { %8102 = vmatpush1.bf16.msra.mxu0 %v9163_v49  ;;  %v1148_v15 = vld [vmem:[#allocation7 + $0x718] sm:$0xff]  ;;  %v9244_v49 = vcombine.high %v1020_v38, %v1024_v39  ;;  %v9243_v53 = vcombine.low %v1020_v38, %v1024_v39 }
 0x401   :  { %8143 = vmatpush1.bf16.msra.mxu1 %v9291_v50  ;;  %8103 = vmatprep.subr.bf16.mxu0 %v9156_v4  ;;  %v1152_v40 = vld [vmem:[#allocation7 + $0x738] sm:$0xff] }
 0x402   :  { %8144 = vmatprep.subr.bf16.mxu1 %v9284_v52  ;;  %v9372_v50 = vcombine.high %v1148_v15, %v1152_v40  ;;  %v1012_v4 = vld [vmem:[#allocation7 + $0x2d8] sm:$0xff]  ;;  %v9371_v60 = vcombine.low %v1148_v15, %v1152_v40 }
 0x403   :  { %v1016_v52 = vld [vmem:[#allocation7 + $0x2f8] sm:$0xff] }
 0x404   :  { %8104 = vmatpush1.bf16.msra.mxu0 %v9155_v22  ;;  %v1140_v10 = vld [vmem:[#allocation7 + $0x6d8] sm:$0xff]  ;;  %v9236_v22 = vcombine.high %v1012_v4, %v1016_v52  ;;  %v9235_v6 = vcombine.low %v1012_v4, %v1016_v52 }
 0x405   :  { %8145 = vmatpush1.bf16.msra.mxu1 %v9283_v63  ;;  %8105 = vmatprep.subr.bf16.mxu0 %v9148_v25  ;;  %v1144_v3 = vld [vmem:[#allocation7 + $0x6f8] sm:$0xff] }
 0x406   :  { %8146 = vmatprep.subr.bf16.mxu1 %v9276_v33  ;;  %v9364_v63 = vcombine.high %v1140_v10, %v1144_v3  ;;  %v1004_v25 = vld [vmem:[#allocation7 + $0x298] sm:$0xff]  ;;  %v9363_v46 = vcombine.low %v1140_v10, %v1144_v3 }
 0x407   :  { %v1008_v33 = vld [vmem:[#allocation7 + $0x2b8] sm:$0xff] }
 0x408   :  { %8106 = vmatpush1.bf16.msra.mxu0 %v9147_v56  ;;  %v1132_v18 = vld [vmem:[#allocation7 + $0x698] sm:$0xff]  ;;  %v9228_v56 = vcombine.high %v1004_v25, %v1008_v33  ;;  %v9227_v13 = vcombine.low %v1004_v25, %v1008_v33 }
 0x409   :  { %8147 = vmatpush1.bf16.msra.mxu1 %v9275_v28  ;;  %8107 = vmatprep.subr.bf16.mxu0 %v9268_v58  ;;  %v1136_v5 = vld [vmem:[#allocation7 + $0x6b8] sm:$0xff] }
 0x40a   :  { %8148 = vmatprep.subr.bf16.mxu1 %v9396_v47  ;;  %v9356_v28 = vcombine.high %v1132_v18, %v1136_v5  ;;  %v996_v58 = vld [vmem:[#allocation7 + $0x258] sm:$0xff]  ;;  %v9355_v7 = vcombine.low %v1132_v18, %v1136_v5 }
 0x40b   :  { %v1000_v47 = vld [vmem:[#allocation7 + $0x278] sm:$0xff] }
 0x40c   :  { %8108 = vmatpush2.bf16.msra.mxu0 %v9267_v16  ;;  %v1124_v20 = vld [vmem:[#allocation7 + $0x658] sm:$0xff]  ;;  %v9220_v16 = vcombine.high %v996_v58, %v1000_v47  ;;  %v9219_v61 = vcombine.low %v996_v58, %v1000_v47 }
 0x40d   :  { %8149 = vmatpush2.bf16.msra.mxu1 %v9395_v17  ;;  %8109 = vmatprep.subr.bf16.mxu0 %v9260_v1  ;;  %v1128_v12 = vld [vmem:[#allocation7 + $0x678] sm:$0xff] }
 0x40e   :  { %8150 = vmatprep.subr.bf16.mxu1 %v9388_v29  ;;  %v9348_v17 = vcombine.high %v1124_v20, %v1128_v12  ;;  %v988_v1 = vld [vmem:[#allocation7 + $0x218] sm:$0xff]  ;;  %v9347_v32 = vcombine.low %v1124_v20, %v1128_v12 }
 0x40f   :  { %v992_v29 = vld [vmem:[#allocation7 + $0x238] sm:$0xff] }
 0x410   :  { %8110 = vmatpush2.bf16.msra.mxu0 %v9259_v34  ;;  %v1116_v51 = vld [vmem:[#allocation7 + $0x618] sm:$0xff]  ;;  %v9212_v34 = vcombine.high %v988_v1, %v992_v29  ;;  %v9211_v15 = vcombine.low %v988_v1, %v992_v29 }
 0x411   :  { %8151 = vmatpush2.bf16.msra.mxu1 %v9387_v35  ;;  %8111 = vmatprep.subr.bf16.mxu0 %v9252_v21  ;;  %v1120_v31 = vld [vmem:[#allocation7 + $0x638] sm:$0xff] }
 0x412   :  { %8152 = vmatprep.subr.bf16.mxu1 %v9380_v36  ;;  %v9340_v35 = vcombine.high %v1116_v51, %v1120_v31  ;;  %v1236_v21 = vld [vmem:[#allocation7 + $0x9d8] sm:$0xff]  ;;  %v9339_v40 = vcombine.low %v1116_v51, %v1120_v31 }
 0x413   :  { %v1240_v36 = vld [vmem:[#allocation7 + $0x9f8] sm:$0xff] }
 0x414   :  { %8112 = vmatpush2.bf16.msra.mxu0 %v9251_v43  ;;  %v1364_v38 = vld [vmem:[#allocation7 + $0xdd8] sm:$0xff]  ;;  %v9460_v43 = vcombine.high %v1236_v21, %v1240_v36  ;;  %v9459_v4 = vcombine.low %v1236_v21, %v1240_v36 }
 0x415   :  { %8153 = vmatpush2.bf16.msra.mxu1 %v9379_v2  ;;  %8113 = vmatprep.subr.bf16.mxu0 %v9244_v49  ;;  %v1368_v39 = vld [vmem:[#allocation7 + $0xdf8] sm:$0xff] }
 0x416   :  { %8154 = vmatprep.subr.bf16.mxu1 %v9372_v50  ;;  %v9588_v2 = vcombine.high %v1364_v38, %v1368_v39  ;;  %v1228_v49 = vld [vmem:[#allocation7 + $0x998] sm:$0xff]  ;;  %v9587_v3 = vcombine.low %v1364_v38, %v1368_v39 }
 0x417   :  { %v1232_v50 = vld [vmem:[#allocation7 + $0x9b8] sm:$0xff] }
 0x418   :  { %8114 = vmatpush2.bf16.msra.mxu0 %v9243_v53  ;;  %v1356_v52 = vld [vmem:[#allocation7 + $0xd98] sm:$0xff]  ;;  %v9452_v53 = vcombine.high %v1228_v49, %v1232_v50 }
 0x419   :  { %8155 = vmatpush2.bf16.msra.mxu1 %v9371_v60  ;;  %8115 = vmatprep.subr.bf16.mxu0 %v9236_v22  ;;  %v1360_v10 = vld [vmem:[#allocation7 + $0xdb8] sm:$0xff] }
 0x41a   :  { %8156 = vmatprep.subr.bf16.mxu1 %v9364_v63  ;;  %v1220_v60 = vld [vmem:[#allocation7 + $0x958] sm:$0xff]  ;;  %v9580_v25 = vcombine.high %v1356_v52, %v1360_v10 }
 0x41b   :  { %v1224_v22 = vld [vmem:[#allocation7 + $0x978] sm:$0xff] }
 0x41c   :  { %8116 = vmatpush2.bf16.msra.mxu0 %v9235_v6  ;;  %v1348_v33 = vld [vmem:[#allocation7 + $0xd58] sm:$0xff]  ;;  %v9444_v58 = vcombine.high %v1220_v60, %v1224_v22  ;;  %v9443_v1 = vcombine.low %v1220_v60, %v1224_v22 }
 0x41d   :  { %8157 = vmatpush2.bf16.msra.mxu1 %v9363_v46  ;;  %8117 = vmatprep.subr.bf16.mxu0 %v9228_v56  ;;  %v1352_v18 = vld [vmem:[#allocation7 + $0xd78] sm:$0xff]  ;;  %v9451_v46 = vcombine.low %v1228_v49, %v1232_v50 }
 0x41e   :  { %8158 = vmatprep.subr.bf16.mxu1 %v9356_v28  ;;  %v9579_v28 = vcombine.low %v1356_v52, %v1360_v10  ;;  %v1212_v12 = vld [vmem:[#allocation7 + $0x918] sm:$0xff] }
 0x41f   :  { %v1188_v10 = vld [vmem:[#allocation7 + $0x858] sm:$0xff] }
 0x420   :  { %8118 = vmatpush2.bf16.msra.mxu0 %v9227_v13  ;;  %v1216_v13 = vld [vmem:[#allocation7 + $0x938] sm:$0xff] }
 0x421   :  { %8159 = vmatpush2.bf16.msra.mxu1 %v9355_v7  ;;  %8119 = vmatprep.subr.bf16.mxu0 %v9220_v16  ;;  %v1340_v7 = vld [vmem:[#allocation7 + $0xd18] sm:$0xff]  ;;  %v9436_v51 = vcombine.high %v1212_v12, %v1216_v13  ;;  %v9435_v21 = vcombine.low %v1212_v12, %v1216_v13 }
 0x422   :  { %8160 = vmatprep.subr.bf16.mxu1 %v9348_v17  ;;  %v1344_v16 = vld [vmem:[#allocation7 + $0xd38] sm:$0xff] }
 0x423   :  { %v9564_v31 = vcombine.high %v1340_v7, %v1344_v16  ;;  %v9563_v36 = vcombine.low %v1340_v7, %v1344_v16  ;;  %v1320_v60 = vld [vmem:[#allocation7 + $0xc78] sm:$0xff] }
 0x424   :  { %8120 = vmatpush2.bf16.msra.mxu0 %v9219_v61  ;;  %v1204_v61 = vld [vmem:[#allocation7 + $0x8d8] sm:$0xff] }
 0x425   :  { %8161 = vmatpush2.bf16.msra.mxu1 %v9347_v32  ;;  %8121 = vmatprep.subr.bf16.mxu0 %v9212_v34  ;;  %v1208_v32 = vld [vmem:[#allocation7 + $0x8f8] sm:$0xff] }
 0x426   :  { %8162 = vmatprep.subr.bf16.mxu1 %v9340_v35  ;;  %v1332_v34 = vld [vmem:[#allocation7 + $0xcd8] sm:$0xff]  ;;  %v9428_v38 = vcombine.high %v1204_v61, %v1208_v32  ;;  %v9427_v49 = vcombine.low %v1204_v61, %v1208_v32 }
 0x427   :  { %v1336_v35 = vld [vmem:[#allocation7 + $0xcf8] sm:$0xff] }
 0x428   :  { %8122 = vmatpush2.bf16.msra.mxu0 %v9211_v15  ;;  %v9556_v39 = vcombine.high %v1332_v34, %v1336_v35  ;;  %v1196_v15 = vld [vmem:[#allocation7 + $0x898] sm:$0xff]  ;;  %v9555_v50 = vcombine.low %v1332_v34, %v1336_v35 }
 0x429   :  { %8163 = vmatpush2.bf16.msra.mxu1 %v9339_v40  ;;  %8173 = vmatprep.subr.bf16.mxu0 %v9460_v43  ;;  %v1200_v40 = vld [vmem:[#allocation7 + $0x8b8] sm:$0xff] }
 0x42a   :  { %8214 = vmatprep.subr.bf16.mxu1 %v9588_v2  ;;  %v1324_v43 = vld [vmem:[#allocation7 + $0xc98] sm:$0xff]  ;;  %v9419_v22 = vcombine.low %v1196_v15, %v1200_v40 }
 0x42b   :  { %v7879_v63 = vpop.f32.mrf.mxu0  ;;  %8124 = vmatmul.mubr.bf16.vlgmr.msra.gmra.mxu0 %v10696_v48  ;;  %v1328_v2 = vld [vmem:[#allocation7 + $0xcb8] sm:$0xff] }
 0x42c   :  { %v7880_v5 = vadd.f32 %v7879_v63, %v10883_v14  ;;  %v7920_v6 = vpop.f32.mrf.mxu1  ;;  %8165 = vmatmul.mubr.bf16.vlgmr.msra.gmra.mxu1 %v10690_v45  ;;  %8174 = vmatpush1.bf16.msra.mxu0 %v9459_v4  ;;  %v9572_v14 = vcombine.high %v1348_v33, %v1352_v18  ;;  %v9420_v4 = vcombine.high %v1196_v15, %v1200_v40  ;;  %v1428_v12 = vld [vmem:[#allocation7 + $0xfd8] sm:$0xff] }
 0x42d   :  { %8205 = vmatprep.mubr.bf16.mxu0 %v10722_v37  ;;  %8215 = vmatpush1.bf16.msra.mxu1 %v9587_v3  ;;  %v7881_v56 = vpop.f32.mrf.mxu0  ;;  %v9548_v52 = vcombine.high %v1324_v43, %v1328_v2  ;;  %v1192_v3 = vld [vmem:[#allocation7 + $0x878] sm:$0xff]  ;;  %v9547_v63 = vcombine.low %v1324_v43, %v1328_v2 }
 0x42e   :  { %v10892_v47 = vadd.f32 %v7920_v6, %v7880_v5  ;;  %8246 = vmatprep.mubr.bf16.mxu1 %v10724_v42  ;;  %v7882_v48 = vadd.f32 %v7881_v56, %v10886_v55  ;;  %v7922_v20 = vpop.f32.mrf.mxu1  ;;  %8175 = vmatprep.subr.bf16.mxu0 %v9452_v53  ;;  %v9571_v42 = vcombine.low %v1348_v33, %v1352_v18  ;;  %v1316_v53 = vld [vmem:[#allocation7 + $0xc58] sm:$0xff] }
 0x42f   :  { %v7883_v45 = vpop.f32.mrf.mxu0  ;;  %8216 = vmatprep.subr.bf16.mxu1 %v9580_v25  ;;  %v9412_v25 = vcombine.high %v1188_v10, %v1192_v3  ;;  %v9540_v33 = vcombine.high %v1316_v53, %v1320_v60  ;;  %v1180_v18 = vld [vmem:[#allocation7 + $0x818] sm:$0xff]  ;;  %v9411_v56 = vcombine.low %v1188_v10, %v1192_v3 }
 0x430   :  { %v10896_v37 = vadd.f32 %v7922_v20, %v7882_v48  ;;  %v7924_v17 = vpop.f32.mrf.mxu1  ;;  %8176 = vmatpush1.bf16.msra.mxu0 %v9451_v46  ;;  %v1184_v5 = vld [vmem:[#allocation7 + $0x838] sm:$0xff] }
 0x431   :  { %8217 = vmatpush1.bf16.msra.mxu1 %v9579_v28  ;;  %v7884_v29 = vpop.f32.mrf.mxu0  ;;  %8177 = vmatprep.subr.bf16.mxu0 %v9444_v58  ;;  %v1308_v6 = vld [vmem:[#allocation7 + $0xc18] sm:$0xff]  ;;  %v9539_v28 = vcombine.low %v1316_v53, %v1320_v60  ;;  %v9404_v58 = vcombine.high %v1180_v18, %v1184_v5  ;;  %v9403_v45 = vcombine.low %v1180_v18, %v1184_v5 }
 0x432   :  { %v7925_v55 = vpop.f32.mrf.mxu1  ;;  %8218 = vmatprep.subr.bf16.mxu1 %v9572_v14  ;;  %v1312_v46 = vld [vmem:[#allocation7 + $0xc38] sm:$0xff] }
 0x433   :  { %v9532_v48 = vcombine.high %v1308_v6, %v1312_v46  ;;  %v1300_v20 = vld [vmem:[#allocation7 + $0xbd8] sm:$0xff]  ;;  %v9531_v7 = vcombine.low %v1308_v6, %v1312_v46 }
 0x434   :  { %8178 = vmatpush1.bf16.msra.mxu0 %v9443_v1  ;;  %v1304_v14 = vld [vmem:[#allocation7 + $0xbf8] sm:$0xff] }
 0x435   :  { %8219 = vmatpush1.bf16.msra.mxu1 %v9571_v42  ;;  %8179 = vmatprep.subr.bf16.mxu0 %v9436_v51  ;;  %v1432_v13 = vld [vmem:[#allocation7 + $0xff8] sm:$0xff]  ;;  %v9524_v16 = vcombine.high %v1300_v20, %v1304_v14  ;;  %v9523_v55 = vcombine.low %v1300_v20, %v1304_v14 }
 0x436   :  { %8220 = vmatprep.subr.bf16.mxu1 %v9564_v31  ;;  %v9652_v17 = vcombine.high %v1428_v12, %v1432_v13  ;;  %v1292_v1 = vld [vmem:[#allocation7 + $0xb98] sm:$0xff]  ;;  %v9651_v31 = vcombine.low %v1428_v12, %v1432_v13 }
 0x437   :  { %v1296_v29 = vld [vmem:[#allocation7 + $0xbb8] sm:$0xff] }
 0x438   :  { %8180 = vmatpush1.bf16.msra.mxu0 %v9435_v21  ;;  %v1420_v42 = vld [vmem:[#allocation7 + $0xf98] sm:$0xff]  ;;  %v9516_v61 = vcombine.high %v1292_v1, %v1296_v29 }
 0x439   :  { %8221 = vmatpush1.bf16.msra.mxu1 %v9563_v36  ;;  %8181 = vmatprep.subr.bf16.mxu0 %v9428_v38  ;;  %v1424_v51 = vld [vmem:[#allocation7 + $0xfb8] sm:$0xff]  ;;  %v9515_v38 = vcombine.low %v1292_v1, %v1296_v29 }
 0x43a   :  { %8222 = vmatprep.subr.bf16.mxu1 %v9556_v39  ;;  %v9644_v32 = vcombine.high %v1420_v42, %v1424_v51  ;;  %v1284_v34 = vld [vmem:[#allocation7 + $0xb58] sm:$0xff]  ;;  %v9643_v39 = vcombine.low %v1420_v42, %v1424_v51 }
 0x43b   :  { %v1288_v35 = vld [vmem:[#allocation7 + $0xb78] sm:$0xff] }
 0x43c   :  { %8182 = vmatpush1.bf16.msra.mxu0 %v9427_v49  ;;  %v1412_v21 = vld [vmem:[#allocation7 + $0xf58] sm:$0xff]  ;;  %v9508_v15 = vcombine.high %v1284_v34, %v1288_v35 }
 0x43d   :  { %8223 = vmatpush1.bf16.msra.mxu1 %v9555_v50  ;;  %8183 = vmatprep.subr.bf16.mxu0 %v9420_v4  ;;  %v1416_v36 = vld [vmem:[#allocation7 + $0xf78] sm:$0xff]  ;;  %v9507_v4 = vcombine.low %v1284_v34, %v1288_v35 }
 0x43e   :  { %8224 = vmatprep.subr.bf16.mxu1 %v9548_v52  ;;  %v9636_v40 = vcombine.high %v1412_v21, %v1416_v36  ;;  %v1276_v43 = vld [vmem:[#allocation7 + $0xb18] sm:$0xff]  ;;  %v9635_v52 = vcombine.low %v1412_v21, %v1416_v36 }
 0x43f   :  { %v1280_v2 = vld [vmem:[#allocation7 + $0xb38] sm:$0xff] }
 0x440   :  { %8184 = vmatpush1.bf16.msra.mxu0 %v9419_v22  ;;  %v1404_v49 = vld [vmem:[#allocation7 + $0xf18] sm:$0xff]  ;;  %v9500_v10 = vcombine.high %v1276_v43, %v1280_v2 }
 0x441   :  { %8225 = vmatpush1.bf16.msra.mxu1 %v9547_v63  ;;  %8185 = vmatprep.subr.bf16.mxu0 %v9412_v25  ;;  %v1408_v50 = vld [vmem:[#allocation7 + $0xf38] sm:$0xff]  ;;  %v9499_v25 = vcombine.low %v1276_v43, %v1280_v2 }
 0x442   :  { %8226 = vmatprep.subr.bf16.mxu1 %v9540_v33  ;;  %v9628_v3 = vcombine.high %v1404_v49, %v1408_v50  ;;  %v1268_v53 = vld [vmem:[#allocation7 + $0xad8] sm:$0xff]  ;;  %v9627_v33 = vcombine.low %v1404_v49, %v1408_v50 }
 0x443   :  { %v1272_v60 = vld [vmem:[#allocation7 + $0xaf8] sm:$0xff] }
 0x444   :  { %8186 = vmatpush1.bf16.msra.mxu0 %v9411_v56  ;;  %v1396_v22 = vld [vmem:[#allocation7 + $0xed8] sm:$0xff]  ;;  %v9492_v18 = vcombine.high %v1268_v53, %v1272_v60 }
 0x445   :  { %8227 = vmatpush1.bf16.msra.mxu1 %v9539_v28  ;;  %8187 = vmatprep.subr.bf16.mxu0 %v9404_v58  ;;  %v1400_v63 = vld [vmem:[#allocation7 + $0xef8] sm:$0xff]  ;;  %v9491_v58 = vcombine.low %v1268_v53, %v1272_v60 }
 0x446   :  { %8228 = vmatprep.subr.bf16.mxu1 %v9532_v48  ;;  %v9620_v5 = vcombine.high %v1396_v22, %v1400_v63  ;;  %v1260_v6 = vld [vmem:[#allocation7 + $0xa98] sm:$0xff]  ;;  %v9619_v48 = vcombine.low %v1396_v22, %v1400_v63 }
 0x447   :  { %v1264_v46 = vld [vmem:[#allocation7 + $0xab8] sm:$0xff] }
 0x448   :  { %8188 = vmatpush1.bf16.msra.mxu0 %v9403_v45  ;;  %v1388_v56 = vld [vmem:[#allocation7 + $0xe98] sm:$0xff]  ;;  %v9484_v20 = vcombine.high %v1260_v6, %v1264_v46 }
 0x449   :  { %8229 = vmatpush1.bf16.msra.mxu1 %v9531_v7  ;;  %8189 = vmatprep.subr.bf16.mxu0 %v9524_v16  ;;  %v1392_v28 = vld [vmem:[#allocation7 + $0xeb8] sm:$0xff]  ;;  %v9483_v16 = vcombine.low %v1260_v6, %v1264_v46 }
 0x44a   :  { %8230 = vmatprep.subr.bf16.mxu1 %v9652_v17  ;;  %v9612_v14 = vcombine.high %v1388_v56, %v1392_v28  ;;  %v1252_v12 = vld [vmem:[#allocation7 + $0xa58] sm:$0xff]  ;;  %v9611_v17 = vcombine.low %v1388_v56, %v1392_v28 }
 0x44b   :  { %v1256_v13 = vld [vmem:[#allocation7 + $0xa78] sm:$0xff] }
 0x44c   :  { %8190 = vmatpush2.bf16.msra.mxu0 %v9523_v55  ;;  %v1380_v45 = vld [vmem:[#allocation7 + $0xe58] sm:$0xff]  ;;  %v9476_v1 = vcombine.high %v1252_v12, %v1256_v13 }
 0x44d   :  { %8231 = vmatpush2.bf16.msra.mxu1 %v9651_v31  ;;  %8191 = vmatprep.subr.bf16.mxu0 %v9516_v61  ;;  %v1384_v7 = vld [vmem:[#allocation7 + $0xe78] sm:$0xff]  ;;  %v9475_v61 = vcombine.low %v1252_v12, %v1256_v13 }
 0x44e   :  { %8232 = vmatprep.subr.bf16.mxu1 %v9644_v32  ;;  %v9604_v29 = vcombine.high %v1380_v45, %v1384_v7  ;;  %v1244_v42 = vld [vmem:[#allocation7 + $0xa18] sm:$0xff]  ;;  %v9603_v32 = vcombine.low %v1380_v45, %v1384_v7 }
 0x44f   :  { %v1248_v51 = vld [vmem:[#allocation7 + $0xa38] sm:$0xff] }
 0x450   :  { %8192 = vmatpush2.bf16.msra.mxu0 %v9515_v38  ;;  %v1372_v55 = vld [vmem:[#allocation7 + $0xe18] sm:$0xff]  ;;  %v9468_v34 = vcombine.high %v1244_v42, %v1248_v51 }
 0x451   :  { %8233 = vmatpush2.bf16.msra.mxu1 %v9643_v39  ;;  %8193 = vmatprep.subr.bf16.mxu0 %v9508_v15  ;;  %v1376_v31 = vld [vmem:[#allocation7 + $0xe38] sm:$0xff]  ;;  %v9467_v15 = vcombine.low %v1244_v42, %v1248_v51 }
 0x452   :  { %8234 = vmatprep.subr.bf16.mxu1 %v9636_v40  ;;  %v9596_v35 = vcombine.high %v1372_v55, %v1376_v31  ;;  %v1492_v21 = vld [vmem:[#allocation7 + $0x11d8] sm:$0xff]  ;;  %v9595_v40 = vcombine.low %v1372_v55, %v1376_v31 }
 0x453   :  { %v1496_v36 = vld [vmem:[#allocation7 + $0x11f8] sm:$0xff] }
 0x454   :  { %8194 = vmatpush2.bf16.msra.mxu0 %v9507_v4  ;;  %v1620_v38 = vld [vmem:[#allocation7 + $0x15d8] sm:$0xff]  ;;  %v9716_v43 = vcombine.high %v1492_v21, %v1496_v36  ;;  %v9715_v4 = vcombine.low %v1492_v21, %v1496_v36 }
 0x455   :  { %8235 = vmatpush2.bf16.msra.mxu1 %v9635_v52  ;;  %8195 = vmatprep.subr.bf16.mxu0 %v9500_v10  ;;  %v1624_v39 = vld [vmem:[#allocation7 + $0x15f8] sm:$0xff] }
 0x456   :  { %8236 = vmatprep.subr.bf16.mxu1 %v9628_v3  ;;  %v9844_v2 = vcombine.high %v1620_v38, %v1624_v39  ;;  %v1484_v49 = vld [vmem:[#allocation7 + $0x1198] sm:$0xff]  ;;  %v9843_v3 = vcombine.low %v1620_v38, %v1624_v39 }
 0x457   :  { %v1488_v50 = vld [vmem:[#allocation7 + $0x11b8] sm:$0xff] }
 0x458   :  { %8196 = vmatpush2.bf16.msra.mxu0 %v9499_v25  ;;  %v1612_v52 = vld [vmem:[#allocation7 + $0x1598] sm:$0xff]  ;;  %v9708_v53 = vcombine.high %v1484_v49, %v1488_v50  ;;  %v9707_v46 = vcombine.low %v1484_v49, %v1488_v50 }
 0x459   :  { %8237 = vmatpush2.bf16.msra.mxu1 %v9627_v33  ;;  %8197 = vmatprep.subr.bf16.mxu0 %v9492_v18  ;;  %v1616_v10 = vld [vmem:[#allocation7 + $0x15b8] sm:$0xff] }
 0x45a   :  { %8238 = vmatprep.subr.bf16.mxu1 %v9620_v5  ;;  %v1476_v60 = vld [vmem:[#allocation7 + $0x1158] sm:$0xff]  ;;  %v9836_v25 = vcombine.high %v1612_v52, %v1616_v10  ;;  %v9835_v28 = vcombine.low %v1612_v52, %v1616_v10 }
 0x45b   :  { %v1480_v22 = vld [vmem:[#allocation7 + $0x1178] sm:$0xff] }
 0x45c   :  { %8198 = vmatpush2.bf16.msra.mxu0 %v9491_v58  ;;  %v1604_v33 = vld [vmem:[#allocation7 + $0x1558] sm:$0xff]  ;;  %v9700_v58 = vcombine.high %v1476_v60, %v1480_v22 }
 0x45d   :  { %8239 = vmatpush2.bf16.msra.mxu1 %v9619_v48  ;;  %8199 = vmatprep.subr.bf16.mxu0 %v9484_v20  ;;  %v1608_v18 = vld [vmem:[#allocation7 + $0x1578] sm:$0xff] }
 0x45e   :  { %8240 = vmatprep.subr.bf16.mxu1 %v9612_v14  ;;  %v1468_v14 = vld [vmem:[#allocation7 + $0x1118] sm:$0xff] }
 0x45f   :  { %v1472_v12 = vld [vmem:[#allocation7 + $0x1138] sm:$0xff] }
 0x460   :  { %8200 = vmatpush2.bf16.msra.mxu0 %v9483_v16  ;;  %v1596_v13 = vld [vmem:[#allocation7 + $0x1518] sm:$0xff]  ;;  %v9699_v16 = vcombine.low %v1476_v60, %v1480_v22 }
 0x461   :  { %8241 = vmatpush2.bf16.msra.mxu1 %v9611_v17  ;;  %8201 = vmatprep.subr.bf16.mxu0 %v9476_v1  ;;  %v1600_v45 = vld [vmem:[#allocation7 + $0x1538] sm:$0xff]  ;;  %v9692_v1 = vcombine.high %v1468_v14, %v1472_v12 }
 0x462   :  { %8242 = vmatprep.subr.bf16.mxu1 %v9604_v29  ;;  %v9820_v29 = vcombine.high %v1596_v13, %v1600_v45  ;;  %v1460_v42 = vld [vmem:[#allocation7 + $0x10d8] sm:$0xff] }
 0x463   :  { %v1464_v51 = vld [vmem:[#allocation7 + $0x10f8] sm:$0xff] }
 0x464   :  { %8202 = vmatpush2.bf16.msra.mxu0 %v9475_v61  ;;  %v1588_v55 = vld [vmem:[#allocation7 + $0x14d8] sm:$0xff]  ;;  %v9691_v61 = vcombine.low %v1468_v14, %v1472_v12 }
 0x465   :  { %8243 = vmatpush2.bf16.msra.mxu1 %v9603_v32  ;;  %8203 = vmatprep.subr.bf16.mxu0 %v9468_v34  ;;  %v1592_v31 = vld [vmem:[#allocation7 + $0x14f8] sm:$0xff]  ;;  %v9819_v32 = vcombine.low %v1596_v13, %v1600_v45  ;;  %v9684_v34 = vcombine.high %v1460_v42, %v1464_v51 }
 0x466   :  { %8244 = vmatprep.subr.bf16.mxu1 %v9596_v35  ;;  %v9812_v35 = vcombine.high %v1588_v55, %v1592_v31  ;;  %v1452_v21 = vld [vmem:[#allocation7 + $0x1098] sm:$0xff] }
 0x467   :  { %v1456_v36 = vld [vmem:[#allocation7 + $0x10b8] sm:$0xff] }
 0x468   :  { %8204 = vmatpush2.bf16.msra.mxu0 %v9467_v15  ;;  %v1580_v38 = vld [vmem:[#allocation7 + $0x1498] sm:$0xff]  ;;  %v9683_v15 = vcombine.low %v1460_v42, %v1464_v51  ;;  %v9675_v10 = vcombine.low %v1452_v21, %v1456_v36 }
 0x469   :  { %8245 = vmatpush2.bf16.msra.mxu1 %v9595_v40  ;;  %8255 = vmatprep.subr.bf16.mxu0 %v9716_v43  ;;  %v1584_v39 = vld [vmem:[#allocation7 + $0x14b8] sm:$0xff]  ;;  %v9811_v40 = vcombine.low %v1588_v55, %v1592_v31  ;;  %v9676_v43 = vcombine.high %v1452_v21, %v1456_v36 }
 0x46a   :  { %8296 = vmatprep.subr.bf16.mxu1 %v9844_v2  ;;  %v9804_v2 = vcombine.high %v1580_v38, %v1584_v39  ;;  %v1444_v49 = vld [vmem:[#allocation7 + $0x1058] sm:$0xff] }
 0x46b   :  { %v7961_v63 = vpop.f32.mrf.mxu0  ;;  %8206 = vmatmul.mubr.bf16.vlgmr.msra.gmra.mxu0 %v10752_v62  ;;  %v1448_v50 = vld [vmem:[#allocation7 + $0x1078] sm:$0xff] }
 0x46c   :  { %v7962_v5 = vadd.f32 %v7961_v63, %v10892_v47  ;;  %v8002_v6 = vpop.f32.mrf.mxu1  ;;  %8247 = vmatmul.mubr.bf16.vlgmr.msra.gmra.mxu1 %v10750_v57  ;;  %8256 = vmatpush1.bf16.msra.mxu0 %v9715_v4  ;;  %v9828_v47 = vcombine.high %v1604_v33, %v1608_v18  ;;  %v1572_v4 = vld [vmem:[#allocation7 + $0x1458] sm:$0xff] }
 0x46d   :  { %8287 = vmatprep.mubr.bf16.mxu0 %v10754_v8  ;;  %8297 = vmatpush1.bf16.msra.mxu1 %v9843_v3  ;;  %v7963_v56 = vpop.f32.mrf.mxu0  ;;  %v1576_v52 = vld [vmem:[#allocation7 + $0x1478] sm:$0xff]  ;;  %v9803_v3 = vcombine.low %v1580_v38, %v1584_v39 }
 0x46e   :  { %v10902_v48 = vadd.f32 %v8002_v6, %v7962_v5  ;;  %8328 = vmatprep.mubr.bf16.mxu1 %v10756_v9  ;;  %v7964_v62 = vadd.f32 %v7963_v56, %v10896_v37  ;;  %v8004_v20 = vpop.f32.mrf.mxu1  ;;  %8257 = vmatprep.subr.bf16.mxu0 %v9708_v53  ;;  %v9827_v9 = vcombine.low %v1604_v33, %v1608_v18  ;;  %v1436_v22 = vld [vmem:[#allocation7 + $0x1018] sm:$0xff] }
 0x46f   :  { %v7965_v57 = vpop.f32.mrf.mxu0  ;;  %8298 = vmatprep.subr.bf16.mxu1 %v9836_v25  ;;  %v9668_v53 = vcombine.high %v1444_v49, %v1448_v50  ;;  %v9796_v60 = vcombine.high %v1572_v4, %v1576_v52  ;;  %v1440_v63 = vld [vmem:[#allocation7 + $0x1038] sm:$0xff]  ;;  %v9667_v18 = vcombine.low %v1444_v49, %v1448_v50  ;;  %v9795_v5 = vcombine.low %v1572_v4, %v1576_v52 }
 0x470   :  { %v10906_v8 = vadd.f32 %v8004_v20, %v7964_v62  ;;  %v8006_v7 = vpop.f32.mrf.mxu1  ;;  %8258 = vmatpush1.bf16.msra.mxu0 %v9707_v46  ;;  %v1564_v25 = vld [vmem:[#allocation7 + $0x1418] sm:$0xff]  ;;  %v9660_v6 = vcombine.high %v1436_v22, %v1440_v63  ;;  %v9659_v20 = vcombine.low %v1436_v22, %v1440_v63 }
 0x471   :  { %8299 = vmatpush1.bf16.msra.mxu1 %v9835_v28  ;;  %v7966_v17 = vpop.f32.mrf.mxu0  ;;  %8259 = vmatprep.subr.bf16.mxu0 %v9700_v58  ;;  %v1568_v33 = vld [vmem:[#allocation7 + $0x1438] sm:$0xff] }
 0x472   :  { %v8007_v37 = vpop.f32.mrf.mxu1  ;;  %8300 = vmatprep.subr.bf16.mxu1 %v9828_v47  ;;  %v9788_v46 = vcombine.high %v1564_v25, %v1568_v33  ;;  %v1556_v56 = vld [vmem:[#allocation7 + $0x13d8] sm:$0xff]  ;;  %v9787_v47 = vcombine.low %v1564_v25, %v1568_v33 }
 0x473   :  { %v1560_v28 = vld [vmem:[#allocation7 + $0x13f8] sm:$0xff] }
 0x474   :  { %8260 = vmatpush1.bf16.msra.mxu0 %v9699_v16  ;;  %v1684_v58 = vld [vmem:[#allocation7 + $0x17d8] sm:$0xff]  ;;  %v9780_v14 = vcombine.high %v1556_v56, %v1560_v28  ;;  %v9779_v16 = vcombine.low %v1556_v56, %v1560_v28 }
 0x475   :  { %8301 = vmatpush1.bf16.msra.mxu1 %v9827_v9  ;;  %8261 = vmatprep.subr.bf16.mxu0 %v9692_v1  ;;  %v1688_v62 = vld [vmem:[#allocation7 + $0x17f8] sm:$0xff] }
 0x476   :  { %8302 = vmatprep.subr.bf16.mxu1 %v9820_v29  ;;  %v9908_v12 = vcombine.high %v1684_v58, %v1688_v62  ;;  %v1548_v57 = vld [vmem:[#allocation7 + $0x1398] sm:$0xff]  ;;  %v9907_v17 = vcombine.low %v1684_v58, %v1688_v62 }
 0x477   :  { %v1552_v13 = vld [vmem:[#allocation7 + $0x13b8] sm:$0xff] }
 0x478   :  { %8262 = vmatpush1.bf16.msra.mxu0 %v9691_v61  ;;  %v1676_v45 = vld [vmem:[#allocation7 + $0x1798] sm:$0xff]  ;;  %v9772_v9 = vcombine.high %v1548_v57, %v1552_v13  ;;  %v9771_v55 = vcombine.low %v1548_v57, %v1552_v13 }
 0x479   :  { %8303 = vmatpush1.bf16.msra.mxu1 %v9819_v32  ;;  %8263 = vmatprep.subr.bf16.mxu0 %v9684_v34  ;;  %v1680_v7 = vld [vmem:[#allocation7 + $0x17b8] sm:$0xff] }
 0x47a   :  { %8304 = vmatprep.subr.bf16.mxu1 %v9812_v35  ;;  %v9900_v1 = vcombine.high %v1676_v45, %v1680_v7  ;;  %v1540_v37 = vld [vmem:[#allocation7 + $0x1358] sm:$0xff]  ;;  %v9899_v31 = vcombine.low %v1676_v45, %v1680_v7 }
 0x47b   :  { %v1544_v29 = vld [vmem:[#allocation7 + $0x1378] sm:$0xff] }
 0x47c   :  { %8264 = vmatpush1.bf16.msra.mxu0 %v9683_v15  ;;  %v1668_v42 = vld [vmem:[#allocation7 + $0x1758] sm:$0xff]  ;;  %v9764_v61 = vcombine.high %v1540_v37, %v1544_v29  ;;  %v9763_v38 = vcombine.low %v1540_v37, %v1544_v29 }
 0x47d   :  { %8305 = vmatpush1.bf16.msra.mxu1 %v9811_v40  ;;  %8265 = vmatprep.subr.bf16.mxu0 %v9676_v43  ;;  %v1672_v51 = vld [vmem:[#allocation7 + $0x1778] sm:$0xff] }
 0x47e   :  { %8306 = vmatprep.subr.bf16.mxu1 %v9804_v2  ;;  %v9892_v32 = vcombine.high %v1668_v42, %v1672_v51  ;;  %v1532_v34 = vld [vmem:[#allocation7 + $0x1318] sm:$0xff]  ;;  %v9891_v39 = vcombine.low %v1668_v42, %v1672_v51 }
 0x47f   :  { %v1536_v35 = vld [vmem:[#allocation7 + $0x1338] sm:$0xff] }
 0x480   :  { %8266 = vmatpush1.bf16.msra.mxu0 %v9675_v10  ;;  %v1660_v21 = vld [vmem:[#allocation7 + $0x1718] sm:$0xff]  ;;  %v9756_v15 = vcombine.high %v1532_v34, %v1536_v35  ;;  %v9755_v4 = vcombine.low %v1532_v34, %v1536_v35 }
 0x481   :  { %8307 = vmatpush1.bf16.msra.mxu1 %v9803_v3  ;;  %8267 = vmatprep.subr.bf16.mxu0 %v9668_v53  ;;  %v1664_v36 = vld [vmem:[#allocation7 + $0x1738] sm:$0xff] }
 0x482   :  { %8308 = vmatprep.subr.bf16.mxu1 %v9796_v60  ;;  %v9884_v40 = vcombine.high %v1660_v21, %v1664_v36  ;;  %v1524_v43 = vld [vmem:[#allocation7 + $0x12d8] sm:$0xff]  ;;  %v9883_v52 = vcombine.low %v1660_v21, %v1664_v36 }
 0x483   :  { %v1528_v2 = vld [vmem:[#allocation7 + $0x12f8] sm:$0xff] }
 0x484   :  { %8268 = vmatpush1.bf16.msra.mxu0 %v9667_v18  ;;  %v1652_v49 = vld [vmem:[#allocation7 + $0x16d8] sm:$0xff]  ;;  %v9748_v10 = vcombine.high %v1524_v43, %v1528_v2  ;;  %v9747_v25 = vcombine.low %v1524_v43, %v1528_v2 }
 0x485   :  { %8309 = vmatpush1.bf16.msra.mxu1 %v9795_v5  ;;  %8269 = vmatprep.subr.bf16.mxu0 %v9660_v6  ;;  %v1656_v50 = vld [vmem:[#allocation7 + $0x16f8] sm:$0xff] }
 0x486   :  { %8310 = vmatprep.subr.bf16.mxu1 %v9788_v46  ;;  %v9876_v3 = vcombine.high %v1652_v49, %v1656_v50  ;;  %v1516_v53 = vld [vmem:[#allocation7 + $0x1298] sm:$0xff]  ;;  %v9875_v33 = vcombine.low %v1652_v49, %v1656_v50 }
 0x487   :  { %v1520_v60 = vld [vmem:[#allocation7 + $0x12b8] sm:$0xff] }
 0x488   :  { %8270 = vmatpush1.bf16.msra.mxu0 %v9659_v20  ;;  %v1644_v22 = vld [vmem:[#allocation7 + $0x1698] sm:$0xff]  ;;  %v9740_v18 = vcombine.high %v1516_v53, %v1520_v60  ;;  %v9739_v58 = vcombine.low %v1516_v53, %v1520_v60 }
 0x489   :  { %8311 = vmatpush1.bf16.msra.mxu1 %v9787_v47  ;;  %8271 = vmatprep.subr.bf16.mxu0 %v9780_v14  ;;  %v1648_v63 = vld [vmem:[#allocation7 + $0x16b8] sm:$0xff] }
 0x48a   :  { %8312 = vmatprep.subr.bf16.mxu1 %v9908_v12  ;;  %v9868_v5 = vcombine.high %v1644_v22, %v1648_v63  ;;  %v1508_v6 = vld [vmem:[#allocation7 + $0x1258] sm:$0xff]  ;;  %v9867_v62 = vcombine.low %v1644_v22, %v1648_v63 }
 0x48b   :  { %v1512_v46 = vld [vmem:[#allocation7 + $0x1278] sm:$0xff] }
 0x48c   :  { %8272 = vmatpush2.bf16.msra.mxu0 %v9779_v16  ;;  %v1636_v56 = vld [vmem:[#allocation7 + $0x1658] sm:$0xff]  ;;  %v9732_v20 = vcombine.high %v1508_v6, %v1512_v46  ;;  %v9731_v45 = vcombine.low %v1508_v6, %v1512_v46 }
 0x48d   :  { %8313 = vmatpush2.bf16.msra.mxu1 %v9907_v17  ;;  %8273 = vmatprep.subr.bf16.mxu0 %v9772_v9  ;;  %v1640_v28 = vld [vmem:[#allocation7 + $0x1678] sm:$0xff] }
 0x48e   :  { %8314 = vmatprep.subr.bf16.mxu1 %v9900_v1  ;;  %v9860_v47 = vcombine.high %v1636_v56, %v1640_v28  ;;  %v1500_v14 = vld [vmem:[#allocation7 + $0x1218] sm:$0xff]  ;;  %v9859_v7 = vcombine.low %v1636_v56, %v1640_v28 }
 0x48f   :  { %v1504_v12 = vld [vmem:[#allocation7 + $0x1238] sm:$0xff] }
 0x490   :  { %8274 = vmatpush2.bf16.msra.mxu0 %v9771_v55  ;;  %v1628_v57 = vld [vmem:[#allocation7 + $0x1618] sm:$0xff]  ;;  %v9724_v16 = vcombine.high %v1500_v14, %v1504_v12  ;;  %v9723_v42 = vcombine.low %v1500_v14, %v1504_v12 }
 0x491   :  { %8315 = vmatpush2.bf16.msra.mxu1 %v9899_v31  ;;  %8275 = vmatprep.subr.bf16.mxu0 %v9764_v61  ;;  %v1632_v13 = vld [vmem:[#allocation7 + $0x1638] sm:$0xff] }
 0x492   :  { %8316 = vmatprep.subr.bf16.mxu1 %v9892_v32  ;;  %v9852_v17 = vcombine.high %v1628_v57, %v1632_v13  ;;  %v1748_v9 = vld [vmem:[#allocation7 + $0x19d8] sm:$0xff]  ;;  %v9851_v51 = vcombine.low %v1628_v57, %v1632_v13 }
 0x493   :  { %v1752_v1 = vld [vmem:[#allocation7 + $0x19f8] sm:$0xff] }
 0x494   :  { %8276 = vmatpush2.bf16.msra.mxu0 %v9763_v38  ;;  %v1876_v37 = vld [vmem:[#allocation7 + $0x1dd8] sm:$0xff]  ;;  %v9972_v55 = vcombine.high %v1748_v9, %v1752_v1  ;;  %v9971_v34 = vcombine.low %v1748_v9, %v1752_v1 }
 0x495   :  { %8317 = vmatpush2.bf16.msra.mxu1 %v9891_v39  ;;  %8277 = vmatprep.subr.bf16.mxu0 %v9756_v15  ;;  %v1880_v29 = vld [vmem:[#allocation7 + $0x1df8] sm:$0xff] }
 0x496   :  { %8318 = vmatprep.subr.bf16.mxu1 %v9884_v40  ;;  %v10100_v31 = vcombine.high %v1876_v37, %v1880_v29  ;;  %v1740_v61 = vld [vmem:[#allocation7 + $0x1998] sm:$0xff]  ;;  %v10099_v36 = vcombine.low %v1876_v37, %v1880_v29 }
 0x497   :  { %v1744_v32 = vld [vmem:[#allocation7 + $0x19b8] sm:$0xff] }
 0x498   :  { %8278 = vmatpush2.bf16.msra.mxu0 %v9755_v4  ;;  %v1868_v35 = vld [vmem:[#allocation7 + $0x1d98] sm:$0xff]  ;;  %v9964_v38 = vcombine.high %v1740_v61, %v1744_v32 }
 0x499   :  { %8319 = vmatpush2.bf16.msra.mxu1 %v9883_v52  ;;  %8279 = vmatprep.subr.bf16.mxu0 %v9748_v10  ;;  %v1872_v21 = vld [vmem:[#allocation7 + $0x1db8] sm:$0xff]  ;;  %v9963_v52 = vcombine.low %v1740_v61, %v1744_v32 }
 0x49a   :  { %8320 = vmatprep.subr.bf16.mxu1 %v9876_v3  ;;  %v1732_v39 = vld [vmem:[#allocation7 + $0x1958] sm:$0xff]  ;;  %v10092_v43 = vcombine.high %v1868_v35, %v1872_v21  ;;  %v10091_v3 = vcombine.low %v1868_v35, %v1872_v21 }
 0x49b   :  { %v1736_v15 = vld [vmem:[#allocation7 + $0x1978] sm:$0xff] }
 0x49c   :  { %8280 = vmatpush2.bf16.msra.mxu0 %v9747_v25  ;;  %v1860_v2 = vld [vmem:[#allocation7 + $0x1d58] sm:$0xff]  ;;  %v9956_v53 = vcombine.high %v1732_v39, %v1736_v15  ;;  %v9955_v6 = vcombine.low %v1732_v39, %v1736_v15 }
 0x49d   :  { %8321 = vmatpush2.bf16.msra.mxu1 %v9875_v33  ;;  %8281 = vmatprep.subr.bf16.mxu0 %v9740_v18  ;;  %v1864_v49 = vld [vmem:[#allocation7 + $0x1d78] sm:$0xff] }
 0x49e   :  { %8322 = vmatprep.subr.bf16.mxu1 %v9868_v5  ;;  %v1724_v63 = vld [vmem:[#allocation7 + $0x1918] sm:$0xff] }
 0x49f   :  { %v1728_v25 = vld [vmem:[#allocation7 + $0x1938] sm:$0xff] }
 0x4a0   :  { %8282 = vmatpush2.bf16.msra.mxu0 %v9739_v58  ;;  %v1852_v33 = vld [vmem:[#allocation7 + $0x1d18] sm:$0xff]  ;;  %v9948_v56 = vcombine.high %v1724_v63, %v1728_v25  ;;  %v9947_v14 = vcombine.low %v1724_v63, %v1728_v25 }
 0x4a1   :  { %8323 = vmatpush2.bf16.msra.mxu1 %v9867_v62  ;;  %8283 = vmatprep.subr.bf16.mxu0 %v9732_v20  ;;  %v1856_v18 = vld [vmem:[#allocation7 + $0x1d38] sm:$0xff] }
 0x4a2   :  { %8324 = vmatprep.subr.bf16.mxu1 %v9860_v47  ;;  %v10076_v28 = vcombine.high %v1852_v33, %v1856_v18  ;;  %v1716_v58 = vld [vmem:[#allocation7 + $0x18d8] sm:$0xff]  ;;  %v10075_v12 = vcombine.low %v1852_v33, %v1856_v18 }
 0x4a3   :  { %v1720_v62 = vld [vmem:[#allocation7 + $0x18f8] sm:$0xff] }
 0x4a4   :  { %8284 = vmatpush2.bf16.msra.mxu0 %v9731_v45  ;;  %v1844_v20 = vld [vmem:[#allocation7 + $0x1cd8] sm:$0xff]  ;;  %v9940_v57 = vcombine.high %v1716_v58, %v1720_v62  ;;  %v9939_v9 = vcombine.low %v1716_v58, %v1720_v62 }
 0x4a5   :  { %8325 = vmatpush2.bf16.msra.mxu1 %v9859_v7  ;;  %8285 = vmatprep.subr.bf16.mxu0 %v9724_v16  ;;  %v1848_v47 = vld [vmem:[#allocation7 + $0x1cf8] sm:$0xff] }
 0x4a6   :  { %8326 = vmatprep.subr.bf16.mxu1 %v9852_v17  ;;  %v10068_v13 = vcombine.high %v1844_v20, %v1848_v47  ;;  %v1708_v45 = vld [vmem:[#allocation7 + $0x1898] sm:$0xff]  ;;  %v10067_v1 = vcombine.low %v1844_v20, %v1848_v47 }
 0x4a7   :  { %v1712_v7 = vld [vmem:[#allocation7 + $0x18b8] sm:$0xff] }
 0x4a8   :  { %8286 = vmatpush2.bf16.msra.mxu0 %v9723_v42  ;;  %v1836_v16 = vld [vmem:[#allocation7 + $0x1c98] sm:$0xff]  ;;  %v9932_v37 = vcombine.high %v1708_v45, %v1712_v7  ;;  %v9931_v61 = vcombine.low %v1708_v45, %v1712_v7 }
 0x4a9   :  { %8327 = vmatpush2.bf16.msra.mxu1 %v9851_v51  ;;  %8337 = vmatprep.subr.bf16.mxu0 %v9972_v55  ;;  %v1840_v17 = vld [vmem:[#allocation7 + $0x1cb8] sm:$0xff] }
 0x4aa   :  { %8378 = vmatprep.subr.bf16.mxu1 %v10100_v31  ;;  %v10060_v29 = vcombine.high %v1836_v16, %v1840_v17  ;;  %v1700_v42 = vld [vmem:[#allocation7 + $0x1858] sm:$0xff]  ;;  %v10059_v32 = vcombine.low %v1836_v16, %v1840_v17 }
 0x4ab   :  { %v8043_v40 = vpop.f32.mrf.mxu0  ;;  %8288 = vmatmul.mubr.bf16.vlgmr.msra.gmra.mxu0 %v10776_v19  ;;  %v1704_v51 = vld [vmem:[#allocation7 + $0x1878] sm:$0xff] }
 0x4ac   :  { %v8044_v50 = vadd.f32 %v8043_v40, %v10902_v48  ;;  %v8084_v4 = vpop.f32.mrf.mxu1  ;;  %8329 = vmatmul.mubr.bf16.vlgmr.msra.gmra.mxu1 %v10778_v26  ;;  %8338 = vmatpush1.bf16.msra.mxu0 %v9971_v34  ;;  %v10084_v48 = vcombine.high %v1860_v2, %v1864_v49  ;;  %v1828_v55 = vld [vmem:[#allocation7 + $0x1c58] sm:$0xff]  ;;  %v9924_v34 = vcombine.high %v1700_v42, %v1704_v51 }
 0x4ad   :  { %8369 = vmatprep.mubr.bf16.mxu0 %v10780_v30  ;;  %8379 = vmatpush1.bf16.msra.mxu1 %v10099_v36  ;;  %v8045_v10 = vpop.f32.mrf.mxu0  ;;  %v1832_v31 = vld [vmem:[#allocation7 + $0x1c78] sm:$0xff]  ;;  %v9923_v15 = vcombine.low %v1700_v42, %v1704_v51 }
 0x4ae   :  { %v10912_v60 = vadd.f32 %v8084_v4, %v8044_v50  ;;  %8410 = vmatprep.mubr.bf16.mxu1 %v10782_v0  ;;  %v8046_v19 = vadd.f32 %v8045_v10, %v10906_v8  ;;  %v8086_v22 = vpop.f32.mrf.mxu1  ;;  %8339 = vmatprep.subr.bf16.mxu0 %v9964_v38  ;;  %v10083_v0 = vcombine.low %v1860_v2, %v1864_v49  ;;  %v1692_v21 = vld [vmem:[#allocation7 + $0x1818] sm:$0xff] }
 0x4af   :  { %v8047_v26 = vpop.f32.mrf.mxu0  ;;  %8380 = vmatprep.subr.bf16.mxu1 %v10092_v43  ;;  %v10052_v35 = vcombine.high %v1828_v55, %v1832_v31  ;;  %v1696_v36 = vld [vmem:[#allocation7 + $0x1838] sm:$0xff]  ;;  %v10051_v40 = vcombine.low %v1828_v55, %v1832_v31 }
 0x4b0   :  { %v10916_v30 = vadd.f32 %v8086_v22, %v8046_v19  ;;  %v8088_v5 = vpop.f32.mrf.mxu1  ;;  %8340 = vmatpush1.bf16.msra.mxu0 %v9963_v52  ;;  %v1820_v38 = vld [vmem:[#allocation7 + $0x1c18] sm:$0xff]  ;;  %v9916_v43 = vcombine.high %v1692_v21, %v1696_v36  ;;  %v9915_v10 = vcombine.low %v1692_v21, %v1696_v36 }
 0x4b1   :  { %8381 = vmatpush1.bf16.msra.mxu1 %v10091_v3  ;;  %v8048_v46 = vpop.f32.mrf.mxu0  ;;  %8341 = vmatprep.subr.bf16.mxu0 %v9956_v53  ;;  %v1824_v39 = vld [vmem:[#allocation7 + $0x1c38] sm:$0xff] }
 0x4b2   :  { %v8089_v8 = vpop.f32.mrf.mxu1  ;;  %8382 = vmatprep.subr.bf16.mxu1 %v10084_v48  ;;  %v10044_v2 = vcombine.high %v1820_v38, %v1824_v39  ;;  %v1812_v49 = vld [vmem:[#allocation7 + $0x1bd8] sm:$0xff]  ;;  %v10043_v3 = vcombine.low %v1820_v38, %v1824_v39 }
 0x4b3   :  { %v1816_v50 = vld [vmem:[#allocation7 + $0x1bf8] sm:$0xff] }
 0x4b4   :  { %8342 = vmatpush1.bf16.msra.mxu0 %v9955_v6  ;;  %v1940_v4 = vld [vmem:[#allocation7 + $0x1fd8] sm:$0xff]  ;;  %v10036_v53 = vcombine.high %v1812_v49, %v1816_v50  ;;  %v10035_v26 = vcombine.low %v1812_v49, %v1816_v50 }
 0x4b5   :  { %8383 = vmatpush1.bf16.msra.mxu1 %v10083_v0  ;;  %8343 = vmatprep.subr.bf16.mxu0 %v9948_v56  ;;  %v1944_v52 = vld [vmem:[#allocation7 + $0x1ff8] sm:$0xff] }
 0x4b6   :  { %8384 = vmatprep.subr.bf16.mxu1 %v10076_v28  ;;  %v10164_v19 = vcombine.high %v1940_v4, %v1944_v52  ;;  %v1804_v22 = vld [vmem:[#allocation7 + $0x1b98] sm:$0xff]  ;;  %v10163_v33 = vcombine.low %v1940_v4, %v1944_v52 }
 0x4b7   :  { %v1808_v48 = vld [vmem:[#allocation7 + $0x1bb8] sm:$0xff] }
 0x4b8   :  { %8344 = vmatpush1.bf16.msra.mxu0 %v9947_v14  ;;  %v1932_v63 = vld [vmem:[#allocation7 + $0x1f98] sm:$0xff]  ;;  %v10028_v18 = vcombine.high %v1804_v22, %v1808_v48  ;;  %v10027_v8 = vcombine.low %v1804_v22, %v1808_v48 }
 0x4b9   :  { %8385 = vmatpush1.bf16.msra.mxu1 %v10075_v12  ;;  %8345 = vmatprep.subr.bf16.mxu0 %v9940_v57  ;;  %v1936_v25 = vld [vmem:[#allocation7 + $0x1fb8] sm:$0xff] }
 0x4ba   :  { %8386 = vmatprep.subr.bf16.mxu1 %v10068_v13  ;;  %v10156_v5 = vcombine.high %v1932_v63, %v1936_v25  ;;  %v1796_v6 = vld [vmem:[#allocation7 + $0x1b58] sm:$0xff]  ;;  %v10155_v28 = vcombine.low %v1932_v63, %v1936_v25 }
 0x4bb   :  { %v1800_v46 = vld [vmem:[#allocation7 + $0x1b78] sm:$0xff] }
 0x4bc   :  { %8346 = vmatpush1.bf16.msra.mxu0 %v9939_v9  ;;  %v1924_v0 = vld [vmem:[#allocation7 + $0x1f58] sm:$0xff]  ;;  %v10020_v58 = vcombine.high %v1796_v6, %v1800_v46  ;;  %v10019_v57 = vcombine.low %v1796_v6, %v1800_v46  ;;  %v10398_v6 = vld [vmem:[#allocation8] sm:$0xff] }
 0x4bd   :  { %8387 = vmatpush1.bf16.msra.mxu1 %v10067_v1  ;;  %8347 = vmatprep.subr.bf16.mxu0 %v9932_v37  ;;  %v1928_v56 = vld [vmem:[#allocation7 + $0x1f78] sm:$0xff]  ;;  %v1974_v46 = vrot.slane %v10398_v6, %v10729_v59 }
 0x4be   :  { %8388 = vmatprep.subr.bf16.mxu1 %v10060_v29  ;;  %v10148_v62 = vcombine.high %v1924_v0, %v1928_v56  ;;  %v1788_v20 = vld [vmem:[#allocation7 + $0x1b18] sm:$0xff]  ;;  %v10147_v13 = vcombine.low %v1924_v0, %v1928_v56  ;;  %v10334_v0 = vld [vmem:[#allocation10 + $0x38] sm:$0xff]  }
 0x4bf   :  { %v1792_v47 = vld [vmem:[#allocation7 + $0x1b38] sm:$0xff]  ;;  %v10335_v56 = vld [vmem:[#allocation10 + $0xb8] sm:$0xff]  }
 0x4c0   :  { %8348 = vmatpush1.bf16.msra.mxu0 %v9931_v61  ;;  %v1916_v14 = vld [vmem:[#allocation7 + $0x1f18] sm:$0xff]  ;;  %v10012_v45 = vcombine.high %v1788_v20, %v1792_v47  ;;  %v10011_v37 = vcombine.low %v1788_v20, %v1792_v47 }
 0x4c1   :  { %8389 = vmatpush1.bf16.msra.mxu1 %v10059_v32  ;;  %8349 = vmatprep.subr.bf16.mxu0 %v9924_v34  ;;  %v1920_v12 = vld [vmem:[#allocation7 + $0x1f38] sm:$0xff] }
 0x4c2   :  { %8390 = vmatprep.subr.bf16.mxu1 %v10052_v35  ;;  %v10140_v7 = vcombine.high %v1916_v14, %v1920_v12  ;;  %v1780_v16 = vld [vmem:[#allocation7 + $0x1ad8] sm:$0xff]  ;;  %v10139_v29 = vcombine.low %v1916_v14, %v1920_v12 }
 0x4c3   :  { %v1784_v17 = vld [vmem:[#allocation7 + $0x1af8] sm:$0xff] }
 0x4c4   :  { %8350 = vmatpush1.bf16.msra.mxu0 %v9923_v15  ;;  %v1908_v9 = vld [vmem:[#allocation7 + $0x1ed8] sm:$0xff]  ;;  %v10004_v42 = vcombine.high %v1780_v16, %v1784_v17  ;;  %v10003_v34 = vcombine.low %v1780_v16, %v1784_v17 }
 0x4c5   :  { %8391 = vmatpush1.bf16.msra.mxu1 %v10051_v40  ;;  %8351 = vmatprep.subr.bf16.mxu0 %v9916_v43  ;;  %v1912_v1 = vld [vmem:[#allocation7 + $0x1ef8] sm:$0xff] }
 0x4c6   :  { %8392 = vmatprep.subr.bf16.mxu1 %v10044_v2  ;;  %v10132_v51 = vcombine.high %v1908_v9, %v1912_v1  ;;  %v1772_v55 = vld [vmem:[#allocation7 + $0x1a98] sm:$0xff]  ;;  %v10131_v35 = vcombine.low %v1908_v9, %v1912_v1  ;;  %v10343_v1 = vld [vmem:[#allocation10 + $0xa8] sm:$0xff]  }
 0x4c7   :  { %v1776_v31 = vld [vmem:[#allocation7 + $0x1ab8] sm:$0xff] }
 0x4c8   :  { %8352 = vmatpush1.bf16.msra.mxu0 %v9915_v10  ;;  %v1900_v61 = vld [vmem:[#allocation7 + $0x1e98] sm:$0xff]  ;;  %v9996_v21 = vcombine.high %v1772_v55, %v1776_v31  ;;  %v9995_v43 = vcombine.low %v1772_v55, %v1776_v31  ;;  %v10347_v55 = vld [vmem:[#allocation10 + $0xa0] sm:$0xff]   ;;  %v10348_v31 = vld [vmem:[#allocation10 + $0x58] sm:$0xff]  }
 0x4c9   :  { %8393 = vmatpush1.bf16.msra.mxu1 %v10043_v3  ;;  %8353 = vmatprep.subr.bf16.mxu0 %v10036_v53  ;;  %v1904_v32 = vld [vmem:[#allocation7 + $0x1eb8] sm:$0xff] }
 0x4ca   :  { %8394 = vmatprep.subr.bf16.mxu1 %v10164_v19  ;;  %v10124_v36 = vcombine.high %v1900_v61, %v1904_v32  ;;  %v1764_v38 = vld [vmem:[#allocation7 + $0x1a58] sm:$0xff]  ;;  %v10123_v2 = vcombine.low %v1900_v61, %v1904_v32  ;;  %v10349_v61 = vld [vmem:[#allocation10 + $0xd8] sm:$0xff]  }
 0x4cb   :  { %v1768_v39 = vld [vmem:[#allocation7 + $0x1a78] sm:$0xff]  ;;  %v10350_v32 = vld [vmem:[#allocation10 + $0x18] sm:$0xff]  }
 0x4cc   :  { %8354 = vmatpush2.bf16.msra.mxu0 %v10035_v26  ;;  %v1892_v15 = vld [vmem:[#allocation7 + $0x1e58] sm:$0xff]  ;;  %v9988_v49 = vcombine.high %v1764_v38, %v1768_v39  ;;  %v9987_v53 = vcombine.low %v1764_v38, %v1768_v39  ;;  %v10332_v26 = vld [vmem:[#allocation10 + $0x78] sm:$0xff]   ;;  %v10356_v39 = vld [vmem:[#allocation10 + $0x48] sm:$0xff]  }
 0x4cd   :  { %8395 = vmatpush2.bf16.msra.mxu1 %v10163_v33  ;;  %8355 = vmatprep.subr.bf16.mxu0 %v10028_v18  ;;  %v1896_v40 = vld [vmem:[#allocation7 + $0x1e78] sm:$0xff]  ;;  %v10333_v33 = vld [vmem:[#allocation10 + $0xf8] sm:$0xff]   ;;  %v8420_v18 = vmax.f32 %v10836_v41, 0.0 }
 0x4ce   :  { %8396 = vmatprep.subr.bf16.mxu1 %v10156_v5  ;;  %v10116_v50 = vcombine.high %v1892_v15, %v1896_v40  ;;  %v1756_v4 = vld [vmem:[#allocation7 + $0x1a18] sm:$0xff]  ;;  %v10115_v19 = vcombine.low %v1892_v15, %v1896_v40  ;;  %v8422_v5 = vmax.f32 %v10876_v24, 0.0  ;;  %v10357_v15 = vld [vmem:[#allocation10 + $0xc8] sm:$0xff]  }
 0x4cf   :  { %v1760_v52 = vld [vmem:[#allocation7 + $0x1a38] sm:$0xff]  ;;  %v10358_v40 = vld [vmem:[#allocation10 + $0x8] sm:$0xff]  }
 0x4d0   :  { %8356 = vmatpush2.bf16.msra.mxu0 %v10027_v8  ;;  %v1884_v10 = vld [vmem:[#allocation7 + $0x1e18] sm:$0xff]  ;;  %v9980_v22 = vcombine.high %v1756_v4, %v1760_v52  ;;  %v9979_v63 = vcombine.low %v1756_v4, %v1760_v52  ;;  %v1978_v8 = vrot.slane %v10398_v6, %v10712_v54  ;;  %v8430_v41 = vpack.c.bf16 %v8422_v5, %v8422_v5  ;;  %v10363_v52 = vld [vmem:[#allocation10 + $0x80] sm:$0xff]   ;;  %v10384_v5 = vld [vmem:[#allocation10 + $0x1e8] sm:$0xff]  }
 0x4d1   :  { %8397 = vmatpush2.bf16.msra.mxu1 %v10155_v28  ;;  %8357 = vmatprep.subr.bf16.mxu0 %v10020_v58  ;;  %v1888_v3 = vld [vmem:[#allocation7 + $0x1e38] sm:$0xff]  ;;  %v8428_v58 = vpack.c.bf16 %v8420_v18, %v8420_v18  ;;  %v8419_v4 = vmax.f32 %v10832_v27, 0.0  ;;  %v10369_v6 = vld [vmem:[#allocation10 + $0x128] sm:$0xff]  }
 0x4d2   :  { %8398 = vmatprep.subr.bf16.mxu1 %v10148_v62  ;;  %v10108_v48 = vcombine.high %v1884_v10, %v1888_v3  ;;  %v10107_v25 = vcombine.low %v1884_v10, %v1888_v3  ;;  %v10336_v28 = vld [vmem:[#allocation10 + $0x70] sm:$0xff]   ;;  %v10364_v10 = vld [vmem:[#allocation10 + $0x178] sm:$0xff]   ;;  %v8421_v3 = vmax.f32 %v10872_v23, 0.0  ;;  %v10368_v23 = vld [vmem:[#allocation10 + $0x168] sm:$0xff]  }
 0x4d3   :  { %v10337_v20 = vld [vmem:[#allocation10 + $0xf0] sm:$0xff]  }
 0x4d4   :  { %8358 = vmatpush2.bf16.msra.mxu0 %v10019_v57  ;;  %v10338_v59 = vld [vmem:[#allocation10 + $0x30] sm:$0xff]   ;;  %v10340_v57 = vld [vmem:[#allocation10 + $0x68] sm:$0xff]  }
 0x4d5   :  { %8399 = vmatpush2.bf16.msra.mxu1 %v10147_v13  ;;  %8359 = vmatprep.subr.bf16.mxu0 %v10012_v45  ;;  %v10339_v12 = vld [vmem:[#allocation10 + $0xb0] sm:$0xff]  }
 0x4d6   :  { %8400 = vmatprep.subr.bf16.mxu1 %v10140_v7  ;;  %v10355_v38 = vld [vmem:[#allocation10 + $0x90] sm:$0xff]  }
 0x4d7   :  { %v10367_v18 = vld [vmem:[#allocation10 + $0x130] sm:$0xff]  }
 0x4d8   :  { %8360 = vmatpush2.bf16.msra.mxu0 %v10011_v37  ;;  %v10344_v37 = vld [vmem:[#allocation10 + $0x60] sm:$0xff]  }
 0x4d9   :  { %8401 = vmatpush2.bf16.msra.mxu1 %v10139_v29  ;;  %8361 = vmatprep.subr.bf16.mxu0 %v10004_v42  ;;  %v10345_v42 = vld [vmem:[#allocation10 + $0xe0] sm:$0xff]  }
 0x4da   :  { %8402 = vmatprep.subr.bf16.mxu1 %v10132_v51  ;;  %v10346_v51 = vld [vmem:[#allocation10 + $0x20] sm:$0xff]  }
 0x4dc   :  { %8362 = vmatpush2.bf16.msra.mxu0 %v10003_v34  ;;  %v10351_v34 = vld [vmem:[#allocation10 + $0x98] sm:$0xff]  }
 0x4dd   :  { %8403 = vmatpush2.bf16.msra.mxu1 %v10131_v35  ;;  %8363 = vmatprep.subr.bf16.mxu0 %v9996_v21  ;;  %v10352_v35 = vld [vmem:[#allocation10 + $0x50] sm:$0xff]  }
 0x4de   :  { %8404 = vmatprep.subr.bf16.mxu1 %v10124_v36  ;;  %v10353_v21 = vld [vmem:[#allocation10 + $0xd0] sm:$0xff]  }
 0x4df   :  { %v10354_v36 = vld [vmem:[#allocation10 + $0x10] sm:$0xff]  }
 0x4e0   :  { %8364 = vmatpush2.bf16.msra.mxu0 %v9995_v43  ;;  %v10359_v43 = vld [vmem:[#allocation10 + $0x88] sm:$0xff]  }
 0x4e1   :  { %8405 = vmatpush2.bf16.msra.mxu1 %v10123_v2  ;;  %8365 = vmatprep.subr.bf16.mxu0 %v9988_v49  ;;  %v10360_v2 = vld [vmem:[#allocation10 + $0x40] sm:$0xff]  }
 0x4e2   :  { %8406 = vmatprep.subr.bf16.mxu1 %v10116_v50  ;;  %v10361_v49 = vld [vmem:[#allocation10 + $0xc0] sm:$0xff]  }
 0x4e3   :  { %v10362_v50 = vld [vmem:[#allocation10] sm:$0xff]  }
 0x4e4   :  { %8366 = vmatpush2.bf16.msra.mxu0 %v9987_v53  ;;  %v10380_v53 = vld [vmem:[#allocation10 + $0x1f8] sm:$0xff]  }
 0x4e5   :  { %8407 = vmatpush2.bf16.msra.mxu1 %v10115_v19  ;;  %8367 = vmatprep.subr.bf16.mxu0 %v9980_v22  ;;  %v8424_v19 = vmax.f32 %v10916_v30, 0.0  ;;  %v10365_v22 = vld [vmem:[#allocation10 + $0x138] sm:$0xff]   ;;  %v10383_v30 = vld [vmem:[#allocation10 + $0x1b0] sm:$0xff]  }
 0x4e6   :  { %8408 = vmatprep.subr.bf16.mxu1 %v10108_v48  ;;  %v8427_v48 = vpack.c.bf16 %v8419_v4, %v8419_v4 }
 0x4e7   :  { %v8432_v27 = vpack.c.bf16 %v8424_v19, %v8424_v19 }
 0x4e8   :  { %8368 = vmatpush2.bf16.msra.mxu0 %v9979_v63  ;;  %v10366_v63 = vld [vmem:[#allocation10 + $0x170] sm:$0xff]  }
 0x4e9   :  { %8409 = vmatpush2.bf16.msra.mxu1 %v10107_v25  ;;  %10230 = vmatprep.subr.bf16.mxu0 %v10332_v26  ;;  %v8429_v25 = vpack.c.bf16 %v8421_v3, %v8421_v3  ;;  %v10381_v26 = vld [vmem:[#allocation10 + $0x1b8] sm:$0xff]  }
 0x4ea   :  { %10252 = vmatprep.subr.bf16.mxu1 %v10333_v33  ;;  %v10382_v33 = vld [vmem:[#allocation10 + $0x1f0] sm:$0xff]  }
 0x4eb   :  { %v8125_v62 = vpop.f32.mrf.mxu0  ;;  %8370 = vmatmul.mubr.bf16.vlgmr.msra.gmra.mxu0 %v10795_v11  ;;  %v10341_v11 = vld [vmem:[#allocation10 + $0xe8] sm:$0xff]  }
 0x4ec   :  { %v8126_v47 = vadd.f32 %v8125_v62, %v1974_v46  ;;  %v8166_v24 = vpop.f32.mrf.mxu1  ;;  %8411 = vmatmul.mubr.bf16.vlgmr.msra.gmra.mxu1 %v10797_v44  ;;  %10231 = vmatpush3.bf16.msra.mxu0 %v10334_v0  ;;  %v10342_v44 = vld [vmem:[#allocation10 + $0x28] sm:$0xff]   ;;  %v10370_v46 = vld [vmem:[#allocation10 + $0x160] sm:$0xff]   ;;  %v10388_v62 = vld [vmem:[#allocation10 + $0x1d8] sm:$0xff]  }
 0x4ed   :  { %8986 = vmatprep.mubr.bf16.mxu0 %v8428_v58  ;;  %10253 = vmatpush3.bf16.msra.mxu1 %v10335_v56  ;;  %v8127_v14 = vpop.f32.mrf.mxu0  ;;  %v10385_v0 = vld [vmem:[#allocation10 + $0x1a8] sm:$0xff]   ;;  %v10386_v56 = vld [vmem:[#allocation10 + $0x1e0] sm:$0xff]  }
 0x4ee   :  { %v10924_v13 = vadd.f32 %v8166_v24, %v8126_v47  ;;  %9026 = vmatprep.mubr.bf16.mxu1 %v8430_v41  ;;  %v8128_v54 = vadd.f32 %v8127_v14, %v1978_v8  ;;  %v8168_v45 = vpop.f32.mrf.mxu1  ;;  %10232 = vmatprep.subr.bf16.mxu0 %v10336_v28  ;;  %v10371_v8 = vld [vmem:[#allocation10 + $0x120] sm:$0xff]   ;;  %v10372_v28 = vld [vmem:[#allocation10 + $0x158] sm:$0xff]   ;;  %v10374_v41 = vld [vmem:[#allocation10 + $0x150] sm:$0xff]  }
 0x4ef   :  { %v8129_v7 = vpop.f32.mrf.mxu0  ;;  %10254 = vmatprep.subr.bf16.mxu1 %v10337_v20  ;;  %v10387_v58 = vld [vmem:[#allocation10 + $0x1a0] sm:$0xff]   ;;  %v10373_v20 = vld [vmem:[#allocation10 + $0x118] sm:$0xff]   ;;  %v10375_v24 = vld [vmem:[#allocation10 + $0x110] sm:$0xff]  }
 0x4f0   :  { %v10926_v16 = vadd.f32 %v8168_v45, %v8128_v54  ;;  %v8170_v17 = vpop.f32.mrf.mxu1  ;;  %10233 = vmatpush3.bf16.msra.mxu0 %v10338_v59  ;;  %v10389_v47 = vld [vmem:[#allocation10 + $0x198] sm:$0xff]   ;;  %v10376_v59 = vld [vmem:[#allocation10 + $0x148] sm:$0xff]   ;;  %v8423_v54 = vmax.f32 %v10912_v60, 0.0  ;;  %v10390_v7 = vld [vmem:[#allocation10 + $0x1d0] sm:$0xff]  }
 0x4f1   :  { %10255 = vmatpush3.bf16.msra.mxu1 %v10339_v12  ;;  %v8130_v9 = vpop.f32.mrf.mxu0  ;;  %10234 = vmatprep.subr.bf16.mxu0 %v10340_v57  ;;  %v10377_v14 = vld [vmem:[#allocation10 + $0x108] sm:$0xff]   ;;  %v10378_v12 = vld [vmem:[#allocation10 + $0x140] sm:$0xff]  }
 0x4f2   :  { %v8171_v29 = vpop.f32.mrf.mxu1  ;;  %10256 = vmatprep.subr.bf16.mxu1 %v10341_v11  ;;  %v10379_v57 = vld [vmem:[#allocation10 + $0x100] sm:$0xff]   ;;  %v8431_v45 = vpack.c.bf16 %v8423_v54, %v8423_v54  ;;  %v10391_v9 = vld [vmem:[#allocation10 + $0x190] sm:$0xff]  }
 0x4f4   :  { %10235 = vmatpush3.bf16.msra.mxu0 %v10342_v44 }
 0x4f5   :  { %10257 = vmatpush3.bf16.msra.mxu1 %v10343_v1  ;;  %10236 = vmatprep.subr.bf16.mxu0 %v10344_v37 }
 0x4f6   :  { %10258 = vmatprep.subr.bf16.mxu1 %v10345_v42 }
 0x4f8   :  { %10237 = vmatpush3.bf16.msra.mxu0 %v10346_v51 }
 0x4f9   :  { %10259 = vmatpush3.bf16.msra.mxu1 %v10347_v55  ;;  %10238 = vmatprep.subr.bf16.mxu0 %v10348_v31  ;;  %v10392_v55 = vld [vmem:[#allocation10 + $0x1c8] sm:$0xff]  }
 0x4fa   :  { %10260 = vmatprep.subr.bf16.mxu1 %v10349_v61  ;;  %v10393_v61 = vld [vmem:[#allocation10 + $0x188] sm:$0xff]  }
 0x4fc   :  { %10239 = vmatpush3.bf16.msra.mxu0 %v10350_v32 }
 0x4fd   :  { %10261 = vmatpush3.bf16.msra.mxu1 %v10351_v34  ;;  %10240 = vmatprep.subr.bf16.mxu0 %v10352_v35  ;;  %v10394_v35 = vld [vmem:[#allocation10 + $0x1c0] sm:$0xff]  }
 0x4fe   :  { %10262 = vmatprep.subr.bf16.mxu1 %v10353_v21 }
 0x500   :  { %10241 = vmatpush3.bf16.msra.mxu0 %v10354_v36 }
 0x501   :  { %10263 = vmatpush3.bf16.msra.mxu1 %v10355_v38  ;;  %10242 = vmatprep.subr.bf16.mxu0 %v10356_v39 }
 0x502   :  { %10264 = vmatprep.subr.bf16.mxu1 %v10357_v15 }
 0x504   :  { %10243 = vmatpush3.bf16.msra.mxu0 %v10358_v40 }
 0x505   :  { %10265 = vmatpush3.bf16.msra.mxu1 %v10359_v43  ;;  %10244 = vmatprep.subr.bf16.mxu0 %v10360_v2 }
 0x506   :  { %10266 = vmatprep.subr.bf16.mxu1 %v10361_v49 }
 0x508   :  { %10245 = vmatpush3.bf16.msra.mxu0 %v10362_v50 }
 0x509   :  { %10267 = vmatpush3.bf16.msra.mxu1 %v10363_v52  ;;  %10274 = vmatprep.subr.bf16.mxu0 %v10364_v10 }
 0x50a   :  { %10296 = vmatprep.subr.bf16.mxu1 %v10380_v53 }
 0x50b   :  { %8987 = vmatmul.mubr.bf16.vlgmr.msra.gmra.mxu0 %v8427_v48 }
 0x50c   :  { %9027 = vmatmul.mubr.bf16.vlgmr.msra.gmra.mxu1 %v8429_v25  ;;  %10275 = vmatpush3.bf16.msra.mxu0 %v10365_v22 }
 0x50d   :  { %9066 = vmatprep.mubr.bf16.mxu0 %v8432_v27  ;;  %10276 = vmatprep.subr.bf16.mxu0 %v10366_v63 }
 0x50e   :  { %10297 = vmatpush3.bf16.msra.mxu1 %v10381_v26 }
 0x50f   :  { %10298 = vmatprep.subr.bf16.mxu1 %v10382_v33 }
 0x510   :  { %10277 = vmatpush3.bf16.msra.mxu0 %v10367_v18 }
 0x511   :  { %10278 = vmatprep.subr.bf16.mxu0 %v10368_v23 }
 0x512   :  { %10299 = vmatpush3.bf16.msra.mxu1 %v10383_v30 }
 0x513   :  { %10300 = vmatprep.subr.bf16.mxu1 %v10384_v5 }
 0x514   :  { %10279 = vmatpush3.bf16.msra.mxu0 %v10369_v6 }
 0x515   :  { %10280 = vmatprep.subr.bf16.mxu0 %v10370_v46 }
 0x516   :  { %10301 = vmatpush3.bf16.msra.mxu1 %v10385_v0  ;;  %v10165_v0 = vld [vmem:[#allocation11] ss:$0 sm:$0xff] }
 0x517   :  { %10302 = vmatprep.subr.bf16.mxu1 %v10386_v56 }
 0x518   :  { %10281 = vmatpush3.bf16.msra.mxu0 %v10371_v8 }
 0x519   :  { %10282 = vmatprep.subr.bf16.mxu0 %v10372_v28 }
 0x51a   :  { %10303 = vmatpush3.bf16.msra.mxu1 %v10387_v58 }
 0x51b   :  { %10304 = vmatprep.subr.bf16.mxu1 %v10388_v62 }
 0x51c   :  { %10283 = vmatpush3.bf16.msra.mxu0 %v10373_v20 }
 0x51d   :  { %10284 = vmatprep.subr.bf16.mxu0 %v10374_v41 }
 0x51e   :  { %10305 = vmatpush3.bf16.msra.mxu1 %v10389_v47 }
 0x51f   :  { %10306 = vmatprep.subr.bf16.mxu1 %v10390_v7 }
 0x520   :  { %10285 = vmatpush3.bf16.msra.mxu0 %v10375_v24 }
 0x521   :  { %10286 = vmatprep.subr.bf16.mxu0 %v10376_v59 }
 0x522   :  { %10307 = vmatpush3.bf16.msra.mxu1 %v10391_v9 }
 0x523   :  { %10308 = vmatprep.subr.bf16.mxu1 %v10392_v55 }
 0x524   :  { %10287 = vmatpush3.bf16.msra.mxu0 %v10377_v14 }
 0x525   :  { %10288 = vmatprep.subr.bf16.mxu0 %v10378_v12 }
 0x526   :  { %10309 = vmatpush3.bf16.msra.mxu1 %v10393_v61 }
 0x527   :  { %10310 = vmatprep.subr.bf16.mxu1 %v10394_v35 }
 0x528   :  { %10289 = vmatpush3.bf16.msra.mxu0 %v10379_v57 }
 0x52b   :  { %v8207_v11 = vpop.f32.mrf.mxu0  ;;  %9067 = vmatmul.mubr.bf16.vlgmr.msra.gmra.mxu0 %v8431_v45 }
 0x52c   :  { %v8208_v17 = vadd.f32 %v8207_v11, %v10924_v13  ;;  %v8248_v44 = vpop.f32.mrf.mxu1  ;;  %v10395_v13 = vld [vmem:[#allocation10 + $0x180] sm:$0xff]  }
 0x52d   :  { %v8209_v1 = vpop.f32.mrf.mxu0  ;;  %10311 = vmatpush3.bf16.msra.mxu1 %v10395_v13 }
 0x52e   :  { %v8249_v37 = vadd.f32 %v8248_v44, %v8208_v17  ;;  %v8210_v29 = vadd.f32 %v8209_v1, %v10926_v16  ;;  %v8250_v42 = vpop.f32.mrf.mxu1 }
 0x52f   :  { %v8211_v51 = vpop.f32.mrf.mxu0 }
 0x530   :  { %v8251_v60 = vadd.f32 %v8250_v42, %v8210_v29  ;;  %v8252_v31 = vpop.f32.mrf.mxu1 }
 0x531   :  { %v8212_v32 = vpop.f32.mrf.mxu0 }
 0x532   :  { %v8253_v34 = vpop.f32.mrf.mxu1 }
 0x56b   :  { %v8289_v21 = vpop.f32.mrf.mxu0 }
 0x56c   :  { %v8290_v36 = vadd.f32 %v8289_v21, %v8249_v37  ;;  %v8330_v38 = vpop.f32.mrf.mxu1 }
 0x56d   :  { %v8291_v39 = vpop.f32.mrf.mxu0 }
 0x56e   :  { %v8331_v16 = vadd.f32 %v8330_v38, %v8290_v36  ;;  %v8332_v15 = vpop.f32.mrf.mxu1  ;;  %v8292_v50 = vadd.f32 %v8291_v39, %v8251_v60 }
 0x56f   :  { %v8293_v40 = vpop.f32.mrf.mxu0 }
 0x570   :  { %v8334_v43 = vpop.f32.mrf.mxu1  ;;  %v8333_v52 = vadd.f32 %v8332_v15, %v8292_v50 }
 0x571   :  { %v8294_v2 = vpop.f32.mrf.mxu0 }
 0x572   :  { %v8335_v49 = vpop.f32.mrf.mxu1 }
 0x5ab   :  { %v8371_v4 = vpop.f32.mrf.mxu0 }
 0x5ac   :  { %v8372_v10 = vadd.f32 %v8371_v4, %v8331_v16  ;;  %v8412_v3 = vpop.f32.mrf.mxu1 }
 0x5ad   :  { %v8373_v53 = vpop.f32.mrf.mxu0 }
 0x5ae   :  { %v8413_v19 = vadd.f32 %v8412_v3, %v8372_v10  ;;  %v8374_v22 = vadd.f32 %v8373_v53, %v8333_v52  ;;  %v8414_v48 = vpop.f32.mrf.mxu1 }
 0x5af   :  { %v8375_v63 = vpop.f32.mrf.mxu0 }
 0x5b0   :  { %v8415_v25 = vadd.f32 %v8414_v48, %v8374_v22  ;;  %v8416_v26 = vpop.f32.mrf.mxu1  ;;  %v8425_v27 = vmax.f32 %v8413_v19, 0.0 }
 0x5b1   :  { %v8376_v33 = vpop.f32.mrf.mxu0 }
 0x5b2   :  { %v8426_v18 = vmax.f32 %v8415_v25, 0.0  ;;  %v8417_v23 = vpop.f32.mrf.mxu1  ;;  %v8433_v5 = vpack.c.bf16 %v8425_v27, %v8425_v27 }
 0x5b4   :  { %v8434_v30 = vpack.c.bf16 %v8426_v18, %v8426_v18 }
 0x5b6   :  { %9106 = vmatprep.mubr.bf16.mxu1 %v8434_v30 }
 0x5b7   :  { %9107 = vmatmul.mubr.bf16.vlgmr.msra.gmra.mxu1 %v8433_v5 }
 0x5cb   :  { %v10246_v6 = vpop.f32.mrf.mxu0 }
 0x5cc   :  { %v10268_v46 = vpop.f32.mrf.mxu1 }
 0x5cd   :  { %v10247_v56 = vpop.f32.mrf.mxu0 }
 0x5ce   :  { %v10248_v8 = vadd.f32 %v10247_v56, %v10246_v6  ;;  %v10269_v28 = vpop.f32.mrf.mxu1 }
 0x5cf   :  { %v10270_v58 = vadd.f32 %v10269_v28, %v10268_v46  ;;  %v10249_v62 = vpop.f32.mrf.mxu0 }
 0x5d0   :  { %v8989_v20 = vadd.f32 %v10248_v8, %v10165_v0  ;;  %v10271_v41 = vpop.f32.mrf.mxu1 }
 0x5d1   :  { %v10250_v47 = vpop.f32.mrf.mxu0 }
 0x5d2   :  { %v9029_v24 = vadd.f32 %v10270_v58, %v8989_v20  ;;  %v10272_v59 = vpop.f32.mrf.mxu1 }
 0x5eb   :  { %v10290_v14 = vpop.f32.mrf.mxu0 }
 0x5ed   :  { %v10291_v12 = vpop.f32.mrf.mxu0 }
 0x5ee   :  { %v10292_v57 = vadd.f32 %v10291_v12, %v10290_v14 }
 0x5ef   :  { %v10293_v54 = vpop.f32.mrf.mxu0 }
 0x5f0   :  { %v9069_v45 = vadd.f32 %v10292_v57, %v9029_v24 }
 0x5f1   :  { %v10294_v11 = vpop.f32.mrf.mxu0 }
 0x677   :  { %v10312_v7 = vpop.f32.mrf.mxu1 }
 0x679   :  { %v10313_v17 = vpop.f32.mrf.mxu1 }
 0x67a   :  { %v10314_v44 = vadd.f32 %v10313_v17, %v10312_v7 }
 0x67b   :  { %v10315_v9 = vpop.f32.mrf.mxu1 }
 0x67c   :  { %v9109_v1 = vadd.f32 %v10314_v44, %v9069_v45 }
 0x67d   :  { %v10316_v37 = vpop.f32.mrf.mxu1 }
 0x67e   :  { %9114 = vst [vmem:[#allocation13] sm:$0x3] %v9109_v1 }
 0x67f   :  { %10530 = shalt.err (!%p10527_p6)
}
 0x680   :  { %9124 = dma.vmem_to_hbm [thread:$0]  %s9122_s11, 32, %s10944_s7, [#allocation4]  }
 0x681   :  { %10547 = dma.done.wait [#allocation4], 32  }
 0x682   :  { %10548 = vsyncadd [#allocation4], 4294967264 }
 0x683   :  { %9128 = vsyncpa [#allocation3], 1 }
 0x684   :  { %9129 = vsyncpa [#allocation6], 1 }
 0x685   :  { %9130 = vsyncpa [#allocation9], 1 }
 0x686   :  { %9131 = vsyncpa [#allocation12], 1 }
 0x687   :  { %9132 = vsyncpa [#allocation4], 1 }

</bundles_post_ra>
